<compile_context>
chip_gen: v6e
topology: v6e:2x2x1
jax: 0.10.0
libtpu: 0.0.40
codegen_flags: <defaults>
</compile_context>

<pallas_src>
import functools

import jax
import jax.numpy as jnp
from jax.experimental import pallas as pl
from jax.experimental.pallas import tpu as pltpu


def _bn_inception_kernel(xp_ref, w_ref, b_ref, o_ref, *, H, W):
    # xp_ref: (1, Hp, Wpp, C)  padded NHWC bf16 input (pad 2 left/top, >=2 right/bottom)
    # w_ref : (5, C, 120)      per-kw weight slabs; cols kh*24:(kh+1)*24 = fused tap (kh,kw)
    # b_ref : (1, 24)          concatenated biases [b0 | b1 | b2] (f32)
    # o_ref : (1, 24, H*W)     channel-major, flat-spatial output (lane dense)
    Hp = xp_ref.shape[1]
    C = xp_ref.shape[3]
    HW = H * W

    xp = xp_ref[0]  # (Hp, Wpp, C)

    # One relayout copy per kw shift (5 total, bf16): rows r = (h', w) with
    # x_slab(kw)[r, :] = xp[h', kw + w, :].
    def x_slab(kw):
        return xp[:, kw:kw + W, :].reshape(Hp * W, C)

    # Fused matmul: kh folded into N (120 cols), kw accumulated over 5 taps.
    # 5 MXU matmuls of (Hp*W, C) x (C, 120) into one f32 accumulator.
    acc = jnp.dot(x_slab(0), w_ref[0], preferred_element_type=jnp.float32)
    for kw in range(1, 5):
        acc = acc + jnp.dot(x_slab(kw), w_ref[kw],
                            preferred_element_type=jnp.float32)

    # kh combine: out[h*W+w, co] = bias[co] + sum_kh acc[(h+kh)*W + w, kh*24+co].
    # Row shift kh*W is sublane-aligned (W = 16); the 24-wide lane-group slices
    # are handled by the XLU (off the MXU critical path). Bias folded into the
    # init (single broadcast outside the loop).
    out = jnp.broadcast_to(b_ref[...], (HW, 24)).astype(jnp.float32)
    for kh in range(5):
        out = out + acc[kh * W: kh * W + HW, kh * 24: kh * 24 + 24]

    # (HW, 24) -> (24, HW): lane-dense store (HW = 256 lanes -> unmasked vst);
    # the wrapper recovers NCHW with a free metadata reshape.
    o_ref[0] = out.T.astype(o_ref.dtype)


def bn_inception(x_nchw, w0, b0, w1, b1, w2, b2):
    """x_nchw: (N, 256, H, W); weights in PyTorch layout (Cout, Cin, kh, kw)."""
    N, C, H, W = x_nchw.shape
    assert C == 256
    HW = H * W
    Hp = H + 4
    Wpp = ((W + 4 + 7) // 8) * 8  # pad W+4 up to a multiple of 8 (sublane align)

    # NCHW -> NHWC in bf16 (halves wrapper HBM traffic and MXU passes), then
    # zero-pad the spatial dims (2 for the 5x5/pad=2 branch, extra on the right
    # for sublane alignment; the extra columns are never read by the kernel).
    x = jnp.transpose(x_nchw.astype(jnp.bfloat16), (0, 2, 3, 1))
    xp = jnp.pad(x, ((0, 0), (2, 2), (2, Wpp - W - 2), (0, 0)))

    # Fuse the three branches into one zero-padded (5, 5, C, 24) HWIO weight.
    # Output channel order matches torch.cat((x0, x1, x2), 1):
    #   0:8   = 1x1 branch (fused tap (2, 2))
    #   8:16  = 3x3 branch (fused taps (1:4, 1:4))
    #   16:24 = 5x5 branch (full 5x5 support)
    def to_hwio(w):  # (Cout, Cin, kh, kw) -> (kh, kw, Cin, Cout)
        return jnp.transpose(w, (2, 3, 1, 0))

    wf = jnp.zeros((5, 5, C, 24), jnp.float32)  # (kh, kw, C, cout)
    wf = wf.at[2, 2, :, 0:8].set(to_hwio(w0)[0, 0])
    wf = wf.at[1:4, 1:4, :, 8:16].set(to_hwio(w1))
    wf = wf.at[:, :, :, 16:24].set(to_hwio(w2))
    # Repack to per-kw slabs with kh folded into N:
    #   wpk[kw, c, kh*24 + co] = wf[kh, kw, c, co]
    wpk = jnp.transpose(wf, (1, 2, 0, 3)).reshape(5, C, 5 * 24).astype(jnp.bfloat16)
    bias = jnp.concatenate([b0, b1, b2]).reshape(1, 24).astype(jnp.float32)

    kernel = functools.partial(_bn_inception_kernel, H=H, W=W)

    # Grid over images: keeps >=2 steps for v7x's two TensorCores at N=2.
    # For larger N, batch several images per step (block (Nb,Hp,Wpp,C)) to
    # amortize the ~0.35us per-step overhead.
    out = pl.pallas_call(
        kernel,
        out_shape=jax.ShapeDtypeStruct((N, 24, HW), jnp.float32),
        grid_spec=pltpu.PrefetchScalarGridSpec(
            num_scalar_prefetch=0,
            grid=(N,),
            in_specs=[
                pl.BlockSpec((1, Hp, Wpp, C), lambda n: (n, 0, 0, 0)),
                pl.BlockSpec((5, C, 120), lambda n: (0, 0, 0)),
                pl.BlockSpec((1, 24), lambda n: (0, 0)),
            ],
            out_specs=pl.BlockSpec((1, 24, HW), lambda n: (n, 0, 0)),
        ),
        compiler_params=pltpu.CompilerParams(
            dimension_semantics=("parallel",),
        ),
    )(xp, wpk, bias)

    # (N, 24, H*W) -> (N, 24, H, W): pure metadata reshape, matches NCHW.
    return out.reshape(N, 24, H, W)


def _reference(x_nchw, w0, b0, w1, b1, w2, b2):
    """Plain-JAX reference (NCHW conv, full f32) for correctness checking."""
    def conv(x, w, b, pad):
        y = jax.lax.conv_general_dilated(
            x, w, window_strides=(1, 1), padding=((pad, pad), (pad, pad)),
            dimension_numbers=("NCHW", "OIHW", "NCHW"),
            precision=jax.lax.Precision.HIGHEST)
        return y + b.reshape(1, -1, 1, 1)
    return jnp.concatenate(
        [conv(x_nchw, w0, b0, 0), conv(x_nchw, w1, b1, 1), conv(x_nchw, w2, b2, 2)],
        axis=1)


if __name__ == "__main__":
    key = jax.random.PRNGKey(0)
    ks = jax.random.split(key, 7)

    N, C, H, W = 2, 256, 16, 16  # in-channels fixed to 256 by the module
    x = jax.random.normal(ks[0], (N, C, H, W), jnp.float32)

    # Deterministic parameter init (PyTorch Conv2d shapes: (Cout, Cin, kh, kw)).
    def winit(k, shape):
        fan_in = shape[1] * shape[2] * shape[3]
        bound = 1.0 / jnp.sqrt(fan_in)
        return jax.random.uniform(k, shape, jnp.float32, -bound, bound)

    w0 = winit(ks[1], (8, 256, 1, 1)); b0 = winit(ks[2], (8, 256, 1, 1))[:, 0, 0, 0]
    w1 = winit(ks[3], (8, 256, 3, 3)); b1 = winit(ks[4], (8, 256, 1, 1))[:, 0, 0, 0]
    w2 = winit(ks[5], (8, 256, 5, 5)); b2 = winit(ks[6], (8, 256, 1, 1))[:, 0, 0, 0]

    out = jax.block_until_ready(bn_inception(x, w0, b0, w1, b1, w2, b2))
    assert out.shape == (N, 24, H, W), out.shape

    # Tight check: reference fed the same bf16-rounded inputs/weights (f32
    # accumulation in both), so only summation-order differences remain.
    def q(a):
        return a.astype(jnp.bfloat16).astype(jnp.float32)

    ref_bf16 = jax.block_until_ready(_reference(q(x), q(w0), b0, q(w1), b1, q(w2), b2))
    err_tight = float(jnp.abs(out - ref_bf16).max())
    assert jnp.allclose(out, ref_bf16, atol=2e-3, rtol=2e-3), err_tight

    # Loose check against the full-f32 reference (bounds the bf16 input cast).
    ref_f32 = jax.block_until_ready(_reference(x, w0, b0, w1, b1, w2, b2))
    err_loose = float(jnp.abs(out - ref_f32).max())
    assert jnp.allclose(out, ref_f32, atol=5e-2, rtol=5e-2), err_loose

    print("KERNEL_OK")
</pallas_src>

<mosaic_0001>
module attributes {stable_mosaic.version = 11 : i64} {
  func.func @_bn_inception_kernel(%arg0: i32, %arg1: memref<1x20x24x256xbf16, #tpu.memory_space<vmem>>, %arg2: memref<5x256x120xbf16, #tpu.memory_space<vmem>>, %arg3: memref<1x24xf32, #tpu.memory_space<vmem>>, %arg4: memref<1x24x256xf32, #tpu.memory_space<vmem>>) attributes {dimension_semantics = [#tpu.dimension_semantics<parallel>], iteration_bounds = array<i64: 2>, scalar_prefetch = 0 : i64, scratch_operands = 0 : i64, tpu.core_type = #tpu.core_type<tc>, window_params = [{transform_indices = @transform_0, window_bounds = array<i64: 1, 20, 24, 256>}, {pipeline_mode = #tpu.pipeline_mode<synchronous>, transform_indices = @transform_1, window_bounds = array<i64: 5, 256, 120>}, {pipeline_mode = #tpu.pipeline_mode<synchronous>, transform_indices = @transform_2, window_bounds = array<i64: 1, 24>}, {transform_indices = @transform_3, window_bounds = array<i64: 1, 24, 256>}]} {
    %c0 = arith.constant 0 : index
    %c0_0 = arith.constant 0 : index
    %c0_1 = arith.constant 0 : index
    %c0_2 = arith.constant 0 : index
    %0 = vector.load %arg1[%c0, %c0_0, %c0_1, %c0_2] : memref<1x20x24x256xbf16, #tpu.memory_space<vmem>>, vector<1x20x24x256xbf16>
    %1 = vector.shape_cast %0 : vector<1x20x24x256xbf16> to vector<20x24x256xbf16>
    %2 = vector.extract_strided_slice %1 {offsets = [0, 0, 0], sizes = [20, 16, 256], strides = [1, 1, 1]} : vector<20x24x256xbf16> to vector<20x16x256xbf16>
    %3 = vector.shape_cast %2 : vector<20x16x256xbf16> to vector<320x256xbf16>
    %c0_3 = arith.constant 0 : index
    %c0_4 = arith.constant 0 : index
    %c0_5 = arith.constant 0 : index
    %4 = vector.load %arg2[%c0_3, %c0_4, %c0_5] : memref<5x256x120xbf16, #tpu.memory_space<vmem>>, vector<1x256x120xbf16>
    %5 = vector.shape_cast %4 : vector<1x256x120xbf16> to vector<256x120xbf16>
    %cst = arith.constant dense<0.000000e+00> : vector<320x120xf32>
    %6 = tpu.matmul %3, %5, %cst {dimension_numbers = #tpu.dot_dimension_numbers<[1], [0], [0], [1], [0, 0, 1, 1], [], []>} : vector<320x256xbf16>, vector<256x120xbf16>, vector<320x120xf32> -> vector<320x120xf32>
    %7 = vector.extract_strided_slice %1 {offsets = [0, 1, 0], sizes = [20, 16, 256], strides = [1, 1, 1]} : vector<20x24x256xbf16> to vector<20x16x256xbf16>
    %8 = vector.shape_cast %7 : vector<20x16x256xbf16> to vector<320x256xbf16>
    %c1 = arith.constant 1 : index
    %c0_6 = arith.constant 0 : index
    %c0_7 = arith.constant 0 : index
    %9 = vector.load %arg2[%c1, %c0_6, %c0_7] : memref<5x256x120xbf16, #tpu.memory_space<vmem>>, vector<1x256x120xbf16>
    %10 = vector.shape_cast %9 : vector<1x256x120xbf16> to vector<256x120xbf16>
    %cst_8 = arith.constant dense<0.000000e+00> : vector<320x120xf32>
    %11 = tpu.matmul %8, %10, %cst_8 {dimension_numbers = #tpu.dot_dimension_numbers<[1], [0], [0], [1], [0, 0, 1, 1], [], []>} : vector<320x256xbf16>, vector<256x120xbf16>, vector<320x120xf32> -> vector<320x120xf32>
    %12 = arith.addf %6, %11 : vector<320x120xf32>
    %13 = vector.extract_strided_slice %1 {offsets = [0, 2, 0], sizes = [20, 16, 256], strides = [1, 1, 1]} : vector<20x24x256xbf16> to vector<20x16x256xbf16>
    %14 = vector.shape_cast %13 : vector<20x16x256xbf16> to vector<320x256xbf16>
    %c2 = arith.constant 2 : index
    %c0_9 = arith.constant 0 : index
    %c0_10 = arith.constant 0 : index
    %15 = vector.load %arg2[%c2, %c0_9, %c0_10] : memref<5x256x120xbf16, #tpu.memory_space<vmem>>, vector<1x256x120xbf16>
    %16 = vector.shape_cast %15 : vector<1x256x120xbf16> to vector<256x120xbf16>
    %cst_11 = arith.constant dense<0.000000e+00> : vector<320x120xf32>
    %17 = tpu.matmul %14, %16, %cst_11 {dimension_numbers = #tpu.dot_dimension_numbers<[1], [0], [0], [1], [0, 0, 1, 1], [], []>} : vector<320x256xbf16>, vector<256x120xbf16>, vector<320x120xf32> -> vector<320x120xf32>
    %18 = arith.addf %12, %17 : vector<320x120xf32>
    %19 = vector.extract_strided_slice %1 {offsets = [0, 3, 0], sizes = [20, 16, 256], strides = [1, 1, 1]} : vector<20x24x256xbf16> to vector<20x16x256xbf16>
    %20 = vector.shape_cast %19 : vector<20x16x256xbf16> to vector<320x256xbf16>
    %c3 = arith.constant 3 : index
    %c0_12 = arith.constant 0 : index
    %c0_13 = arith.constant 0 : index
    %21 = vector.load %arg2[%c3, %c0_12, %c0_13] : memref<5x256x120xbf16, #tpu.memory_space<vmem>>, vector<1x256x120xbf16>
    %22 = vector.shape_cast %21 : vector<1x256x120xbf16> to vector<256x120xbf16>
    %cst_14 = arith.constant dense<0.000000e+00> : vector<320x120xf32>
    %23 = tpu.matmul %20, %22, %cst_14 {dimension_numbers = #tpu.dot_dimension_numbers<[1], [0], [0], [1], [0, 0, 1, 1], [], []>} : vector<320x256xbf16>, vector<256x120xbf16>, vector<320x120xf32> -> vector<320x120xf32>
    %24 = arith.addf %18, %23 : vector<320x120xf32>
    %25 = vector.extract_strided_slice %1 {offsets = [0, 4, 0], sizes = [20, 16, 256], strides = [1, 1, 1]} : vector<20x24x256xbf16> to vector<20x16x256xbf16>
    %26 = vector.shape_cast %25 : vector<20x16x256xbf16> to vector<320x256xbf16>
    %c4 = arith.constant 4 : index
    %c0_15 = arith.constant 0 : index
    %c0_16 = arith.constant 0 : index
    %27 = vector.load %arg2[%c4, %c0_15, %c0_16] : memref<5x256x120xbf16, #tpu.memory_space<vmem>>, vector<1x256x120xbf16>
    %28 = vector.shape_cast %27 : vector<1x256x120xbf16> to vector<256x120xbf16>
    %cst_17 = arith.constant dense<0.000000e+00> : vector<320x120xf32>
    %29 = tpu.matmul %26, %28, %cst_17 {dimension_numbers = #tpu.dot_dimension_numbers<[1], [0], [0], [1], [0, 0, 1, 1], [], []>} : vector<320x256xbf16>, vector<256x120xbf16>, vector<320x120xf32> -> vector<320x120xf32>
    %30 = arith.addf %24, %29 : vector<320x120xf32>
    %c0_18 = arith.constant 0 : index
    %c0_19 = arith.constant 0 : index
    %31 = vector.load %arg3[%c0_18, %c0_19] : memref<1x24xf32, #tpu.memory_space<vmem>>, vector<1x24xf32>
    %32 = vector.shape_cast %31 : vector<1x24xf32> to vector<1x24xf32>
    %33 = vector.broadcast %32 : vector<1x24xf32> to vector<256x24xf32>
    %34 = vector.extract_strided_slice %30 {offsets = [0, 0], sizes = [256, 24], strides = [1, 1]} : vector<320x120xf32> to vector<256x24xf32>
    %35 = arith.addf %33, %34 : vector<256x24xf32>
    %36 = vector.extract_strided_slice %30 {offsets = [16, 24], sizes = [256, 24], strides = [1, 1]} : vector<320x120xf32> to vector<256x24xf32>
    %37 = arith.addf %35, %36 : vector<256x24xf32>
    %38 = vector.extract_strided_slice %30 {offsets = [32, 48], sizes = [256, 24], strides = [1, 1]} : vector<320x120xf32> to vector<256x24xf32>
    %39 = arith.addf %37, %38 : vector<256x24xf32>
    %40 = vector.extract_strided_slice %30 {offsets = [48, 72], sizes = [256, 24], strides = [1, 1]} : vector<320x120xf32> to vector<256x24xf32>
    %41 = arith.addf %39, %40 : vector<256x24xf32>
    %42 = vector.extract_strided_slice %30 {offsets = [64, 96], sizes = [256, 24], strides = [1, 1]} : vector<320x120xf32> to vector<256x24xf32>
    %43 = arith.addf %41, %42 : vector<256x24xf32>
    %44 = tpu.transpose %43, [1, 0] : vector<256x24xf32> -> vector<24x256xf32>
    %c0_20 = arith.constant 0 : index
    %c0_21 = arith.constant 0 : index
    %c0_22 = arith.constant 0 : index
    %45 = vector.load %arg4[%c0_20, %c0_21, %c0_22] : memref<1x24x256xf32, #tpu.memory_space<vmem>>, vector<1x24x256xf32>
    %46 = vector.shape_cast %45 : vector<1x24x256xf32> to vector<24x256xf32>
    %47 = vector.shape_cast %44 : vector<24x256xf32> to vector<1x24x256xf32>
    tpu.vector_store %arg4[%c0_20, %c0_21, %c0_22], %47 {strides = array<i32>} : memref<1x24x256xf32, #tpu.memory_space<vmem>>, vector<1x24x256xf32>,
    return
  }
  func.func @transform_0(%arg0: i32) -> (i32, i32, i32, i32) {
    %c0_i32 = arith.constant 0 : i32
    %c0_i32_0 = arith.constant 0 : i32
    %c0_i32_1 = arith.constant 0 : i32
    %c0_i32_2 = arith.constant 0 : i32
    return %arg0, %c0_i32, %c0_i32_0, %c0_i32_1 : i32, i32, i32, i32
  }
  func.func @transform_1(%arg0: i32) -> (i32, i32, i32) {
    %c0_i32 = arith.constant 0 : i32
    %c0_i32_0 = arith.constant 0 : i32
    %c0_i32_1 = arith.constant 0 : i32
    %c0_i32_2 = arith.constant 0 : i32
    return %c0_i32, %c0_i32_0, %c0_i32_1 : i32, i32, i32
  }
  func.func @transform_2(%arg0: i32) -> (i32, i32) {
    %c0_i32 = arith.constant 0 : i32
    %c0_i32_0 = arith.constant 0 : i32
    %c0_i32_1 = arith.constant 0 : i32
    return %c0_i32, %c0_i32_0 : i32, i32
  }
  func.func @transform_3(%arg0: i32) -> (i32, i32, i32) {
    %c0_i32 = arith.constant 0 : i32
    %c0_i32_0 = arith.constant 0 : i32
    %c0_i32_1 = arith.constant 0 : i32
    return %arg0, %c0_i32, %c0_i32_0 : i32, i32, i32
  }
}

</mosaic_0001>

<bundles_post_ra>
// kernel: tpu_custom_call.1
= control target key start
LH: loop header
LB: loop body
LE: loop exit
PB: predicated region body
PF: predicated region fallthrough
CT: control target
= control target key end

     0   :  { %8 = vsyncpa [#allocation3], 0  ;;  %s8678_s0 = inlined_call_operand.vmem [shape: bf16[2,20,24,256], index: 0, kind: input, shape index: {}]   ;;  %s8679_s1 = inlined_call_operand.vmem [shape: bf16[5,256,120], index: 1, kind: input, shape index: {}]   ;;  %s8680_s2 = inlined_call_operand.vmem [shape: f32[1,24], index: 2, kind: input, shape index: {}]   ;;  %s8681_s3 = inlined_call_operand.hbm [shape: f32[2,24,256], index: 3, kind: output, shape index: {}]  }
   0x1   :  { %10 = vsyncpa [#allocation3 + $0x1], 0  ;;  %s5466_s12 = smov 0   ;;  %s5468_s13 = smov 0  }
   0x2   :  { %s5470_s14 = smov 0   ;;  %s5472_s15 = smov 0  }
   0x3 LB: > { %s5487_s16 = sadd.s32 4294967295, %s5436_s15   ;;  %s4626_s17 = sadd.s32 4294967294, %s5436_s15   ;;  %s5436_s15 = sphi %s5472_s15, %s9178_s15   ;;  %s5432_s14 = sphi %s5470_s14, %s9177_s14   ;;  %s5428_s13 = sphi %s5468_s13, %s9176_s13   ;;  %s5424_s12 = sphi %s5466_s12, %s9175_s12  }
   0x4   : > { %s5491_s18 = sadd.s32 1, %s5436_s15   ;;  %s91_s19 = sadd.s32 1, %s5432_s14 }
   0x5   : > { %s88_s20 = ssub.s32 %s5436_s15, %s5491_s18  ;;  %p101_p0 = scmp.ne.s32.totalorder %s5432_s14, %s5428_s13 }
   0x6   : > { %p89_p1 = scmp.eq.s32.totalorder %s88_s20, 0  ;;  %p102_p2 = scmp.eq.s32.totalorder %s5487_s16, 1 }
   0x7   : > { %p107_p3 = scmp.ne.s32.totalorder %s5428_s13, %s5424_s12  ;;  %p108_p4 = scmp.eq.s32.totalorder %s4626_s17, 1 }
   0x8   : > { %s5502_s21 = scalar_select %p89_p1, %s5432_s14, %s91_s19  }
   0x9   : > { %p5504_p5 = por %p102_p2, %p101_p0  ;;  %p5508_p6 = por %p108_p4, %p107_p3 }
   0xa   : > { %p4629_p7 = scmp.ge.s32.totalorder %s5436_s15, 1  ;;  %p140_p8 = scmp.lt.s32.totalorder %s5436_s15, 3 }
   0xc   : > { %p141_p9 = pnand %p4629_p7, %p140_p8 }
   0xe   : > { %144 = sbr.rel (%p141_p9) target bundleno = 999 (0x3e7), region = 32 }
  0x13   : > { %v5164_v0 = vld [vmem:[%s8679_s1 + $0xb8] sm:$0xff]   ;;  %v8720_v1 = vmov 0   ;;  %p164_p10 = scmp.lt.s32.totalorder %s5487_s16, 1  ;;  %v5165_v2 = vld [vmem:[%s8679_s1 + $0xb0] sm:$0xff]   ;;  %v5166_v3 = vld [vmem:[%s8679_s1 + $0xa8] sm:$0xff]   ;;  %vm1736_vm3 = vcmask 1042432  }
  0x14   : > { %1034 = vmatprep.subr.bf16.mxu0 %v8720_v1  ;;  %5083 = vmatprep.subr.bf16.mxu1 %v8720_v1  ;;  %v5167_v4 = vld [vmem:[%s8679_s1 + $0xa0] sm:$0xff]   ;;  %v5168_v5 = vld [vmem:[%s8679_s1 + $0x98] sm:$0xff]   ;;  %vm262_vm0 = vsmask.f32 3328  ;;  %vm263_vm1 = vsmask.f32 7440 }
  0x15   : > { %1035 = vmatpush1.bf16.msra.mxu0 %v5164_v0  ;;  %5099 = vmatpush1.bf16.msra.mxu1 %v5164_v0  ;;  %s165_s28 = scalar_select %p164_p10, %s5487_s16, 1  ;;  %v5169_v13 = vld [vmem:[%s8679_s1 + $0x90] sm:$0xff]   ;;  %v5170_v25 = vld [vmem:[%s8679_s1 + $0x88] sm:$0xff]   ;;  %vm5595_vm2 = vmor %vm262_vm0, %vm263_vm1  ;;  %vm1737_vm4 = vcmask 1046532   ;;  %vm2401_vm6 = vsmask.f32 2304 }
  0x16   : > { %1036 = vmatprep.subr.bf16.mxu0 %v8720_v1  ;;  %5084 = vmatprep.subr.bf16.mxu1 %v8720_v1  ;;  %v5171_v43 = vld [vmem:[%s8679_s1 + $0x80] sm:$0xff]   ;;  %v5172_v51 = vld [vmem:[%s8679_s1 + $0xf8] sm:$0xff]   ;;  %v5173_v61 = vld [vmem:[%s8679_s1 + $0xf0] sm:$0xff]   ;;  %vm2402_vm7 = vsmask.f32 6416  ;;  %vm3226_vm9 = vcmask 1041408  }
  0x17   : > { %s5116_s4 = smul.u32 480, %s165_s28  ;;  %vm6565_vm5 = vmor %vm1736_vm3, %vm1737_vm4  ;;  %vm3227_vm10 = vcmask 1045508   ;;  %s5440_s8 = smov 80  }
  0x18   : > { %vm6755_vm8 = vmor %vm2401_vm6, %vm2402_vm7  ;;  %s5441_s10 = smov 56   ;;  %s5442_s11 = smov 32  }
  0x19   : > { %1037 = vmatpush1.bf16.msra.mxu0 %v5165_v2  ;;  %5100 = vmatpush1.bf16.msra.mxu1 %v5165_v2  ;;  %s5539_s9 = scalar_lea.vmem %s8678_s0, %s5116_s4  ;;  %vm7084_vm11 = vmor %vm3226_vm9, %vm3227_vm10  ;;  %s161_s20 = sand.u32 1, %s5428_s13  }
  0x1a   : > { %1038 = vmatprep.subr.bf16.mxu0 %v8720_v1  ;;  %5085 = vmatprep.subr.bf16.mxu1 %v8720_v1  ;;  %v5547_v6 = vld [vmem:[%s5539_s9] sm:$0xff]  ;;  %v5550_v7 = vld [vmem:[%s5539_s9 + $0x8] sm:$0xff]  ;;  %v5553_v8 = vld [vmem:[%s5539_s9 + $0x10] sm:$0xff]  ;;  %s5115_s24 = smul.u32 48, %s161_s20  ;;  %s8638_s4 = scalar_lea.sflag [#allocation3], %s161_s20 }
  0x1b   : > { %v8713_v9 = vshrl.u32 %v5547_v6, 16  ;;  %v8712_v10 = vshll.u32 %v5547_v6, 16  ;;  %v8715_v11 = vshll.u32 %v5550_v7, 16  ;;  %v5559_v12 = vld [vmem:[%s5539_s9 + $0xf0] sm:$0xff]  ;;  %v8710_v14 = vshrl.u32 %v5550_v7, 16  ;;  %v5567_v16 = vld [vmem:[%s5539_s9 + $0xf8] sm:$0xff] }
  0x1c   : > { %v8711_v15 = vshll.u32 %v5553_v8, 16  ;;  %v8708_v17 = vshrl.u32 %v5559_v12, 16  ;;  %v8707_v18 = vshll.u32 %v5559_v12, 16  ;;  %v5580_v22 = vld [vmem:[%s5539_s9 + $0x100] sm:$0xff]  ;;  %v8709_v28 = vshll.u32 %v5567_v16, 16  ;;  %v5630_v48 = vld [vmem:[%s5539_s9 + $0x18] sm:$0xff] }
  0x1d   : > { %1039 = vmatpush1.bf16.msra.mxu0 %v5166_v3  ;;  %5101 = vmatpush1.bf16.msra.mxu1 %v5166_v3  ;;  %v268_v19 = vrot.slane %v8713_v9, 4  ;;  %v271_v20 = vrot.slane %v8712_v10, 5  ;;  %v277_v21 = vrot.slane %v8715_v11, 5  ;;  %v281_v23 = vrot.slane %v8710_v14, 4  ;;  %v5637_v50 = vld [vmem:[%s5539_s9 + $0x20] sm:$0xff]  ;;  %v5645_v53 = vld [vmem:[%s5539_s9 + $0x108] sm:$0xff] }
  0x1e   : > { %1040 = vmatprep.subr.bf16.mxu0 %v8720_v1  ;;  %5086 = vmatprep.subr.bf16.mxu1 %v8720_v1  ;;  %v508_v24 = vrot.slane %v8708_v17, 4  ;;  %v511_v27 = vrot.slane %v8707_v18, 5  ;;  %v8706_v29 = vshrl.u32 %v5567_v16, 16  ;;  %v287_v32 = vrot.slane %v8711_v15, 5  ;;  %8834 = vst [vmem:[#allocation5_spill] sm:$0xff] %v5645_v53  ;;  %v5651_v55 = vld [vmem:[%s5539_s9 + $0x110] sm:$0xff] }
  0x1f   : > { %v272_v26 = vor.u32 %v271_v20, %v268_v19  ;;  %v282_v31 = vor.u32 %v281_v23, %v277_v21  ;;  %v8700_v33 = vshll.u32 %v5580_v22, 16  ;;  %v517_v36 = vrot.slane %v8709_v28, 5  ;;  %8835 = vst [vmem:[#allocation6_spill] sm:$0xff] %v5651_v55  ;;  %v5662_v62 = vld [vmem:[%s5539_s9 + $0x28] sm:$0xff]  ;;  %v5671_v3 = vld [vmem:[%s5539_s9 + $0x118] sm:$0xff]  ;;  %v5836_v17 = vld [vmem:[%s5539_s9 + $0x60] sm:$0xff] }
  0x20   : > { %v512_v35 = vor.u32 %v511_v27, %v508_v24  ;;  %v521_v37 = vrot.slane %v8706_v29, 4  ;;  %v8699_v54 = vshrl.u32 %v5630_v48, 16  ;;  %v8698_v56 = vshll.u32 %v5630_v48, 16  ;;  %8836 = vst [vmem:[#allocation7_spill] sm:$0xff] %v5671_v3  ;;  %v5689_v23 = vld [vmem:[%s5539_s9 + $0x38] sm:$0xff]  ;;  %v5174_v24 = vld [vmem:[%s8679_s1 + $0xe8] sm:$0xff]  }
  0x21   : > { %1041 = vmatpush1.bf16.msra.mxu0 %v5167_v4  ;;  %5102 = vmatpush1.bf16.msra.mxu1 %v5167_v4  ;;  %v273_v34 = vrot.slane %v272_v26, 4  ;;  %v283_v38 = vrot.slane %v282_v31, 4  ;;  %v527_v42 = vrot.slane %v8700_v33, 5  ;;  %v8696_v57 = vshll.u32 %v5637_v50, 16  ;;  %v5674_v4 = vld [vmem:[%s5539_s9 + $0x30] sm:$0xff]  ;;  %8846 = vst [vmem:[#allocation17_spill] sm:$0xff] %v5836_v17 }
  0x22   : > { %1042 = vmatprep.subr.bf16.mxu0 %v8720_v1  ;;  %5087 = vmatprep.subr.bf16.mxu1 %v8720_v1  ;;  %v513_v40 = vrot.slane %v512_v35, 4  ;;  %v522_v41 = vor.u32 %v521_v37, %v517_v36  ;;  %v8697_v58 = vshrl.u32 %v5637_v50, 16  ;;  %v8685_v59 = vshrl.u32 %v5645_v53, 16  ;;  %v5175_v35 = vld [vmem:[%s8679_s1 + $0xe0] sm:$0xff]   ;;  %v5839_v28 = vld [vmem:[%s5539_s9 + $0x68] sm:$0xff]  ;;  %s163_s25 = scalar_lea.vmem [#allocation2], %s5115_s24 }
  0x23   : > { %v5610_v39 = vsel %vm5595_vm2, %v273_v34, %v277_v21  ;;  %v5619_v44 = vsel %vm5595_vm2, %v283_v38, %v287_v32  ;;  %v8684_v60 = vshll.u32 %v5645_v53, 16  ;;  %v8682_v63 = vshll.u32 %v5651_v55, 16  ;;  %v5704_v34 = vld [vmem:[%s5539_s9 + $0x120] sm:$0xff]  ;;  %8847 = vst [vmem:[#allocation18_spill] sm:$0xff] %v5839_v28  ;;  %s5117_s26 = smul.u32 768, %s5487_s16  ;;  %s4564_s27 = sshll.u32 %s163_s25, 4  ;;  %s8631_s27 = int_to_ptr.vmem [resolvable:$true] %s4564_s27 }
  0x24   : > { %v4664_v45 = vcombine.high %v5610_v39, %v5619_v44  ;;  %v5627_v46 = vsel %vm5595_vm2, %v513_v40, %v517_v36  ;;  %v523_v47 = vrot.slane %v522_v41, 4  ;;  %v8683_v0 = vshrl.u32 %v5651_v55, 16  ;;  %8837 = vst [vmem:[#allocation8_spill] sm:$0xff] %v5704_v34  ;;  %v5713_v41 = vld [vmem:[%s5539_s9 + $0x128] sm:$0xff]  ;;  %v5179_v14 = vld [vmem:[%s8679_s1 + $0xc0] sm:$0xff]   ;;  %s5376_s5 = scalar_lea.vmem %s8631_s27, 768 }
  0x25   : > { %1043 = vmatpush1.bf16.msra.mxu0 %v5168_v5  ;;  %5103 = vmatpush1.bf16.msra.mxu1 %v5168_v5  ;;  %v292_v2 = vrot.slane %v8699_v54, 4  ;;  %v295_v5 = vrot.slane %v8698_v56, 5  ;;  %v305_v19 = vrot.slane %v8697_v58, 4  ;;  %v532_v20 = vrot.slane %v8685_v59, 4  ;;  %8838 = vst [vmem:[#allocation9_spill] sm:$0xff] %v5713_v41  ;;  %v5788_v54 = vld [vmem:[%s5539_s9 + $0x138] sm:$0xff]  ;;  %s8636_s30 = scalar_lea.hbm %s8681_s3, %s5117_s26  ;;  %p5377_p11 = scmp.ne.s32.totalorder %s8631_s27, %s5376_s5 }
  0x26   : > { %1044 = vmatprep.subr.bf16.mxu0 %v8720_v1  ;;  %5088 = vmatprep.subr.bf16.mxu1 %v8720_v1  ;;  %v5634_v49 = vsel %vm5595_vm2, %v523_v47, %v527_v42  ;;  %v535_v21 = vrot.slane %v8684_v60, 5  ;;  %v545_v26 = vrot.slane %v8683_v0, 4  ;;  %v8687_v27 = vshrl.u32 %v5674_v4, 16  ;;  %v5717_v47 = vld [vmem:[%s5539_s9 + $0x40] sm:$0xff]  ;;  %8843 = vst [vmem:[#allocation14_spill] sm:$0xff] %v5788_v54  ;;  %s5443_s16 = smov [#allocation2]  }
  0x27   : > { %1066 = vmatprep.mubr.bf16.mxu0 %v4664_v45  ;;  %v4684_v52 = vcombine.high %v5627_v46, %v5634_v49  ;;  %v8686_v31 = vshll.u32 %v5674_v4, 16  ;;  %v8689_v32 = vshll.u32 %v5662_v62, 16  ;;  %v296_v36 = vor.u32 %v295_v5, %v292_v2  ;;  %8839 = vst [vmem:[#allocation10_spill] sm:$0xff] %v5717_v47  ;;  %p5378_p12 = pnand %p5377_p11, %p5504_p5  ;;  %s5380_s6 = sshll.u32 %s5443_s16, 4  ;;  %s5381_s6 = int_to_ptr.vmem [resolvable:$false] %s5380_s6 }
  0x28   : > { %v8691_v37 = vshll.u32 %v5671_v3, 16  ;;  %v8688_v38 = vshll.u32 %v5689_v23, 16  ;;  %v8690_v40 = vshrl.u32 %v5689_v23, 16  ;;  %v8693_v5 = vshll.u32 %v5704_v34, 16  ;;  %s5382_s7 = scalar_lea.vmem %s5381_s6, 1536  ;;  %p5383_p0 = scmp.lt.s32.totalorder %s8631_s27, %s5381_s6 }
  0x29   : > { %1045 = vmatpush1.bf16.msra.mxu0 %v5169_v13  ;;  %5104 = vmatpush1.bf16.msra.mxu1 %v5169_v13  ;;  %v5680_v13 = vrot.slane %v8696_v57, 5  ;;  %v311_v2 = vrot.slane %v8689_v32, 5  ;;  %p5379_p13 = pneg %p5378_p12  ;;  %p5384_p1 = scmp.lt.s32.totalorder %s5382_s7, %s5376_s5 }
  0x2a   : > { %1046 = vmatprep.subr.bf16.mxu0 %v8720_v1  ;;  %5089 = vmatprep.subr.bf16.mxu1 %v8720_v1  ;;  %v551_v59 = vrot.slane %v8691_v37, 5 }
  0x2b   : > { %1146 = vmatprep.mubr.bf16.mxu1 %v4684_v52  ;;  %v306_v42 = vor.u32 %v305_v19, %v5680_v13  ;;  %v319_v52 = vrot.slane %v8686_v31, 5  ;;  %v8694_v19 = vshll.u32 %v5713_v41, 16  ;;  %v8705_v31 = vshll.u32 %v5717_v47, 16  ;;  %v6413_v47 = vld [vmem:[%s5539_s9 + $0x1d0] sm:$0xff]  ;;  %p5385_p2 = por %p5384_p1, %p5383_p0 }
  0x2c   : > { %8932 = vst [vmem:[#allocation46_spill] sm:$0xff] %v6413_v47 }
  0x2d   : > { %1047 = vmatpush1.bf16.msra.mxu0 %v5170_v25  ;;  %5105 = vmatpush1.bf16.msra.mxu1 %v5170_v25  ;;  %v541_v25 = vrot.slane %v8682_v63, 5  ;;  %v8695_v63 = vshrl.u32 %v5713_v41, 16  ;;  %v307_v0 = vrot.slane %v306_v42, 4  ;;  %v559_v42 = vrot.slane %v8693_v5, 5  ;;  %p5386_p3 = pnand %p5385_p2, %p5379_p13 }
  0x2e   : > { %1048 = vmatprep.subr.bf16.mxu0 %v8720_v1  ;;  %5090 = vmatprep.subr.bf16.mxu1 %v8720_v1 }
  0x2f   : > { %v546_v45 = vor.u32 %v545_v26, %v541_v25  ;;  %v329_v26 = vrot.slane %v8690_v40, 4  ;;  %v5781_v57 = vsel %vm5595_vm2, %v307_v0, %v311_v2 }
  0x31   : > { %1049 = vmatpush1.bf16.msra.mxu0 %v5171_v43  ;;  %5106 = vmatpush1.bf16.msra.mxu1 %v5171_v43  ;;  %v536_v43 = vor.u32 %v535_v21, %v532_v20  ;;  %v5176_v20 = vld [vmem:[%s8679_s1 + $0xd8] sm:$0xff]   ;;  %v297_v21 = vrot.slane %v296_v36, 4  ;;  %v5747_v36 = vld [vmem:[%s5539_s9 + $0x50] sm:$0xff] }
  0x32   : > { %1050 = vmatprep.subr.bf16.mxu0 %v8720_v1  ;;  %5091 = vmatprep.subr.bf16.mxu1 %v8720_v1  ;;  %8841 = vst [vmem:[#allocation12_spill] sm:$0xff] %v5747_v36  ;;  %v8701_v5 = vshll.u32 %v5747_v36, 16 }
  0x33   : > { %v537_v60 = vrot.slane %v536_v43, 4  ;;  %v5757_v43 = vrot.slane %v8694_v19, 5  ;;  %v8703_v19 = vshrl.u32 %v5747_v36, 16 }
  0x35   : > { %1051 = vmatpush2.bf16.msra.mxu0 %v5172_v51  ;;  %5107 = vmatpush2.bf16.msra.mxu1 %v5172_v51  ;;  %v316_v51 = vrot.slane %v8687_v27, 4  ;;  %v5744_v27 = vld [vmem:[%s5539_s9 + $0x48] sm:$0xff]  ;;  %v5785_v58 = vsel %vm5595_vm2, %v537_v60, %v541_v25  ;;  %v5800_v60 = vld [vmem:[%s5539_s9 + $0x140] sm:$0xff] }
  0x36   : > { %1052 = vmatprep.subr.bf16.mxu0 %v8720_v1  ;;  %5092 = vmatprep.subr.bf16.mxu1 %v8720_v1  ;;  %8840 = vst [vmem:[#allocation11_spill] sm:$0xff] %v5744_v27  ;;  %8844 = vst [vmem:[#allocation15_spill] sm:$0xff] %v5800_v60 }
  0x37   : > { %v320_v32 = vor.u32 %v319_v52, %v316_v51  ;;  %v8704_v51 = vshrl.u32 %v5744_v27, 16  ;;  %v8702_v52 = vshll.u32 %v5744_v27, 16 }
  0x39   : > { %1053 = vmatpush2.bf16.msra.mxu0 %v5173_v61  ;;  %5108 = vmatpush2.bf16.msra.mxu1 %v5173_v61  ;;  %v8692_v61 = vshrl.u32 %v5704_v34, 16  ;;  %v321_v56 = vrot.slane %v320_v32, 4  ;;  %v343_v33 = vrot.slane %v8702_v52, 5  ;;  %v5823_v52 = vld [vmem:[%s5539_s9 + $0x58] sm:$0xff] }
  0x3a   : > { %1054 = vmatprep.subr.bf16.mxu0 %v8720_v1  ;;  %5093 = vmatprep.subr.bf16.mxu1 %v8720_v1  ;;  %8845 = vst [vmem:[#allocation16_spill] sm:$0xff] %v5823_v52 }
  0x3b   : > { %v556_v40 = vrot.slane %v8692_v61, 4  ;;  %v5182_v61 = vld [vmem:[%s8679_s1 + $0x30] sm:$0xff]  }
  0x3d   : > { %1055 = vmatpush2.bf16.msra.mxu0 %v5174_v24  ;;  %5109 = vmatpush2.bf16.msra.mxu1 %v5174_v24  ;;  %v5735_v24 = vrot.slane %v8688_v38, 5  ;;  %v547_v38 = vrot.slane %v546_v45, 4  ;;  %v569_v45 = vrot.slane %v8695_v63, 4  ;;  %v5777_v63 = vsel %vm5595_vm2, %v297_v21, %v5680_v13 }
  0x3e   : > { %1056 = vmatprep.subr.bf16.mxu0 %v8720_v1  ;;  %5094 = vmatprep.subr.bf16.mxu1 %v8720_v1  ;;  %v335_v13 = vrot.slane %v8705_v31, 5  ;;  %v560_v0 = vor.u32 %v559_v42, %v556_v40  ;;  %v340_v21 = vrot.slane %v8704_v51, 4  ;;  %v8719_v40 = vshrl.u32 %v5788_v54, 16  ;;  %v5178_v42 = vld [vmem:[%s8679_s1 + $0xc8] sm:$0xff]  }
  0x3f   : > { %v330_v37 = vor.u32 %v329_v26, %v5735_v24  ;;  %v5177_v26 = vld [vmem:[%s8679_s1 + $0xd0] sm:$0xff]   ;;  %v570_v32 = vor.u32 %v569_v45, %v5757_v43  ;;  %v8717_v51 = vshrl.u32 %v5800_v60, 16  ;;  %v5847_v15 = vsel %vm5595_vm2, %v321_v56, %v5735_v24  ;;  %v5898_v45 = vld [vmem:[%s5539_s9 + $0x158] sm:$0xff] }
  0x40   : > { %v561_v29 = vrot.slane %v560_v0, 4  ;;  %v344_v9 = vor.u32 %v343_v33, %v340_v21  ;;  %v8722_v31 = vshll.u32 %v5823_v52, 16  ;;  %8850 = vst [vmem:[#allocation21_spill] sm:$0xff] %v5898_v45  ;;  %v8855_v21 = vshll.u32 %v5839_v28, 16 }
  0x41   : > { %1057 = vmatpush2.bf16.msra.mxu0 %v5175_v35  ;;  %5110 = vmatpush2.bf16.msra.mxu1 %v5175_v35  ;;  %v5761_v35 = vld [vmem:[%s5539_s9 + $0x130] sm:$0xff]  ;;  %v331_v25 = vrot.slane %v330_v37, 4  ;;  %v8718_v37 = vshll.u32 %v5788_v54, 16  ;;  %v571_v0 = vrot.slane %v570_v32, 4  ;;  %v593_v24 = vrot.slane %v8717_v51, 4  ;;  %v5181_v51 = vld [vmem:[%s8679_s1 + $0x138] sm:$0xff]  }
  0x42   : > { %1058 = vmatprep.subr.bf16.mxu0 %v8720_v1  ;;  %5095 = vmatprep.subr.bf16.mxu1 %v8720_v1  ;;  %8842 = vst [vmem:[#allocation13_spill] sm:$0xff] %v5761_v35  ;;  %v8714_v2 = vshll.u32 %v5761_v35, 16 }
  0x43   : > { %v5851_v10 = vsel %vm5595_vm2, %v331_v25, %v335_v13  ;;  %v583_v56 = vrot.slane %v8718_v37, 5  ;;  %v8723_v13 = vshrl.u32 %v5836_v17, 16  ;;  %v8724_v25 = vshll.u32 %v5836_v17, 16 }
  0x44   : > { %v575_v18 = vrot.slane %v8714_v2, 5  ;;  %v5854_v2 = vld [vmem:[%s5539_s9 + $0x150] sm:$0xff]  ;;  %v359_v37 = vrot.slane %v8722_v31, 5  ;;  %v8854_v31 = vmov 0  }
  0x45   : > { %1059 = vmatpush2.bf16.msra.mxu0 %v5176_v20  ;;  %5111 = vmatpush2.bf16.msra.mxu1 %v5176_v20  ;;  %v5794_v20 = vsel %vm5595_vm2, %v547_v38, %v551_v59  ;;  %v5809_v59 = vrot.slane %v8701_v5, 5  ;;  %v353_v38 = vrot.slane %v8703_v19, 4  ;;  %v8716_v19 = vshll.u32 %v5800_v60, 16  ;;  %8848 = vst [vmem:[#allocation19_spill] sm:$0xff] %v5854_v2 }
  0x46   : > { %1060 = vmatprep.subr.bf16.mxu0 %v8720_v1  ;;  %5096 = vmatprep.subr.bf16.mxu1 %v8720_v1  ;;  %v580_v5 = vrot.slane %v8719_v40, 4  ;;  %v5891_v40 = vsel %vm5595_vm2, %v561_v29, %v5757_v43  ;;  %v5895_v32 = vsel %vm5595_vm2, %v571_v0, %v575_v18  ;;  %v364_v18 = vrot.slane %v8723_v13, 4 }
  0x47   : > { %v354_v11 = vor.u32 %v353_v38, %v5809_v59  ;;  %v5867_v33 = vrot.slane %v8716_v19, 5  ;;  %v5180_v19 = vld [vmem:[%s8679_s1 + $0x38] sm:$0xff]   ;;  %v367_v0 = vrot.slane %v8724_v25, 5  ;;  %v8730_v25 = vshll.u32 %v5898_v45, 16 }
  0x48   : > { %v584_v29 = vor.u32 %v583_v56, %v580_v5  ;;  %v8856_v5 = vshrl.u32 %v5839_v28, 16  ;;  %v8858_v54 = vshll.u32 %v5854_v2, 16  ;;  %v6406_v28 = vld [vmem:[%s5539_s9 + $0x1c8] sm:$0xff] }
  0x49   : > { %1061 = vmatpush2.bf16.msra.mxu0 %v5177_v26  ;;  %5112 = vmatpush2.bf16.msra.mxu1 %v5177_v26  ;;  %v5859_v26 = vld [vmem:[%s5539_s9 + $0x148] sm:$0xff]  ;;  %v355_v38 = vrot.slane %v354_v11, 4  ;;  %v594_v43 = vor.u32 %v593_v24, %v5867_v33  ;;  %v5916_v11 = vld [vmem:[%s5539_s9 + $0x78] sm:$0xff]  ;;  %v8857_v24 = vshrl.u32 %v5854_v2, 16  ;;  %v368_v60 = vor.u32 %v367_v0, %v364_v18  ;;  %v5186_v2 = vld [vmem:[%s8679_s1 + $0x20] sm:$0xff]   ;;  %8930 = vst [vmem:[#allocation45_spill] sm:$0xff] %v6406_v28 }
  0x4a   : > { %1062 = vmatprep.subr.bf16.mxu0 %v8720_v1  ;;  %5097 = vmatprep.subr.bf16.mxu1 %v8720_v1  ;;  %8849 = vst [vmem:[#allocation20_spill] sm:$0xff] %v5859_v26  ;;  %8853 = vst [vmem:[#allocation24_spill] sm:$0xff] %v5916_v11  ;;  %v377_v56 = vrot.slane %v8856_v5, 4  ;;  %v607_v35 = vrot.slane %v8858_v54, 5  ;;  %v8859_v5 = vcombine.low %v5610_v39, %v5619_v44  ;;  %v8861_v44 = vshll.u32 %v5859_v26, 16  ;;  %v5184_v0 = vld [vmem:[%s8679_s1 + $0x28] sm:$0xff]  }
  0x4b   : > { %v604_v13 = vrot.slane %v8857_v24, 4  ;;  %v8860_v24 = vcombine.low %v5627_v46, %v5634_v49  ;;  %v5954_v39 = vsel %vm5595_vm2, %v355_v38, %v359_v37  ;;  %v5183_v49 = vld [vmem:[%s8679_s1 + $0x130] sm:$0xff]   ;;  %v8864_v37 = vcombine.high %v5777_v63, %v5781_v57 }
  0x4c   : > { %v599_v46 = vrot.slane %v8861_v44, 5  ;;  %v8866_v18 = vcombine.high %v5785_v58, %v5794_v20 }
  0x4d   : > { %1063 = vmatpush2.bf16.msra.mxu0 %v5178_v42  ;;  %5113 = vmatpush2.bf16.msra.mxu1 %v5178_v42  ;;  %v345_v42 = vrot.slane %v344_v9, 4  ;;  %v5913_v9 = vld [vmem:[%s5539_s9 + $0x160] sm:$0xff]  ;;  %v608_v44 = vor.u32 %v607_v35, %v604_v13  ;;  %v5185_v35 = vld [vmem:[%s8679_s1 + $0x128] sm:$0xff]  }
  0x4e   : > { %1064 = vmatprep.subr.bf16.mxu0 %v8720_v1  ;;  %5098 = vmatprep.subr.bf16.mxu1 %v8720_v1  ;;  %v5905_v1 = vld [vmem:[%s5539_s9 + $0x70] sm:$0xff]  ;;  %8852 = vst [vmem:[#allocation23_spill] sm:$0xff] %v5913_v9 }
  0x4f   : > { %8851 = vst [vmem:[#allocation22_spill] sm:$0xff] %v5905_v1  ;;  %v5950_v54 = vsel %vm5595_vm2, %v345_v42, %v5809_v59  ;;  %v5963_v42 = vld [vmem:[%s5539_s9 + $0x80] sm:$0xff] }
  0x50   : > { %8862 = vst [vmem:[#allocation25_spill] sm:$0xff] %v5963_v42  ;;  %v5187_v59 = vld [vmem:[%s8679_s1 + $0x120] sm:$0xff]  }
  0x51   : > { %1065 = vmatpush2.bf16.msra.mxu0 %v5179_v14  ;;  %5114 = vmatpush2.bf16.msra.mxu1 %v5179_v14  ;;  %v5922_v14 = vrot.slane %v8855_v21, 5  ;;  %v5966_v21 = vld [vmem:[%s5539_s9 + $0x168] sm:$0xff] }
  0x52   : > { %1523 = vmatprep.subr.bf16.mxu1 %v8854_v31  ;;  %2168 = vmatprep.subr.bf16.mxu0 %v8854_v31  ;;  %8863 = vst [vmem:[#allocation26_spill] sm:$0xff] %v5966_v21  ;;  %v8878_v34 = vshrl.u32 %v5966_v21, 16 }
  0x54   : > { %1067 = vmatmul.mubr.bf16.vlgmr.msra.gmra.mxu0 %v8859_v5  ;;  %1147 = vmatmul.mubr.bf16.vlgmr.msra.gmra.mxu1 %v8860_v24  ;;  %v585_v5 = vrot.slane %v584_v29, 4  ;;  %v595_v24 = vrot.slane %v594_v43, 4  ;;  %v5980_v43 = vld [vmem:[%s5539_s9 + $0x170] sm:$0xff]  ;;  %v8739_v29 = vshll.u32 %v5916_v11, 16  ;;  %v6061_v3 = vrot.slane %v8878_v34, 4  ;;  %v6077_v34 = vld [vmem:[%s5539_s9 + $0x188] sm:$0xff] }
  0x55   : > { %1524 = vmatpush1.bf16.msra.mxu1 %v5180_v19  ;;  %2169 = vmatpush1.bf16.msra.mxu0 %v5181_v51  ;;  %v378_v19 = vor.u32 %v377_v56, %v5922_v14  ;;  %v5975_v51 = vrot.slane %v8730_v25, 5  ;;  %8865 = vst [vmem:[#allocation27_spill] sm:$0xff] %v5980_v43  ;;  %8883 = vst [vmem:[#allocation32_spill] sm:$0xff] %v6077_v34 }
  0x56   : > { %1525 = vmatprep.subr.bf16.mxu1 %v8854_v31  ;;  %1074 = vmatprep.mubr.bf16.mxu0 %v8864_v37  ;;  %v8867_v37 = vshrl.u32 %v5898_v45, 16  ;;  %v6004_v13 = vsel %vm5595_vm2, %v585_v5, %v5867_v33  ;;  %v8869_v5 = vshll.u32 %v5913_v9, 16  ;;  %v6039_v38 = vrot.slane %v8739_v29, 5  ;;  %v6042_v9 = vld [vmem:[%s5539_s9 + $0x98] sm:$0xff] }
  0x57   : > { %1154 = vmatprep.mubr.bf16.mxu1 %v8866_v18  ;;  %2170 = vmatprep.subr.bf16.mxu0 %v8854_v31  ;;  %v379_v33 = vrot.slane %v378_v19, 4  ;;  %v8871_v19 = vshrl.u32 %v5916_v11, 16  ;;  %8872 = vst [vmem:[#allocation29_spill] sm:$0xff] %v6042_v9  ;;  %v8873_v45 = vcombine.low %v5777_v63, %v5781_v57  ;;  %v6057_v29 = vld [vmem:[%s5539_s9 + $0x178] sm:$0xff]  ;;  %v8879_v57 = vshll.u32 %v5966_v21, 16  ;;  %v5190_v21 = vld [vmem:[%s8679_s1 + $0x10] sm:$0xff]  }
  0x58   : > { %v617_v25 = vrot.slane %v8867_v37, 4  ;;  %v8868_v37 = vshll.u32 %v5905_v1, 16  ;;  %v6018_v18 = vrot.slane %v8869_v5, 5  ;;  %8877 = vst [vmem:[#allocation30_spill] sm:$0xff] %v6057_v29 }
  0x59   : > { %1526 = vmatpush1.bf16.msra.mxu1 %v5182_v61  ;;  %2171 = vmatpush1.bf16.msra.mxu0 %v5183_v49  ;;  %v6014_v61 = vsel %vm5595_vm2, %v595_v24, %v599_v46  ;;  %v369_v49 = vrot.slane %v368_v60, 4  ;;  %v609_v46 = vrot.slane %v608_v44, 4  ;;  %v6031_v24 = vld [vmem:[%s5539_s9 + $0x88] sm:$0xff]  ;;  %v6035_v5 = vrot.slane %v8871_v19, 4 }
  0x5a   : > { %v383_v56 = vrot.slane %v8868_v37, 5  ;;  %1527 = vmatprep.subr.bf16.mxu1 %v8854_v31  ;;  %2172 = vmatprep.subr.bf16.mxu0 %v8854_v31  ;;  %v6021_v37 = vld [vmem:[%s5539_s9 + $0x90] sm:$0xff]  ;;  %v618_v60 = vor.u32 %v617_v25, %v5975_v51  ;;  %v8874_v25 = vcombine.low %v5785_v58, %v5794_v20  ;;  %v8875_v44 = vshll.u32 %v5963_v42, 16 }
  0x5b   : > { %8870 = vst [vmem:[#allocation28_spill] sm:$0xff] %v6021_v37  ;;  %v8876_v19 = vshrl.u32 %v5963_v42, 16  ;;  %v631_v63 = vrot.slane %v8879_v57, 5  ;;  %v8881_v58 = vshll.u32 %v5980_v43, 16  ;;  %v8884_v57 = vcombine.high %v5847_v15, %v5851_v10 }
  0x5c   : > { %1075 = vmatmul.mubr.bf16.gmra.mxu0 %v8873_v45  ;;  %1155 = vmatmul.mubr.bf16.gmra.mxu1 %v8874_v25  ;;  %v6052_v26 = vrot.slane %v8875_v44, 5  ;;  %v6066_v45 = vld [vmem:[%s5539_s9 + $0x180] sm:$0xff]  ;;  %v8882_v25 = vshrl.u32 %v5980_v43, 16  ;;  %v392_v55 = vor.u32 %v6039_v38, %v6035_v5  ;;  %v8888_v38 = vshll.u32 %v6042_v9, 16 }
  0x5d   : > { %v401_v41 = vrot.slane %v8876_v19, 4  ;;  %8880 = vst [vmem:[#allocation31_spill] sm:$0xff] %v6066_v45  ;;  %1528 = vmatpush1.bf16.msra.mxu1 %v5184_v0  ;;  %2173 = vmatpush1.bf16.msra.mxu0 %v5185_v35  ;;  %v6070_v20 = vrot.slane %v8881_v58, 5  ;;  %v8885_v0 = vcombine.high %v5891_v40, %v5895_v32  ;;  %v4690_v35 = vcombine.high %v6004_v13, %v6014_v61 }
  0x5e   : > { %v641_v44 = vrot.slane %v8882_v25, 4  ;;  %1082 = vmatprep.mubr.bf16.mxu0 %v8884_v57  ;;  %1529 = vmatprep.subr.bf16.mxu1 %v8854_v31  ;;  %v6096_v57 = vsel %vm5595_vm2, %v369_v49, %v5922_v14  ;;  %v8753_v19 = vshrl.u32 %v6066_v45, 16  ;;  %v619_v25 = vrot.slane %v618_v60, 4  ;;  %v5188_v14 = vld [vmem:[%s8679_s1 + $0x18] sm:$0xff]  }
  0x5f   : > { %1162 = vmatprep.mubr.bf16.mxu1 %v8885_v0  ;;  %2174 = vmatprep.subr.bf16.mxu0 %v8854_v31  ;;  %v6100_v0 = vsel %vm5595_vm2, %v379_v33, %v383_v56  ;;  %v402_v43 = vor.u32 %v401_v41, %v6052_v26  ;;  %v632_v56 = vor.u32 %v631_v63, %v6061_v3  ;;  %v8886_v60 = vshrl.u32 %v6021_v37, 16  ;;  %v5189_v41 = vld [vmem:[%s8679_s1 + $0x118] sm:$0xff]  }
  0x60   : > { %v642_v49 = vor.u32 %v641_v44, %v6070_v20  ;;  %v6128_v5 = vrot.slane %v8888_v38, 5  ;;  %v8889_v63 = vshrl.u32 %v6042_v9, 16  ;;  %v4689_v33 = vcombine.low %v6004_v13, %v6014_v61  ;;  %v5191_v61 = vld [vmem:[%s8679_s1 + $0x110] sm:$0xff]  }
  0x61   : > { %1530 = vmatpush1.bf16.msra.mxu1 %v5186_v2  ;;  %2175 = vmatpush1.bf16.msra.mxu0 %v5187_v59  ;;  %v412_v58 = vrot.slane %v8886_v60, 4  ;;  %v6122_v2 = vld [vmem:[%s5539_s9 + $0xa0] sm:$0xff]  ;;  %v8887_v59 = vshll.u32 %v6021_v37, 16  ;;  %v652_v38 = vrot.slane %v8753_v19, 4  ;;  %v8890_v53 = vshll.u32 %v6066_v45, 16  ;;  %v6181_v45 = vld [vmem:[%s5539_s9 + $0xb0] sm:$0xff] }
  0x62   : > { %1531 = vmatprep.subr.bf16.mxu1 %v8854_v31  ;;  %2176 = vmatprep.subr.bf16.mxu0 %v8854_v31  ;;  %v425_v44 = vrot.slane %v8889_v63, 4  ;;  %v8891_v63 = vcombine.low %v5847_v15, %v5851_v10  ;;  %v8892_v13 = vcombine.low %v5891_v40, %v5895_v32  ;;  %v6166_v15 = vld [vmem:[%s5539_s9 + $0x190] sm:$0xff]  ;;  %v6170_v32 = vld [vmem:[%s5539_s9 + $0xa8] sm:$0xff]  ;;  %v633_v10 = vrot.slane %v632_v56, 4 }
  0x63   : > { %v415_v3 = vrot.slane %v8887_v59, 5  ;;  %v655_v9 = vrot.slane %v8890_v53, 5  ;;  %v6156_v59 = vsel %vm5595_vm2, %v609_v46, %v5975_v51  ;;  %v6161_v53 = vsel %vm5595_vm2, %v619_v25, %v6018_v18  ;;  %8893 = vst [vmem:[#allocation33_spill] sm:$0xff] %v6166_v15 }
  0x64   : > { %1083 = vmatmul.mubr.bf16.gmra.mxu0 %v8891_v63  ;;  %1163 = vmatmul.mubr.bf16.gmra.mxu1 %v8892_v13  ;;  %v8894_v51 = vcombine.high %v5950_v54, %v5954_v39  ;;  %v393_v46 = vrot.slane %v392_v55, 4  ;;  %v403_v63 = vrot.slane %v402_v43, 4  ;;  %v8895_v18 = vshll.u32 %v6031_v24, 16 }
  0x65   : > { %1532 = vmatpush1.bf16.msra.mxu1 %v5188_v14  ;;  %v8896_v13 = vshll.u32 %v6057_v29, 16  ;;  %1170 = vmatprep.mubr.bf16.mxu1 %v4690_v35  ;;  %v643_v40 = vrot.slane %v642_v49, 4  ;;  %v416_v60 = vor.u32 %v415_v3, %v412_v58  ;;  %v4692_v55 = vcombine.high %v6156_v59, %v6161_v53  ;;  %v6193_v58 = vld [vmem:[%s5539_s9 + $0x198] sm:$0xff]  ;;  %v5193_v3 = vld [vmem:[%s8679_s1 + $0x108] sm:$0xff]  }
  0x66   : > { %1090 = vmatprep.mubr.bf16.mxu0 %v8894_v51  ;;  %v407_v25 = vrot.slane %v8895_v18, 5  ;;  %2177 = vmatpush1.bf16.msra.mxu0 %v5189_v41  ;;  %v426_v43 = vor.u32 %v425_v44, %v6128_v5  ;;  %v656_v35 = vor.u32 %v655_v9, %v652_v38  ;;  %v8897_v56 = vshll.u32 %v6077_v34, 16  ;;  %8898 = vst [vmem:[#allocation34_spill] sm:$0xff] %v6193_v58  ;;  %v5192_v41 = vld [vmem:[%s8679_s1 + $0x8] sm:$0xff]   ;;  %v6221_v9 = vld [vmem:[%s5539_s9 + $0xc0] sm:$0xff] }
  0x67   : > { %v647_v19 = vrot.slane %v8896_v13, 5  ;;  %1533 = vmatprep.subr.bf16.mxu1 %v8854_v31  ;;  %2178 = vmatprep.subr.bf16.mxu0 %v8854_v31  ;;  %v8899_v51 = vshrl.u32 %v6077_v34, 16  ;;  %v6207_v13 = vld [vmem:[%s5539_s9 + $0x1a0] sm:$0xff]  ;;  %8901 = vst [vmem:[#allocation36_spill] sm:$0xff] %v6221_v9  ;;  %v4691_v34 = vcombine.low %v6156_v59, %v6161_v53 }
  0x68   : > { %v6190_v49 = vrot.slane %v8897_v56, 5  ;;  %8900 = vst [vmem:[#allocation35_spill] sm:$0xff] %v6207_v13  ;;  %v6212_v56 = vsel %vm5595_vm2, %v393_v46, %v6052_v26  ;;  %v6216_v14 = vsel %vm5595_vm2, %v403_v63, %v407_v25  ;;  %v417_v46 = vrot.slane %v416_v60, 4  ;;  %v5195_v60 = vld [vmem:[%s8679_s1 + $0x100] sm:$0xff]  }
  0x69   : > { %v665_v18 = vrot.slane %v8899_v51, 4  ;;  %1534 = vmatpush1.bf16.msra.mxu1 %v5190_v21  ;;  %v6227_v21 = vsel %vm5595_vm2, %v633_v10, %v6070_v20  ;;  %v6231_v26 = vsel %vm5595_vm2, %v643_v40, %v647_v19  ;;  %v8902_v63 = vshll.u32 %v6122_v2, 16  ;;  %v6237_v51 = vld [vmem:[%s5539_s9 + $0xb8] sm:$0xff]  ;;  %v5194_v19 = vld [vmem:[%s8679_s1] sm:$0xff]  }
  0x6a   : > { %2179 = vmatpush1.bf16.msra.mxu0 %v5191_v61  ;;  %1535 = vmatprep.subr.bf16.mxu1 %v8854_v31  ;;  %v427_v44 = vrot.slane %v426_v43, 4  ;;  %v657_v61 = vrot.slane %v656_v35, 4  ;;  %v8903_v10 = vcombine.low %v5950_v54, %v5954_v39  ;;  %v8904_v43 = vshll.u32 %v6166_v15, 16 }
  0x6b   : > { %v431_v25 = vrot.slane %v8902_v63, 5  ;;  %2180 = vmatprep.subr.bf16.mxu0 %v8854_v31  ;;  %v666_v40 = vor.u32 %v665_v18, %v6190_v49  ;;  %v8905_v63 = vshrl.u32 %v6170_v32, 16  ;;  %v8906_v54 = vshll.u32 %v6170_v32, 16 }
  0x6c   : > { %1091 = vmatmul.mubr.bf16.gmra.mxu0 %v8903_v10  ;;  %1171 = vmatmul.mubr.bf16.gmra.mxu1 %v4689_v33  ;;  %v671_v35 = vrot.slane %v8904_v43, 5  ;;  %v6262_v33 = vld [vmem:[%s5539_s9 + $0xc8] sm:$0xff]  ;;  %v8908_v10 = vcombine.high %v6096_v57, %v6100_v0  ;;  %v8909_v18 = vshll.u32 %v6181_v45, 16  ;;  %v8910_v43 = vshrl.u32 %v6181_v45, 16 }
  0x6d   : > { %v6255_v20 = vrot.slane %v8905_v63, 4  ;;  %v6259_v39 = vrot.slane %v8906_v54, 5  ;;  %8907 = vst [vmem:[#allocation37_spill] sm:$0xff] %v6262_v33  ;;  %1178 = vmatprep.mubr.bf16.mxu1 %v4692_v55  ;;  %1536 = vmatpush1.bf16.msra.mxu1 %v5192_v41  ;;  %v4674_v55 = vcombine.high %v6212_v56, %v6216_v14  ;;  %v4694_v59 = vcombine.high %v6227_v21, %v6231_v26 }
  0x6e   : > { %1098 = vmatprep.mubr.bf16.mxu0 %v8908_v10  ;;  %v6269_v38 = vrot.slane %v8909_v18, 5  ;;  %v6273_v63 = vrot.slane %v8910_v43, 4  ;;  %2181 = vmatpush1.bf16.msra.mxu0 %v5193_v3  ;;  %v6282_v10 = vld [vmem:[%s5539_s9 + $0x1a8] sm:$0xff]  ;;  %v6287_v43 = vld [vmem:[%s5539_s9 + $0x1b0] sm:$0xff]  ;;  %v8913_v41 = vshrl.u32 %v6193_v58, 16  ;;  %v8914_v18 = vshll.u32 %v6193_v58, 16 }
  0x6f   : > { %8911 = vst [vmem:[#allocation38_spill] sm:$0xff] %v6282_v10  ;;  %8912 = vst [vmem:[#allocation39_spill] sm:$0xff] %v6287_v43  ;;  %1537 = vmatprep.subr.bf16.mxu1 %v8854_v31  ;;  %2182 = vmatprep.subr.bf16.mxu0 %v8854_v31  ;;  %v6302_v29 = vsel %vm5595_vm2, %v417_v46, %v6128_v5  ;;  %v6306_v15 = vsel %vm5595_vm2, %v427_v44, %v431_v25  ;;  %v667_v37 = vrot.slane %v666_v40, 4  ;;  %v6318_v46 = vld [vmem:[%s5539_s9 + $0x1b8] sm:$0xff] }
  0x70   : > { %v676_v3 = vrot.slane %v8913_v41, 4  ;;  %v679_v54 = vrot.slane %v8914_v18, 5  ;;  %v8915_v53 = vshll.u32 %v6207_v13, 16  ;;  %v8916_v41 = vshrl.u32 %v6207_v13, 16  ;;  %8917 = vst [vmem:[#allocation40_spill] sm:$0xff] %v6318_v46  ;;  %v5196_v44 = vld [vmem:[%s8679_s1 + $0x78] sm:$0xff]  }
  0x71   : > { %1538 = vmatpush1.bf16.msra.mxu1 %v5194_v19  ;;  %v5197_v25 = vld [vmem:[%s8679_s1 + $0x178] sm:$0xff]   ;;  %v440_v40 = vor.u32 %v6259_v39, %v6255_v20  ;;  %v8919_v19 = vshll.u32 %v6221_v9, 16  ;;  %v6338_v13 = vld [vmem:[%s5539_s9 + $0xd0] sm:$0xff]  ;;  %v8780_v20 = vshrl.u32 %v6287_v43, 16  ;;  %v8782_v39 = vshll.u32 %v6287_v43, 16 }
  0x72   : > { %v6311_v11 = vrot.slane %v8915_v53, 5  ;;  %v689_v58 = vrot.slane %v8916_v41, 4  ;;  %2183 = vmatpush1.bf16.msra.mxu0 %v5195_v60  ;;  %v450_v53 = vor.u32 %v6273_v63, %v6269_v38  ;;  %v8918_v41 = vshrl.u32 %v6221_v9, 16  ;;  %1539 = vmatprep.subr.bf16.mxu1 %v8854_v31  ;;  %8920 = vst [vmem:[#allocation41_spill] sm:$0xff] %v6338_v13 }
  0x73   : > { %v463_v60 = vrot.slane %v8919_v19, 5  ;;  %2184 = vmatprep.subr.bf16.mxu0 %v8854_v31  ;;  %v680_v5 = vor.u32 %v679_v54, %v676_v3  ;;  %v8921_v63 = vcombine.low %v6096_v57, %v6100_v0  ;;  %v6351_v54 = vsel %vm5595_vm2, %v657_v61, %v6190_v49  ;;  %v5199_v57 = vld [vmem:[%s8679_s1 + $0x170] sm:$0xff]  }
  0x74   : > { %v460_v42 = vrot.slane %v8918_v41, 4  ;;  %1179 = vmatmul.mubr.bf16.gmra.mxu1 %v4691_v34  ;;  %v5198_v41 = vld [vmem:[%s8679_s1 + $0x70] sm:$0xff]   ;;  %v6355_v3 = vsel %vm5595_vm2, %v667_v37, %v671_v35  ;;  %v4693_v49 = vcombine.low %v6227_v21, %v6231_v26  ;;  %v690_v61 = vor.u32 %v689_v58, %v6311_v11  ;;  %v6377_v58 = vld [vmem:[%s5539_s9 + $0x1c0] sm:$0xff]  ;;  %v6380_v26 = vld [vmem:[%s5539_s9 + $0xd8] sm:$0xff] }
  0x75   : > { %1099 = vmatmul.mubr.bf16.gmra.mxu0 %v8921_v63  ;;  %1186 = vmatprep.mubr.bf16.mxu1 %v4694_v59  ;;  %v8922_v37 = vshll.u32 %v6262_v33, 16  ;;  %v8923_v19 = vshrl.u32 %v6262_v33, 16  ;;  %v4676_v18 = vcombine.high %v6302_v29, %v6306_v15  ;;  %8925 = vst [vmem:[#allocation42_spill] sm:$0xff] %v6377_v58  ;;  %8926 = vst [vmem:[#allocation43_spill] sm:$0xff] %v6380_v26  ;;  %v700_v21 = vrot.slane %v8780_v20, 4 }
  0x76   : > { %1106 = vmatprep.mubr.bf16.mxu0 %v4674_v55  ;;  %1540 = vmatpush2.bf16.msra.mxu1 %v5196_v44  ;;  %v8924_v55 = vshll.u32 %v6237_v51, 16  ;;  %v464_v0 = vor.u32 %v463_v60, %v460_v42  ;;  %v4696_v44 = vcombine.high %v6351_v54, %v6355_v3  ;;  %v5200_v42 = vld [vmem:[%s8679_s1 + $0x68] sm:$0xff]   ;;  %v703_v34 = vrot.slane %v8782_v39, 5 }
  0x77   : > { %v6367_v35 = vrot.slane %v8922_v37, 5  ;;  %v473_v63 = vrot.slane %v8923_v19, 4  ;;  %2185 = vmatpush2.bf16.msra.mxu0 %v5197_v25  ;;  %1541 = vmatprep.subr.bf16.mxu1 %v8854_v31  ;;  %v441_v25 = vrot.slane %v440_v40, 4  ;;  %v451_v37 = vrot.slane %v450_v53, 4  ;;  %v5201_v60 = vld [vmem:[%s8679_s1 + $0x168] sm:$0xff]  }
  0x78   : > { %v455_v59 = vrot.slane %v8924_v55, 5  ;;  %2186 = vmatprep.subr.bf16.mxu0 %v8854_v31  ;;  %v681_v19 = vrot.slane %v680_v5, 4  ;;  %v6387_v55 = vld [vmem:[%s5539_s9 + $0xe0] sm:$0xff]  ;;  %v8928_v40 = vshll.u32 %v6318_v46, 16  ;;  %v8929_v5 = vshrl.u32 %v6318_v46, 16 }
  0x79   : > { %8927 = vst [vmem:[#allocation44_spill] sm:$0xff] %v6387_v55  ;;  %v691_v17 = vrot.slane %v690_v61, 4  ;;  %v8931_v52 = vshll.u32 %v6282_v10, 16  ;;  %v474_v27 = vor.u32 %v473_v63, %v6367_v35  ;;  %v8785_v20 = vshll.u32 %v6377_v58, 16  ;;  %v5202_v63 = vld [vmem:[%s8679_s1 + $0x60] sm:$0xff]  }
  0x7a   : > { %v6401_v53 = vrot.slane %v8928_v40, 5  ;;  %v713_v1 = vrot.slane %v8929_v5, 4  ;;  %1542 = vmatpush2.bf16.msra.mxu1 %v5198_v41  ;;  %v465_v39 = vrot.slane %v464_v0, 4  ;;  %v8933_v40 = vshll.u32 %v6338_v13, 16 }
  0x7b   : > { %v695_v36 = vrot.slane %v8931_v52, 5  ;;  %2187 = vmatpush2.bf16.msra.mxu0 %v5199_v57  ;;  %1543 = vmatprep.subr.bf16.mxu1 %v8854_v31  ;;  %v6422_v52 = vsel %vm5595_vm2, %v441_v25, %v6269_v38  ;;  %v6426_v61 = vsel %vm5595_vm2, %v451_v37, %v455_v59  ;;  %v8795_v41 = vshrl.u32 %v6380_v26, 16  ;;  %v5203_v38 = vld [vmem:[%s8679_s1 + $0x160] sm:$0xff]  }
  0x7c   : > { %v479_v43 = vrot.slane %v8933_v40, 5  ;;  %2188 = vmatprep.subr.bf16.mxu0 %v8854_v31  ;;  %v8794_v57 = vshll.u32 %v6380_v26, 16  ;;  %v8934_v0 = vcombine.low %v6212_v56, %v6216_v14  ;;  %1187 = vmatmul.mubr.bf16.gmra.mxu1 %v4693_v49  ;;  %v704_v25 = vor.u32 %v703_v34, %v700_v21 }
  0x7d   : > { %v714_v59 = vor.u32 %v713_v1, %v6401_v53  ;;  %v8786_v37 = vshll.u32 %v6387_v55, 16  ;;  %v8787_v5 = vshrl.u32 %v6387_v55, 16  ;;  %1194 = vmatprep.mubr.bf16.mxu1 %v4696_v44  ;;  %v475_v14 = vrot.slane %v474_v27, 4 }
  0x7e   : > { %1107 = vmatmul.mubr.bf16.gmra.mxu0 %v8934_v0  ;;  %v719_v56 = vrot.slane %v8785_v20, 5  ;;  %v8788_v49 = vshrl.u32 %v6406_v28, 16  ;;  %v8789_v40 = vshll.u32 %v6406_v28, 16  ;;  %1544 = vmatpush2.bf16.msra.mxu1 %v5200_v42  ;;  %v6449_v1 = vsel %vm5595_vm2, %v681_v19, %v6311_v11  ;;  %v6464_v11 = vld [vmem:[%s5539_s9 + $0xe8] sm:$0xff]  ;;  %v5204_v19 = vld [vmem:[%s8679_s1 + $0x58] sm:$0xff]  }
  0x7f   : > { %1114 = vmatprep.mubr.bf16.mxu0 %v4676_v18  ;;  %2189 = vmatpush2.bf16.msra.mxu0 %v5201_v60  ;;  %v6453_v18 = vsel %vm5595_vm2, %v691_v17, %v695_v36  ;;  %v8790_v27 = vshll.u32 %v6413_v47, 16  ;;  %v8791_v34 = vshrl.u32 %v6413_v47, 16  ;;  %v4675_v21 = vcombine.low %v6302_v29, %v6306_v15  ;;  %8935 = vst [vmem:[#allocation47_spill] sm:$0xff] %v6464_v11  ;;  %v6481_v60 = vld [vmem:[%s5539_s9 + $0x1d8] sm:$0xff] }
  0x80   : > { %v4695_v44 = vcombine.low %v6351_v54, %v6355_v3  ;;  %1545 = vmatprep.subr.bf16.mxu1 %v8854_v31  ;;  %2190 = vmatprep.subr.bf16.mxu0 %v8854_v31  ;;  %v484_v17 = vrot.slane %v8795_v41, 4  ;;  %v487_v36 = vrot.slane %v8794_v57, 5  ;;  %v705_v29 = vrot.slane %v704_v25, 4  ;;  %v5205_v54 = vld [vmem:[%s8679_s1 + $0x158] sm:$0xff]   ;;  %8936 = vst [vmem:[#allocation48_spill] sm:$0xff] %v6481_v60 }
  0x81   : > { %v715_v15 = vrot.slane %v714_v59, 4  ;;  %v493_v3 = vrot.slane %v8786_v37, 5  ;;  %v497_v42 = vrot.slane %v8787_v5, 4  ;;  %v4678_v0 = vcombine.high %v6422_v52, %v6426_v61 }
  0x82   : > { %v4698_v20 = vcombine.high %v6449_v1, %v6453_v18  ;;  %v724_v25 = vrot.slane %v8788_v49, 4  ;;  %v727_v59 = vrot.slane %v8789_v40, 5  ;;  %1546 = vmatpush2.bf16.msra.mxu1 %v5202_v63  ;;  %v733_v37 = vrot.slane %v8790_v27, 5 }
  0x83   : > { %2191 = vmatpush2.bf16.msra.mxu0 %v5203_v38  ;;  %v737_v5 = vrot.slane %v8791_v34, 4  ;;  %1547 = vmatprep.subr.bf16.mxu1 %v8854_v31  ;;  %v6500_v49 = vsel %vm5595_vm2, %v465_v39, %v6367_v35  ;;  %v488_v40 = vor.u32 %v487_v36, %v484_v17  ;;  %v8793_v63 = vshll.u32 %v6464_v11, 16  ;;  %v5206_v35 = vld [vmem:[%s8679_s1 + $0x50] sm:$0xff]   ;;  %v5208_v36 = vld [vmem:[%s8679_s1 + $0x48] sm:$0xff]  }
  0x84   : > { %2192 = vmatprep.subr.bf16.mxu0 %v8854_v31  ;;  %1195 = vmatmul.mubr.bf16.gmra.mxu1 %v4695_v44  ;;  %v480_v38 = vsel %vm5595_vm2, %v475_v14, %v479_v43  ;;  %v710_v27 = vsel %vm5595_vm2, %v705_v29, %v6401_v53  ;;  %v498_v34 = vor.u32 %v497_v42, %v493_v3  ;;  %v5207_v43 = vld [vmem:[%s8679_s1 + $0x150] sm:$0xff]   ;;  %v1779_v57 = vrot.slane %v6031_v24, 5 }
  0x85   : > { %1202 = vmatprep.mubr.bf16.mxu1 %v4698_v20  ;;  %v720_v39 = vsel %vm5595_vm2, %v715_v15, %v719_v56  ;;  %v728_v20 = vor.u32 %v727_v59, %v724_v25  ;;  %v738_v14 = vor.u32 %v737_v5, %v733_v37  ;;  %v4677_v53 = vcombine.low %v6422_v52, %v6426_v61  ;;  %v5209_v5 = vld [vmem:[%s8679_s1 + $0x148] sm:$0xff]  }
  0x86   : > { %1115 = vmatmul.mubr.bf16.gmra.mxu0 %v4675_v21  ;;  %v8792_v21 = vshll.u32 %v6481_v60, 16  ;;  %1548 = vmatpush2.bf16.msra.mxu1 %v5204_v19  ;;  %v4697_v56 = vcombine.low %v6449_v1, %v6453_v18  ;;  %v489_v44 = vrot.slane %v488_v40, 4  ;;  %v503_v17 = vrot.slane %v8793_v63, 5  ;;  %v5210_v18 = vld [vmem:[%s8679_s1 + $0x40] sm:$0xff]  }
  0x87   : > { %1122 = vmatprep.mubr.bf16.mxu0 %v4678_v0  ;;  %2193 = vmatpush2.bf16.msra.mxu0 %v5205_v54  ;;  %v4680_v19 = vcombine.high %v6500_v49, %v480_v38  ;;  %v4700_v29 = vcombine.high %v710_v27, %v720_v39  ;;  %v499_v15 = vrot.slane %v498_v34, 4  ;;  %v729_v61 = vrot.slane %v728_v20, 4  ;;  %v6551_v0 = vld [vmem:[%s5539_s9 + $0x8] sm:$0xff] }
  0x88   : > { %1549 = vmatprep.subr.bf16.mxu1 %v8854_v31  ;;  %2194 = vmatprep.subr.bf16.mxu0 %v8854_v31  ;;  %v743_v52 = vrot.slane %v8792_v21, 5  ;;  %v739_v40 = vrot.slane %v738_v14, 4  ;;  %v494_v1 = vsel %vm5595_vm2, %v489_v44, %v493_v3  ;;  %v5211_v3 = vld [vmem:[%s8679_s1 + $0x140] sm:$0xff]   ;;  %v1741_v25 = vrot.slane %v6551_v0, 5 }
  0x89   : > { %v504_v34 = vsel %vm5595_vm2, %v499_v15, %v503_v17  ;;  %v734_v54 = vsel %vm5595_vm2, %v729_v61, %v733_v37  ;;  %v4679_v37 = vcombine.low %v6500_v49, %v480_v38  ;;  %v4699_v30 = vcombine.low %v710_v27, %v720_v39  ;;  %v6576_v39 = vld [vmem:[%s5539_s9 + $0x20] sm:$0xff]  ;;  %v6586_v61 = vld [vmem:[%s5539_s9 + $0x28] sm:$0xff] }
  0x8a   : > { %1550 = vmatpush2.bf16.msra.mxu1 %v5206_v35  ;;  %v744_v42 = vsel %vm5595_vm2, %v739_v40, %v743_v52  ;;  %v4682_v59 = vcombine.high %v494_v1, %v504_v34  ;;  %v1743_v14 = vrot.slane %v1741_v25, 4  ;;  %v1748_v44 = vrot.slane %v6576_v39, 5 }
  0x8b   : > { %2195 = vmatpush2.bf16.msra.mxu0 %v5207_v43  ;;  %1551 = vmatprep.subr.bf16.mxu1 %v8854_v31  ;;  %v4702_v35 = vcombine.high %v734_v54, %v744_v42  ;;  %v6558_v43 = vld [vmem:[%s5539_s9] sm:$0xff]  ;;  %v4681_v17 = vcombine.low %v494_v1, %v504_v34  ;;  %v1751_v40 = vrot.slane %v6586_v61, 5  ;;  %v6590_v1 = vld [vmem:[%s5539_s9 + $0x38] sm:$0xff]  ;;  %v8941_v60 = vshll.u32 %v5547_v6, 16 }
  0x8c   : > { %2196 = vmatprep.subr.bf16.mxu0 %v8854_v31  ;;  %1203 = vmatmul.mubr.bf16.gmra.mxu1 %v4697_v56  ;;  %v4775_v20 = vrot.slane %v6558_v43, 9  ;;  %v1750_v52 = vrot.slane %v1748_v44, 4  ;;  %v8942_v28 = vshll.u32 %v5553_v8, 16  ;;  %v6742_v8 = vld [vmem:[%s5539_s9 + $0x98] sm:$0xff]  ;;  %v8964_v49 = vshrl.u32 %v5637_v50, 16 }
  0x8d   : > { %1210 = vmatprep.mubr.bf16.mxu1 %v4700_v29  ;;  %v6582_v29 = vld [vmem:[%s5539_s9 + $0x18] sm:$0xff]  ;;  %v2405_v47 = vrot.slane %v8941_v60, 6 }
  0x8e   : > { %1123 = vmatmul.mubr.bf16.gmra.mxu0 %v4677_v53  ;;  %1552 = vmatpush2.bf16.msra.mxu1 %v5208_v36  ;;  %v6562_v53 = vld [vmem:[%s5539_s9 + $0x10] sm:$0xff]  ;;  %v1742_v27 = vsel %vm6565_vm5, %v4775_v20, %v1741_v25  ;;  %v4701_v36 = vcombine.low %v734_v54, %v744_v42  ;;  %v4776_v15 = vrot.slane %v6582_v29, 9  ;;  %v1752_v54 = vsel %vm6565_vm5, %v1750_v52, %v1751_v40  ;;  %v5214_v25 = vld [vmem:[%s8679_s1 + $0x1b8] sm:$0xff]  }
  0x8f   : > { %1130 = vmatprep.mubr.bf16.mxu0 %v4680_v19  ;;  %2197 = vmatpush2.bf16.msra.mxu0 %v5209_v5  ;;  %v1744_v56 = vrot.slane %v6562_v53, 5  ;;  %v4720_v5 = vcombine.high %v6558_v43, %v6551_v0  ;;  %v2416_v58 = vrot.slane %v8942_v28, 6  ;;  %v2413_v46 = vshrl.u32 %v6562_v53, 16 }
  0x90   : > { %1553 = vmatprep.subr.bf16.mxu1 %v8854_v31  ;;  %2198 = vmatprep.subr.bf16.mxu0 %v8854_v31  ;;  %v1749_v34 = vsel %vm6565_vm5, %v4776_v15, %v1748_v44  ;;  %v5219_v44 = vld [vmem:[%s8679_s1 + $0x230] sm:$0xff]   ;;  %v4721_v15 = vcombine.low %v6582_v29, %v6576_v39  ;;  %v1783_v28 = vrot.slane %v6742_v8, 5 }
  0x91   : > { %v1745_v38 = vsel %vm6565_vm5, %v1743_v14, %v1744_v56  ;;  %v6612_v56 = vld [vmem:[%s5539_s9 + $0x40] sm:$0xff]  ;;  %v4829_v52 = vcombine.low %v1749_v34, %v1752_v54 }
  0x92   : > { %1554 = vmatpush2.bf16.msra.mxu1 %v5210_v18  ;;  %v4828_v19 = vcombine.high %v1742_v27, %v1745_v38  ;;  %v1755_v18 = vrot.slane %v6590_v1, 5  ;;  %v4827_v42 = vcombine.low %v1742_v27, %v1745_v38  ;;  %v1758_v27 = vrot.slane %v6612_v56, 5  ;;  %v5218_v38 = vld [vmem:[%s8679_s1 + $0x1b0] sm:$0xff]  }
  0x93   : > { %2199 = vmatpush2.bf16.msra.mxu0 %v5211_v3  ;;  %2993 = vmatprep.subr.bf16.mxu1 %v8854_v31  ;;  %v4719_v3 = vcombine.low %v6558_v43, %v6551_v0 }
  0x94   : > { %3658 = vmatprep.subr.bf16.mxu0 %v8854_v31  ;;  %1211 = vmatmul.mubr.bf16.gmra.mxu1 %v4699_v30  ;;  %v4722_v30 = vcombine.high %v6582_v29, %v6576_v39  ;;  %v1757_v14 = vrot.slane %v1755_v18, 4 }
  0x95   : > { %1218 = vmatprep.mubr.bf16.mxu1 %v4702_v35  ;;  %v6608_v35 = vld [vmem:[%s5539_s9 + $0x30] sm:$0xff] }
  0x96   : > { %1131 = vmatmul.mubr.bf16.gmra.mxu0 %v4679_v37  ;;  %v5215_v37 = vld [vmem:[%s8679_s1 + $0x238] sm:$0xff]   ;;  %v4777_v20 = vrot.slane %v6608_v35, 9  ;;  %v4724_v40 = vcombine.high %v6608_v35, %v6590_v1 }
  0x97   : > { %1138 = vmatprep.mubr.bf16.mxu0 %v4682_v59  ;;  %v4830_v59 = vcombine.high %v1749_v34, %v1752_v54  ;;  %v6645_v54 = vld [vmem:[%s5539_s9 + $0x58] sm:$0xff] }
  0x9c   : > { %1219 = vmatmul.mubr.bf16.gmra.mxu1 %v4701_v36  ;;  %v1759_v36 = vsel %vm6565_vm5, %v1757_v14, %v1758_v27  ;;  %v6656_v14 = vld [vmem:[%s5539_s9 + $0x68] sm:$0xff] }
  0x9d   : > { %1555 = vmatprep.mubr.bf16.mxu1 %v4720_v5  ;;  %v6626_v5 = vld [vmem:[%s5539_s9 + $0x50] sm:$0xff]  ;;  %v1769_v27 = vrot.slane %v6656_v14, 5 }
  0x9e   : > { %1139 = vmatmul.mubr.bf16.gmra.mxu0 %v4681_v17  ;;  %v1756_v17 = vsel %vm6565_vm5, %v4777_v20, %v1755_v18 }
  0x9f   : > { %2200 = vmatprep.mubr.bf16.mxu0 %v4828_v19  ;;  %v1762_v19 = vrot.slane %v6626_v5, 5  ;;  %v4832_v18 = vcombine.high %v1756_v17, %v1759_v36 }
  0xa1   : > { %v1764_v34 = vrot.slane %v1762_v19, 4 }
  0xa4   : > { %1556 = vmatmul.mubr.bf16.vlgmr.msra.gmra.mxu1 %v4719_v3  ;;  %v6641_v3 = vld [vmem:[%s5539_s9 + $0x48] sm:$0xff] }
  0xa5   : > { %2994 = vmatpush1.bf16.msra.mxu1 %v5214_v25  ;;  %1563 = vmatprep.mubr.bf16.mxu1 %v4722_v30  ;;  %v4778_v25 = vrot.slane %v6641_v3, 9  ;;  %v5224_v30 = vld [vmem:[%s8679_s1 + $0x228] sm:$0xff]  }
  0xa6   : > { %2201 = vmatmul.mubr.bf16.vlgmr.msra.gmra.mxu0 %v4827_v42  ;;  %2995 = vmatprep.subr.bf16.mxu1 %v8854_v31  ;;  %v5222_v42 = vld [vmem:[%s8679_s1 + $0x1a8] sm:$0xff]  }
  0xa7   : > { %3659 = vmatpush1.bf16.msra.mxu0 %v5215_v37  ;;  %2208 = vmatprep.mubr.bf16.mxu0 %v4830_v59  ;;  %v1765_v37 = vrot.slane %v6645_v54, 5  ;;  %v1763_v59 = vsel %vm6565_vm5, %v4778_v25, %v1762_v19  ;;  %v4723_v19 = vcombine.low %v6608_v35, %v6590_v1  ;;  %v1771_v25 = vrot.slane %v1769_v27, 4 }
  0xa8   : > { %3660 = vmatprep.subr.bf16.mxu0 %v8854_v31 }
  0xa9   : > { %2996 = vmatpush1.bf16.msra.mxu1 %v5218_v38  ;;  %v1766_v20 = vsel %vm6565_vm5, %v1764_v34, %v1765_v37  ;;  %v5227_v38 = vld [vmem:[%s8679_s1 + $0x1a0] sm:$0xff]   ;;  %v6676_v34 = vld [vmem:[%s5539_s9 + $0x70] sm:$0xff] }
  0xaa   : > { %2997 = vmatprep.subr.bf16.mxu1 %v8854_v31  ;;  %v1772_v37 = vrot.slane %v6676_v34, 5 }
  0xab   : > { %3661 = vmatpush1.bf16.msra.mxu0 %v5219_v44  ;;  %v5229_v44 = vld [vmem:[%s8679_s1 + $0x220] sm:$0xff]  }
  0xac   : > { %3662 = vmatprep.subr.bf16.mxu0 %v8854_v31  ;;  %1564 = vmatmul.mubr.bf16.gmra.mxu1 %v4721_v15  ;;  %v4831_v15 = vcombine.low %v1756_v17, %v1759_v36  ;;  %v5232_v17 = vld [vmem:[%s8679_s1 + $0x198] sm:$0xff]  }
  0xad   : > { %1571 = vmatprep.mubr.bf16.mxu1 %v4724_v40  ;;  %2998 = vmatpush1.bf16.msra.mxu1 %v5222_v42  ;;  %v4834_v40 = vcombine.high %v1763_v59, %v1766_v20  ;;  %v5233_v36 = vld [vmem:[%s8679_s1 + $0x218] sm:$0xff]  }
  0xae   : > { %2209 = vmatmul.mubr.bf16.gmra.mxu0 %v4829_v52  ;;  %2999 = vmatprep.subr.bf16.mxu1 %v8854_v31  ;;  %v4726_v52 = vcombine.high %v6641_v3, %v6626_v5 }
  0xaf   : > { %2216 = vmatprep.mubr.bf16.mxu0 %v4832_v18  ;;  %3663 = vmatpush1.bf16.msra.mxu0 %v5224_v30  ;;  %v6672_v18 = vld [vmem:[%s5539_s9 + $0x60] sm:$0xff] }
  0xb0   : > { %3664 = vmatprep.subr.bf16.mxu0 %v8854_v31  ;;  %v4779_v42 = vrot.slane %v6672_v18, 9 }
  0xb1   : > { %3000 = vmatpush1.bf16.msra.mxu1 %v5227_v38  ;;  %v6693_v38 = vsel %vm6565_vm5, %v1771_v25, %v1772_v37  ;;  %v4728_v25 = vcombine.high %v6672_v18, %v6656_v14 }
  0xb2   : > { %3001 = vmatprep.subr.bf16.mxu1 %v8854_v31  ;;  %v6689_v30 = vsel %vm6565_vm5, %v4779_v42, %v1769_v27  ;;  %v4725_v27 = vcombine.low %v6641_v3, %v6626_v5 }
  0xb3   : > { %3665 = vmatpush1.bf16.msra.mxu0 %v5229_v44  ;;  %v6696_v44 = vld [vmem:[%s5539_s9 + $0x80] sm:$0xff]  ;;  %v4836_v37 = vcombine.high %v6689_v30, %v6693_v38 }
  0xb4   : > { %3666 = vmatprep.subr.bf16.mxu0 %v8854_v31  ;;  %1572 = vmatmul.mubr.bf16.gmra.mxu1 %v4723_v19  ;;  %v1776_v21 = vrot.slane %v6696_v44, 5  ;;  %v5236_v19 = vld [vmem:[%s8679_s1 + $0x190] sm:$0xff]  }
  0xb5   : > { %1579 = vmatprep.mubr.bf16.mxu1 %v4726_v52  ;;  %3002 = vmatpush1.bf16.msra.mxu1 %v5232_v17  ;;  %v4833_v52 = vcombine.low %v1763_v59, %v1766_v20  ;;  %v6716_v17 = vld [vmem:[%s5539_s9 + $0x78] sm:$0xff]  ;;  %v5240_v59 = vld [vmem:[%s8679_s1 + $0x188] sm:$0xff]  }
  0xb6   : > { %2217 = vmatmul.mubr.bf16.gmra.mxu0 %v4831_v15  ;;  %v5237_v15 = vld [vmem:[%s8679_s1 + $0x210] sm:$0xff]   ;;  %3003 = vmatprep.subr.bf16.mxu1 %v8854_v31  ;;  %v1778_v63 = vrot.slane %v1776_v21, 4  ;;  %v5242_v20 = vld [vmem:[%s8679_s1 + $0x208] sm:$0xff]  }
  0xb7   : > { %2224 = vmatprep.mubr.bf16.mxu0 %v4834_v40  ;;  %3667 = vmatpush1.bf16.msra.mxu0 %v5233_v36  ;;  %v8939_v40 = vshll.u32 %v5550_v7, 16  ;;  %v4780_v36 = vrot.slane %v6716_v17, 9 }
  0xb8   : > { %3668 = vmatprep.subr.bf16.mxu0 %v8854_v31 }
  0xb9   : > { %v2409_v42 = vrot.slane %v8939_v40, 6  ;;  %3004 = vmatpush1.bf16.msra.mxu1 %v5236_v19  ;;  %v8940_v40 = vshrl.u32 %v5547_v6, 16  ;;  %v8943_v19 = vshrl.u32 %v5550_v7, 16  ;;  %v6739_v6 = vsel %vm6565_vm5, %v4780_v36, %v1776_v21  ;;  %v5245_v7 = vld [vmem:[%s8679_s1 + $0x180] sm:$0xff]  }
  0xba   : > { %3005 = vmatprep.subr.bf16.mxu1 %v8854_v31 }
  0xbb   : > { %3669 = vmatpush1.bf16.msra.mxu0 %v5237_v15  ;;  %v2404_v41 = vrot.slane %v8940_v40, 5  ;;  %v2408_v15 = vrot.slane %v8943_v19, 5  ;;  %v2415_v40 = vrot.slane %v2413_v46, 5  ;;  %v4737_v19 = vcombine.low %v6380_v26, %v6387_v55 }
  0xbc   : > { %3670 = vmatprep.subr.bf16.mxu0 %v8854_v31  ;;  %1580 = vmatmul.mubr.bf16.gmra.mxu1 %v4725_v27  ;;  %v1780_v27 = vsel %vm6565_vm5, %v1778_v63, %v1779_v57  ;;  %v4727_v63 = vcombine.low %v6672_v18, %v6656_v14 }
  0xbd   : > { %v2406_v10 = vor.u32 %v2405_v47, %v2404_v41  ;;  %1587 = vmatprep.mubr.bf16.mxu1 %v4728_v25  ;;  %v2410_v60 = vor.u32 %v2409_v42, %v2408_v15  ;;  %3006 = vmatpush1.bf16.msra.mxu1 %v5240_v59  ;;  %v5247_v47 = vld [vmem:[%s8679_s1 + $0x200] sm:$0xff]   ;;  %v2417_v57 = vor.u32 %v2416_v58, %v2415_v40  ;;  %v1785_v59 = vrot.slane %v1783_v28, 4 }
  0xbe   : > { %2225 = vmatmul.mubr.bf16.gmra.mxu0 %v4833_v52  ;;  %3007 = vmatprep.subr.bf16.mxu1 %v8854_v31  ;;  %v4835_v52 = vcombine.low %v6689_v30, %v6693_v38  ;;  %v4838_v25 = vcombine.high %v6739_v6, %v1780_v27  ;;  %v1786_v30 = vrot.slane %v6122_v2, 5  ;;  %v5250_v38 = vld [vmem:[%s8679_s1 + $0x1f8] sm:$0xff]   ;;  %v1790_v40 = vrot.slane %v6181_v45, 5 }
  0xbf   : > { %2232 = vmatprep.mubr.bf16.mxu0 %v4836_v37  ;;  %3671 = vmatpush1.bf16.msra.mxu0 %v5242_v20  ;;  %v2407_v41 = vrot.slane %v2406_v10, 4  ;;  %v2412_v46 = vrot.slane %v2410_v60, 4  ;;  %v4730_v10 = vcombine.high %v6716_v17, %v6696_v44  ;;  %v6771_v37 = vld [vmem:[%s5539_s9 + $0x90] sm:$0xff]  ;;  %v5251_v20 = vld [vmem:[%s8679_s1 + $0x278] sm:$0xff]  }
  0xc0   : > { %3672 = vmatprep.subr.bf16.mxu0 %v8854_v31  ;;  %v4781_v36 = vrot.slane %v6771_v37, 9 }
  0xc1   : > { %v6765_v42 = vsel %vm6755_vm8, %v2407_v41, %v2410_v60  ;;  %v6776_v58 = vsel %vm6755_vm8, %v2412_v46, %v2417_v57  ;;  %3008 = vmatpush1.bf16.msra.mxu1 %v5245_v7  ;;  %v1787_v60 = vsel %vm6565_vm5, %v1785_v59, %v1786_v30  ;;  %v5255_v41 = vld [vmem:[%s8679_s1 + $0x270] sm:$0xff]   ;;  %v4837_v46 = vcombine.low %v6739_v6, %v1780_v27  ;;  %v5263_v59 = vld [vmem:[%s8679_s1 + $0x1e0] sm:$0xff]  }
  0xc2   : > { %3009 = vmatprep.subr.bf16.mxu1 %v8854_v31  ;;  %v1784_v7 = vsel %vm6565_vm5, %v4781_v36, %v1783_v28  ;;  %v4729_v28 = vcombine.low %v6716_v17, %v6696_v44  ;;  %v4732_v57 = vcombine.high %v6771_v37, %v6742_v8  ;;  %v5258_v36 = vld [vmem:[%s8679_s1 + $0x1e8] sm:$0xff]   ;;  %v1797_v27 = vrot.slane %v6262_v33, 5  ;;  %v5265_v30 = vld [vmem:[%s8679_s1 + $0x260] sm:$0xff]  }
  0xc3   : > { %3673 = vmatpush1.bf16.msra.mxu0 %v5247_v47  ;;  %v5254_v47 = vld [vmem:[%s8679_s1 + $0x1f0] sm:$0xff]   ;;  %v5260_v44 = vld [vmem:[%s8679_s1 + $0x268] sm:$0xff]  }
  0xc4   : > { %3674 = vmatprep.subr.bf16.mxu0 %v8854_v31  ;;  %1588 = vmatmul.mubr.bf16.gmra.mxu1 %v4727_v63  ;;  %v4840_v63 = vcombine.high %v1784_v7, %v1787_v60 }
  0xc5   : > { %1595 = vmatprep.mubr.bf16.mxu1 %v4730_v10  ;;  %3010 = vmatpush2.bf16.msra.mxu1 %v5250_v38  ;;  %v1792_v10 = vrot.slane %v1790_v40, 4  ;;  %v4731_v38 = vcombine.low %v6771_v37, %v6742_v8 }
  0xc6   : > { %2233 = vmatmul.mubr.bf16.gmra.mxu0 %v4835_v52  ;;  %3011 = vmatprep.subr.bf16.mxu1 %v8854_v31  ;;  %v4782_v52 = vrot.slane %v6170_v32, 9 }
  0xc7   : > { %2240 = vmatprep.mubr.bf16.mxu0 %v4838_v25  ;;  %3675 = vmatpush2.bf16.msra.mxu0 %v5251_v20  ;;  %v1793_v25 = vrot.slane %v6237_v51, 5  ;;  %v4839_v20 = vcombine.low %v1784_v7, %v1787_v60  ;;  %v5269_v7 = vld [vmem:[%s8679_s1 + $0x258] sm:$0xff]  }
  0xc8   : > { %3676 = vmatprep.subr.bf16.mxu0 %v8854_v31  ;;  %v1791_v17 = vsel %vm6565_vm5, %v4782_v52, %v1790_v40  ;;  %v6835_v40 = vld [vmem:[%s5539_s9 + $0xa8] sm:$0xff] }
  0xc9   : > { %3012 = vmatpush2.bf16.msra.mxu1 %v5254_v47  ;;  %v1794_v6 = vsel %vm6565_vm5, %v1792_v10, %v1793_v25  ;;  %v4734_v47 = vcombine.high %v6835_v40, %v6181_v45  ;;  %v1804_v10 = vrot.slane %v6387_v55, 5  ;;  %v5272_v25 = vld [vmem:[%s8679_s1 + $0x1d0] sm:$0xff]  }
  0xca   : > { %3013 = vmatprep.subr.bf16.mxu1 %v8854_v31 }
  0xcb   : > { %3677 = vmatpush2.bf16.msra.mxu0 %v5255_v41  ;;  %v4842_v41 = vcombine.high %v1791_v17, %v1794_v6 }
  0xcc   : > { %3678 = vmatprep.subr.bf16.mxu0 %v8854_v31  ;;  %1596 = vmatmul.mubr.bf16.gmra.mxu1 %v4729_v28  ;;  %v4783_v28 = vrot.slane %v6221_v9, 9 }
  0xcd   : > { %1603 = vmatprep.mubr.bf16.mxu1 %v4732_v57  ;;  %3014 = vmatpush2.bf16.msra.mxu1 %v5258_v36  ;;  %v1800_v57 = vrot.slane %v6338_v13, 5  ;;  %v5273_v36 = vld [vmem:[%s8679_s1 + $0x250] sm:$0xff]  }
  0xce   : > { %2241 = vmatmul.mubr.bf16.gmra.mxu0 %v4837_v46  ;;  %3015 = vmatprep.subr.bf16.mxu1 %v8854_v31  ;;  %v1799_v46 = vrot.slane %v1797_v27, 4  ;;  %v1798_v60 = vsel %vm6565_vm5, %v4783_v28, %v1797_v27  ;;  %v5276_v28 = vld [vmem:[%s8679_s1 + $0x1c8] sm:$0xff]  }
  0xcf   : > { %2248 = vmatprep.mubr.bf16.mxu0 %v4840_v63  ;;  %3679 = vmatpush2.bf16.msra.mxu0 %v5260_v44  ;;  %v5268_v63 = vld [vmem:[%s8679_s1 + $0x1d8] sm:$0xff]   ;;  %v6863_v44 = vld [vmem:[%s5539_s9 + $0xb0] sm:$0xff] }
  0xd0   : > { %3680 = vmatprep.subr.bf16.mxu0 %v8854_v31  ;;  %v1801_v52 = vsel %vm6565_vm5, %v1799_v46, %v1800_v57  ;;  %v4733_v27 = vcombine.low %v6835_v40, %v6863_v44  ;;  %v5305_v57 = vld [vmem:[%s5539_s9 + $0xf8] sm:$0xff] }
  0xd1   : > { %3016 = vmatpush2.bf16.msra.mxu1 %v5263_v59  ;;  %v4841_v59 = vcombine.low %v1791_v17, %v1794_v6  ;;  %v5278_v17 = vld [vmem:[%s8679_s1 + $0x248] sm:$0xff]  }
  0xd2   : > { %3017 = vmatprep.subr.bf16.mxu1 %v8854_v31 }
  0xd3   : > { %3681 = vmatpush2.bf16.msra.mxu0 %v5265_v30  ;;  %v4736_v30 = vcombine.high %v6221_v9, %v6262_v33 }
  0xd4   : > { %3682 = vmatprep.subr.bf16.mxu0 %v8854_v31  ;;  %1604 = vmatmul.mubr.bf16.gmra.mxu1 %v4731_v38  ;;  %v4844_v38 = vcombine.high %v1798_v60, %v1801_v52 }
  0xd5   : > { %1611 = vmatprep.mubr.bf16.mxu1 %v4734_v47  ;;  %3018 = vmatpush2.bf16.msra.mxu1 %v5268_v63  ;;  %v1806_v47 = vrot.slane %v1804_v10, 4  ;;  %v1811_v63 = vrot.slane %v5305_v57, 5 }
  0xd6   : > { %2249 = vmatmul.mubr.bf16.gmra.mxu0 %v4839_v20  ;;  %3019 = vmatprep.subr.bf16.mxu1 %v8854_v31  ;;  %v4784_v20 = vrot.slane %v6380_v26, 9 }
  0xd7   : > { %2256 = vmatprep.mubr.bf16.mxu0 %v4842_v41  ;;  %3683 = vmatpush2.bf16.msra.mxu0 %v5269_v7  ;;  %v1807_v41 = vrot.slane %v6464_v11, 5  ;;  %v5281_v7 = vld [vmem:[%s8679_s1 + $0x1c0] sm:$0xff]   ;;  %v5310_v11 = vld [vmem:[%s5539_s9 + $0x108] sm:$0xff] }
  0xd8   : > { %3684 = vmatprep.subr.bf16.mxu0 %v8854_v31  ;;  %v1805_v6 = vsel %vm6565_vm5, %v4784_v20, %v1804_v10  ;;  %v6893_v10 = vld [vmem:[%s5539_s9 + $0xc0] sm:$0xff] }
  0xd9   : > { %3020 = vmatpush2.bf16.msra.mxu1 %v5272_v25  ;;  %v1808_v46 = vsel %vm6565_vm5, %v1806_v47, %v1807_v41  ;;  %v5283_v25 = vld [vmem:[%s8679_s1 + $0x240] sm:$0xff]   ;;  %8946 = vst [vmem:[#allocation49_spill] sm:$0xff] %v6893_v10  ;;  %v1813_v47 = vrot.slane %v1811_v63, 4 }
  0xda   : > { %3021 = vmatprep.subr.bf16.mxu1 %v8854_v31  ;;  %v6901_v41 = vld [vmem:[%s5539_s9 + $0x100] sm:$0xff]  ;;  %v4845_v15 = vcombine.low %v1805_v6, %v1808_v46 }
  0xdb   : > { %3685 = vmatpush2.bf16.msra.mxu0 %v5273_v36  ;;  %v4735_v36 = vcombine.low %v6893_v10, %v6262_v33 }
  0xdc   : > { %3686 = vmatprep.subr.bf16.mxu0 %v8854_v31  ;;  %1612 = vmatmul.mubr.bf16.gmra.mxu1 %v4733_v27  ;;  %v4843_v27 = vcombine.low %v1798_v60, %v1801_v52  ;;  %v5309_v52 = vld [vmem:[%s5539_s9 + $0x110] sm:$0xff] }
  0xdd   : > { %1619 = vmatprep.mubr.bf16.mxu1 %v4736_v30  ;;  %3022 = vmatpush2.bf16.msra.mxu1 %v5276_v28  ;;  %v4846_v30 = vcombine.high %v1805_v6, %v1808_v46  ;;  %v1814_v28 = vrot.slane %v6901_v41, 5  ;;  %v5312_v6 = vld [vmem:[%s5539_s9 + $0x128] sm:$0xff]  ;;  %v4742_v10 = vcombine.high %v5310_v11, %v5309_v52 }
  0xde   : > { %2257 = vmatmul.mubr.bf16.gmra.mxu0 %v4841_v59  ;;  %3023 = vmatprep.subr.bf16.mxu1 %v8854_v31  ;;  %v4738_v59 = vcombine.high %v6380_v26, %v6387_v55  ;;  %v1825_v46 = vrot.slane %v5312_v6, 5  ;;  %v5313_v26 = vld [vmem:[%s5539_s9 + $0x120] sm:$0xff] }
  0xdf   : > { %2264 = vmatprep.mubr.bf16.mxu0 %v4844_v38  ;;  %3687 = vmatpush2.bf16.msra.mxu0 %v5278_v17  ;;  %v5307_v38 = vld [vmem:[%s5539_s9 + $0xf0] sm:$0xff]  ;;  %v1815_v60 = vsel %vm6565_vm5, %v1813_v47, %v1814_v28  ;;  %v1818_v17 = vrot.slane %v5309_v52, 5 }
  0xe0   : > { %3688 = vmatprep.subr.bf16.mxu0 %v8854_v31  ;;  %v4785_v20 = vrot.slane %v5307_v38, 9  ;;  %v4739_v47 = vcombine.low %v5307_v38, %v5305_v57 }
  0xe1   : > { %3024 = vmatpush2.bf16.msra.mxu1 %v5281_v7  ;;  %v4740_v7 = vcombine.high %v5307_v38, %v5305_v57  ;;  %v5315_v38 = vld [vmem:[%s5539_s9 + $0x140] sm:$0xff] }
  0xe2   : > { %v1812_v31 = vsel %vm6565_vm5, %v4785_v20, %v1811_v63 }
  0xe3   : > { %3689 = vmatpush2.bf16.msra.mxu0 %v5283_v25  ;;  %v4848_v25 = vcombine.high %v1812_v31, %v1815_v60  ;;  %v4847_v28 = vcombine.low %v1812_v31, %v1815_v60  ;;  %v1832_v31 = vrot.slane %v5315_v38, 5  ;;  %v4741_v60 = vcombine.low %v5310_v11, %v5309_v52  ;;  %v6932_v52 = vld [vmem:[%s5539_s9 + $0x158] sm:$0xff] }
  0xe4   : > { %1620 = vmatmul.mubr.bf16.gmra.mxu1 %v4735_v36  ;;  %v4786_v36 = vrot.slane %v5310_v11, 9 }
  0xe5   : > { %1627 = vmatprep.mubr.bf16.mxu1 %v4738_v59  ;;  %v5311_v59 = vld [vmem:[%s5539_s9 + $0x118] sm:$0xff] }
  0xe6   : > { %2265 = vmatmul.mubr.bf16.gmra.mxu0 %v4843_v27  ;;  %v1820_v27 = vrot.slane %v1818_v17, 4  ;;  %v1819_v63 = vsel %vm6565_vm5, %v4786_v36, %v1818_v17  ;;  %v4744_v36 = vcombine.high %v5313_v26, %v5312_v6 }
  0xe7   : > { %2272 = vmatprep.mubr.bf16.mxu0 %v4846_v30  ;;  %v1821_v30 = vrot.slane %v5311_v59, 5  ;;  %v4787_v59 = vrot.slane %v5313_v26, 9 }
  0xe9   : > { %v1822_v20 = vsel %vm6565_vm5, %v1820_v27, %v1821_v30  ;;  %v1826_v17 = vsel %vm6565_vm5, %v4787_v59, %v1825_v46  ;;  %v5316_v30 = vld [vmem:[%s5539_s9 + $0x138] sm:$0xff] }
  0xea   : > { %v4850_v55 = vcombine.high %v1819_v63, %v1822_v20  ;;  %v4746_v59 = vcombine.high %v5316_v30, %v5315_v38 }
  0xec   : > { %1628 = vmatmul.mubr.bf16.gmra.mxu1 %v4737_v19  ;;  %v1827_v19 = vrot.slane %v1825_v46, 4 }
  0xed   : > { %1635 = vmatprep.mubr.bf16.mxu1 %v4740_v7 }
  0xee   : > { %2273 = vmatmul.mubr.bf16.gmra.mxu0 %v4845_v15  ;;  %v5314_v15 = vld [vmem:[%s5539_s9 + $0x130] sm:$0xff] }
  0xef   : > { %2280 = vmatprep.mubr.bf16.mxu0 %v4848_v25  ;;  %v1828_v7 = vrot.slane %v5314_v15, 5  ;;  %v4849_v25 = vcombine.low %v1819_v63, %v1822_v20  ;;  %v4788_v15 = vrot.slane %v5316_v30, 9  ;;  %v1839_v63 = vrot.slane %v6932_v52, 5 }
  0xf0   : > { %v4743_v20 = vcombine.low %v5313_v26, %v5312_v6  ;;  %v6942_v6 = vld [vmem:[%s5539_s9 + $0x170] sm:$0xff] }
  0xf1   : > { %v1829_v57 = vsel %vm6565_vm5, %v1827_v19, %v1828_v7  ;;  %v5319_v7 = vld [vmem:[%s5539_s9 + $0x150] sm:$0xff] }
  0xf2   : > { %v4852_v27 = vcombine.high %v1826_v17, %v1829_v57  ;;  %v4851_v46 = vcombine.low %v1826_v17, %v1829_v57  ;;  %v1846_v17 = vrot.slane %v6942_v6, 5  ;;  %v8947_v57 = vshll.u32 %v5567_v16, 16 }
  0xf4   : > { %1636 = vmatmul.mubr.bf16.gmra.mxu1 %v4739_v47  ;;  %v1834_v47 = vrot.slane %v1832_v31, 4 }
  0xf5   : > { %1643 = vmatprep.mubr.bf16.mxu1 %v4742_v10 }
  0xf6   : > { %2281 = vmatmul.mubr.bf16.gmra.mxu0 %v4847_v28  ;;  %v5317_v28 = vld [vmem:[%s5539_s9 + $0x148] sm:$0xff] }
  0xf7   : > { %2288 = vmatprep.mubr.bf16.mxu0 %v4850_v55  ;;  %v1835_v10 = vrot.slane %v5317_v28, 5  ;;  %v1833_v55 = vsel %vm6565_vm5, %v4788_v15, %v1832_v31  ;;  %v2559_v15 = vrot.slane %v8947_v57, 6  ;;  %v2563_v57 = vshrl.u32 %v6901_v41, 16 }
  0xf9   : > { %v1836_v11 = vsel %vm6565_vm5, %v1834_v47, %v1835_v10  ;;  %v4745_v47 = vcombine.low %v5316_v30, %v5315_v38  ;;  %v4748_v10 = vcombine.high %v5319_v7, %v6932_v52  ;;  %v8950_v38 = vshrl.u32 %v5567_v16, 16 }
  0xfa   : > { %v4854_v19 = vcombine.high %v1833_v55, %v1836_v11  ;;  %v4853_v28 = vcombine.low %v1833_v55, %v1836_v11  ;;  %v8951_v55 = vshll.u32 %v5580_v22, 16  ;;  %v2565_v9 = vrot.slane %v2563_v57, 5 }
  0xfb   : > { %v2558_v30 = vrot.slane %v8950_v38, 5 }
  0xfc   : > { %1644 = vmatmul.mubr.bf16.gmra.mxu1 %v4741_v60  ;;  %v4789_v60 = vrot.slane %v5319_v7, 9  ;;  %v2566_v11 = vrot.slane %v8951_v55, 6 }
  0xfd   : > { %1651 = vmatprep.mubr.bf16.mxu1 %v4744_v36  ;;  %v5320_v36 = vld [vmem:[%s5539_s9 + $0x160] sm:$0xff]  ;;  %v2560_v33 = vor.u32 %v2559_v15, %v2558_v30 }
  0xfe   : > { %2289 = vmatmul.mubr.bf16.gmra.mxu0 %v4849_v25  ;;  %v1841_v25 = vrot.slane %v1839_v63, 4  ;;  %v1840_v31 = vsel %vm6565_vm5, %v4789_v60, %v1839_v63  ;;  %v5323_v63 = vld [vmem:[%s5539_s9 + $0x178] sm:$0xff]  ;;  %v1848_v60 = vrot.slane %v1846_v17, 4 }
  0xff   : > { %2296 = vmatprep.mubr.bf16.mxu0 %v4852_v27  ;;  %v1842_v27 = vrot.slane %v5320_v36, 5 }
 0x101   : > { %v1843_v26 = vsel %vm6565_vm5, %v1841_v25, %v1842_v27  ;;  %v8948_v25 = vshrl.u32 %v5559_v12, 16  ;;  %v8949_v27 = vshll.u32 %v5559_v12, 16 }
 0x103   : > { %v2554_v36 = vrot.slane %v8948_v25, 5  ;;  %v2555_v13 = vrot.slane %v8949_v27, 6  ;;  %v6967_v25 = vld [vmem:[%s5539_s9 + $0x188] sm:$0xff] }
 0x104   : > { %1652 = vmatmul.mubr.bf16.gmra.mxu1 %v4743_v20  ;;  %v4856_v20 = vcombine.high %v1840_v31, %v1843_v26  ;;  %v1853_v22 = vrot.slane %v6967_v25, 5 }
 0x105   : > { %1659 = vmatprep.mubr.bf16.mxu1 %v4746_v59 }
 0x106   : > { %2297 = vmatmul.mubr.bf16.gmra.mxu0 %v4851_v46  ;;  %v6949_v46 = vld [vmem:[%s5539_s9 + $0x168] sm:$0xff] }
 0x107   : > { %2304 = vmatprep.mubr.bf16.mxu0 %v4854_v19  ;;  %v4790_v59 = vrot.slane %v6949_v46, 9  ;;  %v1849_v19 = vrot.slane %v5323_v63, 5  ;;  %v2556_v63 = vor.u32 %v2555_v13, %v2554_v36  ;;  %v4750_v13 = vcombine.high %v6949_v46, %v6942_v6  ;;  %v5325_v36 = vld [vmem:[%s5539_s9 + $0x180] sm:$0xff] }
 0x109   : > { %v1847_v12 = vsel %vm6565_vm5, %v4790_v59, %v1846_v17  ;;  %v1850_v16 = vsel %vm6565_vm5, %v1848_v60, %v1849_v19  ;;  %v2557_v41 = vrot.slane %v2556_v63, 4  ;;  %v4791_v17 = vrot.slane %v5325_v36, 9 }
 0x10a   : > { %v4858_v15 = vcombine.high %v1847_v12, %v1850_v16  ;;  %v1855_v60 = vrot.slane %v1853_v22, 4 }
 0x10b   : > { %v6976_v59 = vsel %vm6755_vm8, %v2557_v41, %v2560_v33  ;;  %v1854_v30 = vsel %vm6565_vm5, %v4791_v17, %v1853_v22 }
 0x10c   : > { %1660 = vmatmul.mubr.bf16.gmra.mxu1 %v4745_v47  ;;  %v2562_v47 = vrot.slane %v2560_v33, 4  ;;  %8952 = vst [vmem:[#allocation50_spill] sm:$0xff] %v6976_v59 }
 0x10d   : > { %1667 = vmatprep.mubr.bf16.mxu1 %v4748_v10  ;;  %v4747_v10 = vcombine.low %v5319_v7, %v6932_v52 }
 0x10e   : > { %2305 = vmatmul.mubr.bf16.gmra.mxu0 %v4853_v28  ;;  %v2567_v28 = vor.u32 %v2566_v11, %v2565_v9  ;;  %v5326_v9 = vld [vmem:[%s5539_s9 + $0x190] sm:$0xff]  ;;  %v6996_v11 = vld [vmem:[%s5539_s9 + $0x1a0] sm:$0xff] }
 0x10f   : > { %2312 = vmatprep.mubr.bf16.mxu0 %v4856_v20  ;;  %v4855_v20 = vcombine.low %v1840_v31, %v1843_v26  ;;  %v1856_v27 = vrot.slane %v5326_v9, 5  ;;  %v1860_v57 = vrot.slane %v6996_v11, 5  ;;  %v5329_v9 = vld [vmem:[%s5539_s9 + $0x1a8] sm:$0xff] }
 0x110   : > { %v6980_v19 = vsel %vm6755_vm8, %v2562_v47, %v2567_v28  ;;  %v4749_v47 = vcombine.low %v6949_v46, %v6942_v6  ;;  %v4857_v28 = vcombine.low %v1847_v12, %v1850_v16 }
 0x111   : > { %8953 = vst [vmem:[#allocation51_spill] sm:$0xff] %v6980_v19  ;;  %v1857_v55 = vsel %vm6565_vm5, %v1855_v60, %v1856_v27  ;;  %v1862_v60 = vrot.slane %v1860_v57, 4  ;;  %v1863_v27 = vrot.slane %v5329_v9, 5 }
 0x113   : > { %v1864_v16 = vsel %vm6565_vm5, %v1862_v60, %v1863_v27  ;;  %v5332_v27 = vld [vmem:[%s5539_s9 + $0x1c0] sm:$0xff] }
 0x114   : > { %v6987_v31 = vpop.f32.mrf.mxu0  ;;  %v6989_v26 = vpop.f32.mrf.mxu1  ;;  %1668 = vmatmul.mubr.bf16.gmra.mxu1 %v4747_v10  ;;  %v4752_v10 = vcombine.high %v5325_v36, %v6967_v25  ;;  %v1870_v7 = vrot.slane %v5332_v27, 5 }
 0x115   : > { %8954 = vst [vmem:[#allocation52_spill] sm:$0xff] %v6989_v26  ;;  %1675 = vmatprep.mubr.bf16.mxu1 %v4750_v13 }
 0x116   : > { %2313 = vmatmul.mubr.bf16.gmra.mxu0 %v4855_v20  ;;  %v1070_v33 = vpop.f32.mrf.mxu0  ;;  %v1150_v38 = vpop.f32.mrf.mxu1  ;;  %v4860_v20 = vcombine.high %v1854_v30, %v1857_v55 }
 0x117   : > { %2320 = vmatprep.mubr.bf16.mxu0 %v4858_v15  ;;  %v5328_v15 = vld [vmem:[%s5539_s9 + $0x198] sm:$0xff] }
 0x118   : > { %v6999_v63 = vpop.f32.mrf.mxu0  ;;  %v7001_v41 = vpop.f32.mrf.mxu1  ;;  %v4792_v17 = vrot.slane %v5328_v15, 9 }
 0x119   : > { %8955 = vst [vmem:[#allocation53_spill] sm:$0xff] %v7001_v41 }
 0x11a   : > { %v1073_v13 = vpop.f32.mrf.mxu0  ;;  %v1153_v22 = vpop.f32.mrf.mxu1  ;;  %v1861_v12 = vsel %vm6565_vm5, %v4792_v17, %v1860_v57  ;;  %v7027_v57 = vld [vmem:[%s5539_s9 + $0x1b0] sm:$0xff] }
 0x11b   : > { %v7017_v13 = vld [vmem:[%s5539_s9 + $0x1b8] sm:$0xff]  ;;  %v4793_v17 = vrot.slane %v7027_v57, 9 }
 0x11c   : > { %v7008_v33 = vpop.f32.mrf.mxu0  ;;  %v7010_v38 = vpop.f32.mrf.mxu1  ;;  %1676 = vmatmul.mubr.bf16.gmra.mxu1 %v4749_v47  ;;  %v1867_v22 = vrot.slane %v7017_v13, 5 }
 0x11d   : > { %8956 = vst [vmem:[#allocation54_spill] sm:$0xff] %v7010_v38  ;;  %1683 = vmatprep.mubr.bf16.mxu1 %v4752_v10  ;;  %v4859_v10 = vcombine.low %v1854_v30, %v1857_v55  ;;  %v7040_v55 = vld [vmem:[%s5539_s9 + $0x1d0] sm:$0xff] }
 0x11e   : > { %2321 = vmatmul.mubr.bf16.gmra.mxu0 %v4857_v28  ;;  %v1078_v6 = vpop.f32.mrf.mxu0  ;;  %v1158_v46 = vpop.f32.mrf.mxu1  ;;  %v4751_v28 = vcombine.low %v5325_v36, %v6967_v25  ;;  %v1869_v60 = vrot.slane %v1867_v22, 4 }
 0x11f   : > { %2328 = vmatprep.mubr.bf16.mxu0 %v4860_v20  ;;  %v4754_v20 = vcombine.high %v5328_v15, %v6996_v11  ;;  %v4862_v6 = vcombine.high %v1861_v12, %v1864_v16 }
 0x120   : > { %v7020_v9 = vpop.f32.mrf.mxu0  ;;  %v7022_v47 = vpop.f32.mrf.mxu1  ;;  %v1871_v30 = vsel %vm6565_vm5, %v1869_v60, %v1870_v7 }
 0x121   : > { %8957 = vst [vmem:[#allocation55_spill] sm:$0xff] %v7022_v47 }
 0x122   : > { %v1081_v46 = vpop.f32.mrf.mxu0  ;;  %v1161_v52 = vpop.f32.mrf.mxu1 }
 0x123   : > { %v1868_v52 = vsel %vm6565_vm5, %v4793_v17, %v1867_v22  ;;  %v1874_v46 = vrot.slane %v7040_v55, 5  ;;  %v7051_v17 = vld [vmem:[%s5539_s9 + $0x1c8] sm:$0xff] }
 0x124   : > { %v7031_v38 = vpop.f32.mrf.mxu0  ;;  %v7033_v41 = vpop.f32.mrf.mxu1  ;;  %1684 = vmatmul.mubr.bf16.gmra.mxu1 %v4751_v28  ;;  %v4794_v7 = vrot.slane %v7051_v17, 9 }
 0x125   : > { %8958 = vst [vmem:[#allocation56_spill] sm:$0xff] %v7033_v41  ;;  %1691 = vmatprep.mubr.bf16.mxu1 %v4754_v20  ;;  %v4861_v20 = vcombine.low %v1861_v12, %v1864_v16  ;;  %v1876_v60 = vrot.slane %v1874_v46, 4  ;;  %v5335_v41 = vld [vmem:[%s5539_s9 + $0x1d8] sm:$0xff]  ;;  %v4863_v12 = vcombine.low %v1868_v52, %v1871_v30 }
 0x126   : > { %2329 = vmatmul.mubr.bf16.gmra.mxu0 %v4859_v10  ;;  %v1086_v25 = vpop.f32.mrf.mxu0  ;;  %v1166_v36 = vpop.f32.mrf.mxu1  ;;  %v4753_v10 = vcombine.low %v5328_v15, %v6996_v11  ;;  %v1877_v47 = vrot.slane %v5335_v41, 5  ;;  %v1875_v16 = vsel %vm6565_vm5, %v4794_v7, %v1874_v46  ;;  %v4755_v41 = vcombine.low %v7027_v57, %v7017_v13 }
 0x127   : > { %2336 = vmatprep.mubr.bf16.mxu0 %v4862_v6  ;;  %v4756_v6 = vcombine.high %v7027_v57, %v7017_v13  ;;  %v4864_v25 = vcombine.high %v1868_v52, %v1871_v30  ;;  %v2428_v13 = vshrl.u32 %v6586_v61, 16  ;;  %v4758_v57 = vcombine.high %v7051_v17, %v7040_v55 }
 0x128   : > { %v7043_v27 = vpop.f32.mrf.mxu0  ;;  %v7045_v28 = vpop.f32.mrf.mxu1 }
 0x129   : > { %8959 = vst [vmem:[#allocation57_spill] sm:$0xff] %v7045_v28 }
 0x12a   : > { %v1089_v36 = vpop.f32.mrf.mxu0  ;;  %v1169_v22 = vpop.f32.mrf.mxu1 }
 0x12b   : > { %v1878_v36 = vsel %vm6565_vm5, %v1876_v60, %v1877_v47  ;;  %v3231_v22 = vrot.slane %v6551_v0, 6  ;;  %v2423_v47 = vrot.slane %v8964_v49, 5  ;;  %v8965_v0 = vshll.u32 %v5637_v50, 16 }
 0x12c   : > { %v7055_v26 = vpop.f32.mrf.mxu0  ;;  %v7057_v19 = vpop.f32.mrf.mxu1  ;;  %1692 = vmatmul.mubr.bf16.gmra.mxu1 %v4753_v10  ;;  %v8961_v10 = vshrl.u32 %v5630_v48, 16  ;;  %v4866_v46 = vcombine.high %v1875_v16, %v1878_v36  ;;  %v4971_v60 = vrot.slane %v6558_v43, 10  ;;  %v3238_v49 = vrot.slane %v6576_v39, 6 }
 0x12d   : > { %8960 = vst [vmem:[#allocation58_spill] sm:$0xff] %v7057_v19  ;;  %1699 = vmatprep.mubr.bf16.mxu1 %v4756_v6  ;;  %v8962_v6 = vshll.u32 %v5630_v48, 16  ;;  %v2424_v30 = vrot.slane %v8965_v0, 6  ;;  %v8969_v43 = vshll.u32 %v5662_v62, 16  ;;  %v4865_v59 = vcombine.low %v1875_v16, %v1878_v36 }
 0x12e   : > { %2337 = vmatmul.mubr.bf16.gmra.mxu0 %v4861_v20  ;;  %v1094_v11 = vpop.f32.mrf.mxu0  ;;  %v1174_v15 = vpop.f32.mrf.mxu1  ;;  %v2419_v20 = vrot.slane %v8961_v10, 5  ;;  %v3234_v10 = vrot.slane %v6562_v53, 6  ;;  %v3232_v39 = vsel %vm7084_vm11, %v4971_v60, %v3231_v22  ;;  %v3241_v62 = vrot.slane %v6586_v61, 6 }
 0x12f   : > { %2344 = vmatprep.mubr.bf16.mxu0 %v4864_v25  ;;  %v2420_v25 = vrot.slane %v8962_v6, 6  ;;  %v3233_v15 = vrot.slane %v3231_v22, 4  ;;  %v2431_v19 = vrot.slane %v8969_v43, 6  ;;  %v8972_v36 = vshll.u32 %v5674_v4, 16 }
 0x130   : > { %v7070_v11 = vpop.f32.mrf.mxu0  ;;  %v7072_v52 = vpop.f32.mrf.mxu1  ;;  %v2443_v61 = vshrl.u32 %v6612_v56, 16 }
 0x131   : > { %8963 = vst [vmem:[#allocation59_spill] sm:$0xff] %v7072_v52  ;;  %v2421_v50 = vor.u32 %v2420_v25, %v2419_v20  ;;  %v4757_v20 = vcombine.low %v7051_v17, %v7040_v55  ;;  %v4972_v25 = vrot.slane %v6582_v29, 10  ;;  %v8971_v55 = vshrl.u32 %v5674_v4, 16 }
 0x132   : > { %v1097_v7 = vpop.f32.mrf.mxu0  ;;  %v1177_v48 = vpop.f32.mrf.mxu1  ;;  %v2435_v22 = vrot.slane %v8972_v36, 6  ;;  %v8974_v29 = vshll.u32 %v5689_v23, 16 }
 0x133   : > { %v2425_v7 = vor.u32 %v2424_v30, %v2423_v47  ;;  %v2430_v48 = vrot.slane %v2428_v13, 5  ;;  %v3240_v47 = vrot.slane %v3238_v49, 4  ;;  %v2434_v17 = vrot.slane %v8971_v55, 5 }
 0x134   : > { %v7091_v52 = vpop.f32.mrf.mxu1  ;;  %1700 = vmatmul.mubr.bf16.gmra.mxu1 %v4755_v41  ;;  %v3235_v41 = vsel %vm7084_vm11, %v3233_v15, %v3234_v10  ;;  %v2439_v15 = vrot.slane %v8974_v29, 6  ;;  %v2445_v55 = vrot.slane %v2443_v61, 5  ;;  %v3248_v29 = vrot.slane %v6612_v56, 6 }
 0x135   : > { %v7089_v0 = vpop.f32.mrf.mxu0  ;;  %8968 = vst [vmem:[#allocation60_spill] sm:$0xff] %v7091_v52  ;;  %1707 = vmatprep.mubr.bf16.mxu1 %v4758_v57  ;;  %v2432_v16 = vor.u32 %v2431_v19, %v2430_v48  ;;  %v5024_v57 = vcombine.high %v3232_v39, %v3235_v41  ;;  %v7122_v48 = vsel %vm7084_vm11, %v4972_v25, %v3238_v49 }
 0x136   : > { %2345 = vmatmul.mubr.bf16.gmra.mxu0 %v4863_v12  ;;  %v1182_v28 = vpop.f32.mrf.mxu1  ;;  %v2422_v12 = vrot.slane %v2421_v50, 4  ;;  %v8976_v49 = vcombine.high %v6765_v42, %v6776_v58 }
 0x137   : > { %2352 = vmatprep.mubr.bf16.mxu0 %v4866_v46  ;;  %v1102_v53 = vpop.f32.mrf.mxu0  ;;  %v2427_v28 = vrot.slane %v2425_v7, 4  ;;  %v8973_v46 = vshrl.u32 %v5689_v23, 16 }
 0x138   : > { %v7105_v13 = vpop.f32.mrf.mxu1  ;;  %v7118_v19 = vsel %vm6755_vm8, %v2422_v12, %v2425_v7  ;;  %v7134_v53 = vsel %vm7084_vm11, %v3240_v47, %v3241_v62  ;;  %v2436_v7 = vor.u32 %v2435_v22, %v2434_v17  ;;  %v3245_v12 = vrot.slane %v6590_v1, 6 }
 0x139   : > { %v7103_v30 = vpop.f32.mrf.mxu0  ;;  %8970 = vst [vmem:[#allocation61_spill] sm:$0xff] %v7105_v13  ;;  %v2438_v60 = vrot.slane %v8973_v46, 5  ;;  %v7130_v23 = vsel %vm6755_vm8, %v2427_v28, %v2432_v16  ;;  %v5023_v16 = vcombine.low %v3232_v39, %v3235_v41  ;;  %v5026_v62 = vcombine.high %v7122_v48, %v7134_v53 }
 0x13a   : > { %v1185_v50 = vpop.f32.mrf.mxu1  ;;  %v4918_v47 = vcombine.high %v7118_v19, %v7130_v23  ;;  %v2437_v22 = vrot.slane %v2436_v7, 4 }
 0x13b   : > { %v1105_v10 = vpop.f32.mrf.mxu0  ;;  %v2440_v25 = vor.u32 %v2439_v15, %v2438_v60  ;;  %v3247_v60 = vrot.slane %v3245_v12, 4 }
 0x13c   : > { %v7126_v43 = vpop.f32.mrf.mxu1  ;;  %1708 = vmatmul.mubr.bf16.gmra.mxu1 %v4757_v20  ;;  %v8977_v20 = vld [vmem:[#allocation10_spill] sm:$0xff]  ;;  %v8980_v10 = vld [vmem:[#allocation11_spill] sm:$0xff]  ;;  %v9125_v6 = vld [vmem:[#allocation60_spill] sm:$0xff] }
 0x13d   : > { %8975 = vst [vmem:[#allocation62_spill] sm:$0xff] %v7126_v43  ;;  %3025 = vmatprep.mubr.bf16.mxu1 %v8976_v49  ;;  %v2442_v15 = vrot.slane %v2440_v25, 4  ;;  %v8981_v39 = vshrl.u32 %v8980_v10, 16  ;;  %v8982_v50 = vshll.u32 %v8980_v10, 16 }
 0x13e   : > { %v7124_v4 = vpop.f32.mrf.mxu0  ;;  %2353 = vmatmul.mubr.bf16.gmra.mxu0 %v4865_v59  ;;  %v8978_v59 = vshll.u32 %v8977_v20, 16  ;;  %v1190_v28 = vpop.f32.mrf.mxu1 }
 0x13f   : > { %3690 = vmatprep.mubr.bf16.mxu0 %v5024_v57  ;;  %v4973_v57 = vrot.slane %v6608_v35, 10  ;;  %v2449_v41 = vrot.slane %v8981_v39, 5  ;;  %v2450_v49 = vrot.slane %v8982_v50, 6  ;;  %v2458_v35 = vshrl.u32 %v6645_v54, 16 }
 0x140   : > { %v2446_v36 = vrot.slane %v8978_v59, 6  ;;  %v1110_v46 = vpop.f32.mrf.mxu0  ;;  %v7148_v17 = vpop.f32.mrf.mxu1  ;;  %v7178_v39 = vsel %vm7084_vm11, %v3247_v60, %v3248_v29  ;;  %v8993_v29 = vld [vmem:[#allocation18_spill] sm:$0xff] }
 0x141   : > { %8979 = vst [vmem:[#allocation10_spill] sm:$0xff] %v7148_v17  ;;  %v8983_v46 = vld [vmem:[#allocation12_spill] sm:$0xff]  ;;  %v7174_v10 = vsel %vm7084_vm11, %v4973_v57, %v3245_v12  ;;  %v2460_v57 = vrot.slane %v2458_v35, 5 }
 0x142   : > { %v7146_v1 = vpop.f32.mrf.mxu0  ;;  %v2447_v61 = vor.u32 %v2446_v36, %v2445_v55  ;;  %v1193_v59 = vpop.f32.mrf.mxu1  ;;  %v8984_v28 = vshrl.u32 %v8983_v46, 16  ;;  %v8985_v7 = vshll.u32 %v8983_v46, 16  ;;  %v8987_v55 = vcombine.low %v6765_v42, %v6776_v58  ;;  %v8988_v58 = vld [vmem:[#allocation16_spill] sm:$0xff]  ;;  %v8990_v46 = vld [vmem:[#allocation17_spill] sm:$0xff] }
 0x143   : > { %v7170_v36 = vsel %vm6755_vm8, %v2437_v22, %v2440_v25  ;;  %v2451_v42 = vor.u32 %v2450_v49, %v2449_v41  ;;  %v3252_v25 = vrot.slane %v6626_v5, 6  ;;  %v2473_v49 = vshrl.u32 %v6676_v34, 16 }
 0x144   : > { %v1113_v20 = vpop.f32.mrf.mxu0  ;;  %v2453_v43 = vrot.slane %v8984_v28, 5  ;;  %v2454_v17 = vrot.slane %v8985_v7, 6  ;;  %v7163_v56 = vpop.f32.mrf.mxu1  ;;  %3026 = vmatmul.mubr.bf16.vlgmr.msra.gmra.mxu1 %v8987_v55  ;;  %v7182_v50 = vsel %vm6755_vm8, %v2442_v15, %v2447_v61  ;;  %v8991_v28 = vshrl.u32 %v8990_v46, 16 }
 0x145   : > { %8986 = vst [vmem:[#allocation11_spill] sm:$0xff] %v7163_v56  ;;  %3033 = vmatprep.mubr.bf16.mxu1 %v4918_v47  ;;  %v8992_v47 = vshll.u32 %v8990_v46, 16  ;;  %v8994_v7 = vshrl.u32 %v8993_v29, 16  ;;  %v8995_v61 = vshll.u32 %v8993_v29, 16  ;;  %v4920_v35 = vcombine.high %v7170_v36, %v7182_v50 }
 0x146   : > { %v7161_v13 = vpop.f32.mrf.mxu0  ;;  %3691 = vmatmul.mubr.bf16.vlgmr.msra.gmra.mxu0 %v5023_v16  ;;  %v8989_v16 = vshll.u32 %v8988_v58, 16  ;;  %v1198_v59 = vpop.f32.mrf.mxu1  ;;  %v2455_v12 = vor.u32 %v2454_v17, %v2453_v43  ;;  %v2464_v60 = vrot.slane %v8991_v28, 5  ;;  %v4917_v43 = vcombine.low %v7118_v19, %v7130_v23 }
 0x147   : > { %3698 = vmatprep.mubr.bf16.mxu0 %v5026_v62  ;;  %v2465_v62 = vrot.slane %v8992_v47, 6  ;;  %v2468_v15 = vrot.slane %v8994_v7, 5  ;;  %v2469_v41 = vrot.slane %v8995_v61, 6  ;;  %v5025_v17 = vcombine.low %v7122_v48, %v7134_v53  ;;  %v8997_v61 = vld [vmem:[#allocation22_spill] sm:$0xff] }
 0x148   : > { %v2461_v20 = vrot.slane %v8989_v16, 6  ;;  %v1118_v22 = vpop.f32.mrf.mxu0  ;;  %v7198_v5 = vpop.f32.mrf.mxu1  ;;  %v5028_v58 = vcombine.high %v7174_v10, %v7178_v39  ;;  %v2452_v16 = vrot.slane %v2451_v42, 4  ;;  %v3254_v59 = vrot.slane %v3252_v25, 4 }
 0x149   : > { %8996 = vst [vmem:[#allocation12_spill] sm:$0xff] %v7198_v5  ;;  %v4974_v22 = vrot.slane %v6641_v3, 10  ;;  %v3255_v46 = vrot.slane %v6645_v54, 6  ;;  %v2457_v29 = vrot.slane %v2455_v12, 4  ;;  %v2466_v19 = vor.u32 %v2465_v62, %v2464_v60 }
 0x14a   : > { %v7196_v55 = vpop.f32.mrf.mxu0  ;;  %v1201_v47 = vpop.f32.mrf.mxu1  ;;  %v2462_v7 = vor.u32 %v2461_v20, %v2460_v57  ;;  %v3259_v23 = vrot.slane %v6656_v14, 6  ;;  %v2470_v48 = vor.u32 %v2469_v41, %v2468_v15  ;;  %v2475_v53 = vrot.slane %v2473_v49, 5  ;;  %v9000_v41 = vld [vmem:[#allocation24_spill] sm:$0xff] }
 0x14b   : > { %v8998_v5 = vshll.u32 %v8997_v61, 16  ;;  %v4919_v3 = vcombine.low %v7170_v36, %v7182_v50  ;;  %v5027_v54 = vcombine.low %v7174_v10, %v7178_v39  ;;  %v7223_v14 = vsel %vm6755_vm8, %v2452_v16, %v2455_v12  ;;  %v9004_v16 = vld [vmem:[#allocation25_spill] sm:$0xff] }
 0x14c   : > { %v1121_v28 = vpop.f32.mrf.mxu0  ;;  %v7215_v42 = vpop.f32.mrf.mxu1  ;;  %3034 = vmatmul.mubr.bf16.gmra.mxu1 %v4917_v43  ;;  %v7227_v20 = vsel %vm7084_vm11, %v4974_v22, %v3252_v25  ;;  %v7231_v57 = vsel %vm7084_vm11, %v3254_v59, %v3255_v46  ;;  %v7235_v10 = vsel %vm6755_vm8, %v2457_v29, %v2462_v7  ;;  %v2467_v39 = vrot.slane %v2466_v19, 4 }
 0x14d   : > { %v2476_v56 = vrot.slane %v8998_v5, 6  ;;  %8999 = vst [vmem:[#allocation16_spill] sm:$0xff] %v7215_v42  ;;  %3041 = vmatprep.mubr.bf16.mxu1 %v4920_v35  ;;  %v4975_v50 = vrot.slane %v6672_v18, 10  ;;  %v3261_v12 = vrot.slane %v3259_v23, 4  ;;  %v2472_v62 = vrot.slane %v2470_v48, 4  ;;  %v5336_v28 = vld [vmem:[%s5539_s9 + $0x88] sm:$0xff] }
 0x14e   : > { %v7213_v52 = vpop.f32.mrf.mxu0  ;;  %3699 = vmatmul.mubr.bf16.gmra.mxu0 %v5025_v17  ;;  %v1206_v36 = vpop.f32.mrf.mxu1  ;;  %v3262_v25 = vrot.slane %v6676_v34, 6  ;;  %v9001_v49 = vshrl.u32 %v9000_v41, 16  ;;  %v9003_v35 = vshll.u32 %v9000_v41, 16  ;;  %v9005_v22 = vshrl.u32 %v9004_v16, 16 }
 0x14f   : > { %3706 = vmatprep.mubr.bf16.mxu0 %v5028_v58  ;;  %v2477_v15 = vor.u32 %v2476_v56, %v2475_v53  ;;  %v9006_v18 = vshll.u32 %v9004_v16, 16  ;;  %v2488_v56 = vshrl.u32 %v5336_v28, 16  ;;  %v4922_v34 = vcombine.high %v7223_v14, %v7235_v10 }
 0x150   : > { %v1126_v60 = vpop.f32.mrf.mxu0  ;;  %v2479_v5 = vrot.slane %v9001_v49, 5  ;;  %v7243_v17 = vpop.f32.mrf.mxu1  ;;  %v2480_v58 = vrot.slane %v9003_v35, 6  ;;  %v2483_v59 = vrot.slane %v9005_v22, 5  ;;  %v5030_v47 = vcombine.high %v7227_v20, %v7231_v57  ;;  %v9012_v22 = vld [vmem:[#allocation29_spill] sm:$0xff] }
 0x151   : > { %9002 = vst [vmem:[#allocation17_spill] sm:$0xff] %v7243_v17  ;;  %v2484_v46 = vrot.slane %v9006_v18, 6  ;;  %v7258_v19 = vsel %vm7084_vm11, %v4975_v50, %v3259_v23  ;;  %v7262_v53 = vsel %vm6755_vm8, %v2467_v39, %v2470_v48  ;;  %v7266_v61 = vsel %vm6755_vm8, %v2472_v62, %v2477_v15  ;;  %v5337_v50 = vld [vmem:[%s5539_s9 + $0x80] sm:$0xff]  ;;  %v9009_v15 = vld [vmem:[#allocation28_spill] sm:$0xff] }
 0x152   : > { %v7241_v43 = vpop.f32.mrf.mxu0  ;;  %v1209_v7 = vpop.f32.mrf.mxu1  ;;  %v7270_v60 = vsel %vm7084_vm11, %v3261_v12, %v3262_v25  ;;  %v9007_v36 = vshll.u32 %v6031_v24, 16  ;;  %v2481_v23 = vor.u32 %v2480_v58, %v2479_v5  ;;  %v2490_v39 = vrot.slane %v2488_v56, 5 }
 0x153   : > { %v2485_v48 = vor.u32 %v2484_v46, %v2483_v59  ;;  %v3266_v62 = vrot.slane %v5337_v50, 6  ;;  %v9010_v12 = vshrl.u32 %v9009_v15, 16  ;;  %v9011_v24 = vshll.u32 %v9009_v15, 16  ;;  %v5338_v59 = vld [vmem:[%s5539_s9 + $0xa0] sm:$0xff] }
 0x154   : > { %v1129_v29 = vpop.f32.mrf.mxu0  ;;  %v2491_v41 = vrot.slane %v9007_v36, 6  ;;  %v7276_v35 = vpop.f32.mrf.mxu1  ;;  %3042 = vmatmul.mubr.bf16.gmra.mxu1 %v4919_v3  ;;  %v9013_v18 = vshrl.u32 %v9012_v22, 16  ;;  %v9014_v3 = vshll.u32 %v9012_v22, 16  ;;  %v2503_v46 = vshrl.u32 %v5338_v59, 16  ;;  %v5339_v22 = vld [vmem:[%s5539_s9 + $0x78] sm:$0xff] }
 0x155   : > { %9008 = vst [vmem:[#allocation18_spill] sm:$0xff] %v7276_v35  ;;  %3049 = vmatprep.mubr.bf16.mxu1 %v4922_v34  ;;  %v2494_v25 = vrot.slane %v9010_v12, 5  ;;  %v2495_v16 = vrot.slane %v9011_v24, 6  ;;  %v4921_v56 = vcombine.low %v7223_v14, %v7235_v10  ;;  %v5029_v34 = vcombine.low %v7227_v20, %v7231_v57 }
 0x156   : > { %v7274_v49 = vpop.f32.mrf.mxu0  ;;  %3707 = vmatmul.mubr.bf16.gmra.mxu0 %v5027_v54  ;;  %v2498_v29 = vrot.slane %v9013_v18, 5  ;;  %v2499_v54 = vrot.slane %v9014_v3, 6  ;;  %v1214_v58 = vpop.f32.mrf.mxu1  ;;  %v5032_v7 = vcombine.high %v7258_v19, %v7270_v60  ;;  %v2482_v15 = vrot.slane %v2481_v23, 4 }
 0x157   : > { %3714 = vmatprep.mubr.bf16.mxu0 %v5030_v47  ;;  %v4924_v47 = vcombine.high %v7262_v53, %v7266_v61  ;;  %v2487_v12 = vrot.slane %v2485_v48, 4  ;;  %v2492_v24 = vor.u32 %v2491_v41, %v2490_v39  ;;  %v4976_v18 = vrot.slane %v5339_v22, 10 }
 0x158   : > { %v1134_v5 = vpop.f32.mrf.mxu0  ;;  %v7298_v50 = vpop.f32.mrf.mxu1  ;;  %v3268_v3 = vrot.slane %v3266_v62, 4  ;;  %v3269_v14 = vrot.slane %v5336_v28, 6  ;;  %v2496_v10 = vor.u32 %v2495_v16, %v2494_v25  ;;  %v2505_v58 = vrot.slane %v2503_v46, 5 }
 0x159   : > { %9016 = vst [vmem:[#allocation24_spill] sm:$0xff] %v7298_v50  ;;  %v2500_v5 = vor.u32 %v2499_v54, %v2498_v29  ;;  %v9017_v35 = vshll.u32 %v6122_v2, 16  ;;  %v3273_v42 = vrot.slane %v6742_v8, 6  ;;  %v7310_v41 = vsel %vm6755_vm8, %v2482_v15, %v2485_v48 }
 0x15a   : > { %v7296_v36 = vpop.f32.mrf.mxu0  ;;  %v1217_v57 = vpop.f32.mrf.mxu1  ;;  %v7314_v28 = vsel %vm6755_vm8, %v2487_v12, %v2492_v24  ;;  %v7318_v2 = vsel %vm7084_vm11, %v4976_v18, %v3266_v62  ;;  %v7322_v8 = vsel %vm7084_vm11, %v3268_v3, %v3269_v14  ;;  %v4977_v48 = vrot.slane %v6771_v37, 10  ;;  %v5340_v24 = vld [vmem:[%s5539_s9 + $0xb8] sm:$0xff] }
 0x15b   : > { %9015 = vst [vmem:[#allocation22_spill] sm:$0xff] %v7296_v36  ;;  %v2506_v17 = vrot.slane %v9017_v35, 6  ;;  %v2497_v35 = vrot.slane %v2496_v10, 4  ;;  %v2502_v23 = vrot.slane %v2500_v5, 4  ;;  %v3275_v29 = vrot.slane %v3273_v42, 4 }
 0x15c   : > { %v1137_v20 = vpop.f32.mrf.mxu0  ;;  %v7306_v50 = vpop.f32.mrf.mxu1  ;;  %3050 = vmatmul.mubr.bf16.gmra.mxu1 %v4921_v56  ;;  %v3276_v54 = vrot.slane %v5338_v59, 6  ;;  %v9018_v46 = vshrl.u32 %v6170_v32, 16  ;;  %v9019_v56 = vshll.u32 %v6170_v32, 16  ;;  %v9021_v15 = vshll.u32 %v6181_v45, 16 }
 0x15d   : > { %3057 = vmatprep.mubr.bf16.mxu1 %v4924_v47  ;;  %v2507_v16 = vor.u32 %v2506_v17, %v2505_v58  ;;  %v9020_v47 = vshrl.u32 %v6181_v45, 16  ;;  %v2518_v22 = vshrl.u32 %v5340_v24, 16  ;;  %v4923_v17 = vcombine.low %v7262_v53, %v7266_v61 }
 0x15e   : > { %v7304_v36 = vpop.f32.mrf.mxu0  ;;  %3715 = vmatmul.mubr.bf16.gmra.mxu0 %v5029_v34  ;;  %v1222_v25 = vpop.f32.mrf.mxu1  ;;  %v2509_v62 = vrot.slane %v9018_v46, 5  ;;  %v2510_v34 = vrot.slane %v9019_v56, 6  ;;  %v2514_v12 = vrot.slane %v9021_v15, 6  ;;  %v5031_v59 = vcombine.low %v7258_v19, %v7270_v60 }
 0x15f   : > { %3722 = vmatprep.mubr.bf16.mxu0 %v5032_v7  ;;  %v2513_v7 = vrot.slane %v9020_v47, 5  ;;  %v4926_v32 = vcombine.high %v7310_v41, %v7314_v28  ;;  %v5034_v3 = vcombine.high %v7318_v2, %v7322_v8  ;;  %v7348_v10 = vsel %vm6755_vm8, %v2497_v35, %v2500_v5 }
 0x160   : > { %v1142_v39 = vpop.f32.mrf.mxu0  ;;  %v7336_v18 = vpop.f32.mrf.mxu1  ;;  %v7352_v20 = vsel %vm6755_vm8, %v2502_v23, %v2507_v16  ;;  %v7356_v53 = vsel %vm7084_vm11, %v4977_v48, %v3273_v42  ;;  %v7360_v19 = vsel %vm7084_vm11, %v3275_v29, %v3276_v54  ;;  %v2511_v61 = vor.u32 %v2510_v34, %v2509_v62 }
 0x161   : > { %v2515_v60 = vor.u32 %v2514_v12, %v2513_v7  ;;  %v2520_v57 = vrot.slane %v2518_v22, 5  ;;  %v9022_v58 = vshll.u32 %v6237_v51, 16  ;;  %v3280_v23 = vrot.slane %v6863_v44, 6  ;;  %v9023_v7 = vld [vmem:[#allocation36_spill] sm:$0xff] }
 0x162   : > { %v7334_v37 = vpop.f32.mrf.mxu0  ;;  %v1225_v14 = vpop.f32.mrf.mxu1  ;;  %v4925_v16 = vcombine.low %v7310_v41, %v7314_v28  ;;  %v5033_v29 = vcombine.low %v7318_v2, %v7322_v8  ;;  %v4928_v51 = vcombine.high %v7348_v10, %v7352_v20  ;;  %v5036_v54 = vcombine.high %v7356_v53, %v7360_v19 }
 0x163   : > { %v2521_v39 = vrot.slane %v9022_v58, 6  ;;  %v2512_v44 = vrot.slane %v2511_v61, 4  ;;  %v4978_v47 = vrot.slane %v6835_v40, 10  ;;  %v3282_v41 = vrot.slane %v3280_v23, 4 }
 0x164   : > { %v1145_v45 = vpop.f32.mrf.mxu0  ;;  %v1557_v5 = vpop.f32.mrf.mxu1  ;;  %3058 = vmatmul.mubr.bf16.gmra.mxu1 %v4923_v17  ;;  %v3283_v28 = vrot.slane %v5340_v24, 6  ;;  %v9024_v2 = vshrl.u32 %v9023_v7, 16  ;;  %v9025_v12 = vshll.u32 %v9023_v7, 16  ;;  %v9026_v17 = vld [vmem:[#allocation37_spill] sm:$0xff] }
 0x165   : > { %v1558_v25 = vadd.f32 %v1557_v5, %v6987_v31  ;;  %3065 = vmatprep.mubr.bf16.mxu1 %v4926_v32  ;;  %v2517_v31 = vrot.slane %v2515_v60, 4  ;;  %v2522_v62 = vor.u32 %v2521_v39, %v2520_v57  ;;  %v7387_v57 = vld [vmem:[%s5539_s9 + $0xd0] sm:$0xff] }
 0x166   : > { %v2202_v35 = vpop.f32.mrf.mxu0  ;;  %3723 = vmatmul.mubr.bf16.gmra.mxu0 %v5031_v59  ;;  %v1559_v42 = vpop.f32.mrf.mxu1  ;;  %v2524_v8 = vrot.slane %v9024_v2, 5  ;;  %v2525_v22 = vrot.slane %v9025_v12, 6  ;;  %v9027_v59 = vshrl.u32 %v9026_v17, 16  ;;  %v2533_v40 = vshrl.u32 %v7387_v57, 16 }
 0x167   : > { %3730 = vmatprep.mubr.bf16.mxu0 %v5034_v3  ;;  %v7374_v46 = vadd.f32 %v2202_v35, %v1558_v25  ;;  %v9028_v3 = vshll.u32 %v9026_v17, 16  ;;  %v7398_v5 = vsel %vm6755_vm8, %v2517_v31, %v2522_v62  ;;  %v7402_v35 = vsel %vm7084_vm11, %v4978_v47, %v3280_v23  ;;  %v9029_v31 = vld [vmem:[#allocation41_spill] sm:$0xff]  ;;  %v9031_v47 = vld [vmem:[#allocation43_spill] sm:$0xff] }
 0x168   : > { %v2204_v48 = vpop.f32.mrf.mxu0  ;;  %v1560_v56 = vpop.f32.mrf.mxu1  ;;  %v2528_v32 = vrot.slane %v9027_v59, 5  ;;  %v7406_v25 = vsel %vm7084_vm11, %v3282_v41, %v3283_v28  ;;  %v2526_v42 = vor.u32 %v2525_v22, %v2524_v8  ;;  %v9030_v62 = vshll.u32 %v9029_v31, 16 }
 0x169   : > { %v1561_v15 = vadd.f32 %v1560_v56, %v6999_v63  ;;  %v2529_v45 = vrot.slane %v9028_v3, 6  ;;  %v7394_v63 = vsel %vm6755_vm8, %v2512_v44, %v2515_v60  ;;  %v2535_v44 = vrot.slane %v2533_v40, 5 }
 0x16a   : > { %v2205_v34 = vpop.f32.mrf.mxu0  ;;  %v1562_v14 = vpop.f32.mrf.mxu1  ;;  %v2536_v56 = vrot.slane %v9030_v62, 6  ;;  %v9032_v7 = vshrl.u32 %v9031_v47, 16  ;;  %v4927_v59 = vcombine.low %v7348_v10, %v7352_v20  ;;  %v4930_v3 = vcombine.high %v7394_v63, %v7398_v5  ;;  %v9037_v10 = vld [vmem:[#allocation49_spill] sm:$0xff] }
 0x16b   : > { %v7390_v24 = vadd.f32 %v2205_v34, %v1561_v15  ;;  %v2530_v48 = vor.u32 %v2529_v45, %v2528_v32  ;;  %v5342_v34 = vld [vmem:[%s5539_s9 + $0xc8] sm:$0xff]  ;;  %v5035_v32 = vcombine.low %v7356_v53, %v7360_v19  ;;  %v5038_v40 = vcombine.high %v7402_v35, %v7406_v25 }
 0x16c   : > { %v2207_v61 = vpop.f32.mrf.mxu0  ;;  %v1565_v58 = vpop.f32.mrf.mxu1  ;;  %3066 = vmatmul.mubr.bf16.gmra.mxu1 %v4925_v16  ;;  %v3287_v23 = vrot.slane %v5342_v34, 6  ;;  %v2539_v2 = vrot.slane %v9032_v7, 5  ;;  %v5343_v45 = vld [vmem:[%s5539_s9 + $0xe8] sm:$0xff]  ;;  %v4979_v20 = vrot.slane %v9037_v10, 10  ;;  %v3290_v53 = vrot.slane %v7387_v57, 6 }
 0x16d   : > { %v1566_v60 = vadd.f32 %v1565_v58, %v7008_v33  ;;  %3073 = vmatprep.mubr.bf16.mxu1 %v4928_v51  ;;  %v9033_v33 = vshll.u32 %v9031_v47, 16  ;;  %v2548_v14 = vshrl.u32 %v5343_v45, 16  ;;  %v2527_v58 = vrot.slane %v2526_v42, 4  ;;  %v9038_v42 = vld [vmem:[#allocation47_spill] sm:$0xff] }
 0x16e   : > { %v2210_v39 = vpop.f32.mrf.mxu0  ;;  %3731 = vmatmul.mubr.bf16.gmra.mxu0 %v5033_v29  ;;  %v1567_v16 = vpop.f32.mrf.mxu1  ;;  %v3289_v31 = vrot.slane %v3287_v23, 4 }
 0x16f   : > { %3738 = vmatprep.mubr.bf16.mxu0 %v5036_v54  ;;  %v7414_v41 = vadd.f32 %v2210_v39, %v1566_v60  ;;  %v2540_v51 = vrot.slane %v9033_v33, 6  ;;  %v9034_v54 = vld [vmem:[#allocation44_spill] sm:$0xff]  ;;  %v2532_v39 = vrot.slane %v2530_v48, 4  ;;  %v2550_v7 = vrot.slane %v2548_v14, 5 }
 0x170   : > { %v2212_v29 = vpop.f32.mrf.mxu0  ;;  %v9035_v28 = vshrl.u32 %v9034_v54, 16  ;;  %v9036_v15 = vshll.u32 %v9034_v54, 16  ;;  %v1568_v22 = vpop.f32.mrf.mxu1  ;;  %v9039_v33 = vshll.u32 %v9038_v42, 16 }
 0x171   : > { %v1569_v61 = vadd.f32 %v1568_v22, %v7020_v9  ;;  %v2537_v29 = vor.u32 %v2536_v56, %v2535_v44  ;;  %v2541_v62 = vor.u32 %v2540_v51, %v2539_v2  ;;  %v4929_v56 = vcombine.low %v7394_v63, %v7398_v5 }
 0x172   : > { %v2543_v8 = vrot.slane %v9035_v28, 5  ;;  %v2544_v12 = vrot.slane %v9036_v15, 6  ;;  %v2213_v17 = vpop.f32.mrf.mxu0  ;;  %v1570_v60 = vpop.f32.mrf.mxu1  ;;  %v2551_v54 = vrot.slane %v9039_v33, 6  ;;  %v5344_v28 = vld [vmem:[%s5539_s9 + $0xe0] sm:$0xff]  ;;  %v2531_v51 = vsel %vm6755_vm8, %v2527_v58, %v2530_v48  ;;  %v5345_v48 = vld [vmem:[%s5539_s9 + $0xd8] sm:$0xff] }
 0x173   : > { %v7434_v19 = vadd.f32 %v2213_v17, %v1569_v61  ;;  %v3294_v15 = vrot.slane %v5344_v28, 6  ;;  %v5037_v63 = vcombine.low %v7402_v35, %v7406_v25  ;;  %v2542_v5 = vrot.slane %v2541_v62, 4 }
 0x174   : > { %v2215_v16 = vpop.f32.mrf.mxu0  ;;  %v2545_v34 = vor.u32 %v2544_v12, %v2543_v8  ;;  %v1573_v47 = vpop.f32.mrf.mxu1  ;;  %3074 = vmatmul.mubr.bf16.gmra.mxu1 %v4927_v59  ;;  %v2538_v8 = vsel %vm6755_vm8, %v2532_v39, %v2537_v29  ;;  %v3288_v12 = vsel %vm7084_vm11, %v4979_v20, %v3287_v23  ;;  %v4980_v14 = vrot.slane %v5345_v48, 10 }
 0x175   : > { %v1574_v44 = vadd.f32 %v1573_v47, %v7031_v38  ;;  %3081 = vmatprep.mubr.bf16.mxu1 %v4930_v3  ;;  %v3291_v38 = vsel %vm7084_vm11, %v3289_v31, %v3290_v53  ;;  %v2552_v3 = vor.u32 %v2551_v54, %v2550_v7  ;;  %v3296_v61 = vrot.slane %v3294_v15, 4  ;;  %v5346_v53 = vld [vmem:[%s5539_s9 + $0xf8] sm:$0xff] }
 0x176   : > { %v2218_v9 = vpop.f32.mrf.mxu0  ;;  %3739 = vmatmul.mubr.bf16.gmra.mxu0 %v5035_v32  ;;  %v1575_v57 = vpop.f32.mrf.mxu1  ;;  %v2547_v17 = vrot.slane %v2545_v34, 4  ;;  %v4932_v23 = vcombine.high %v2531_v51, %v2538_v8  ;;  %v5040_v39 = vcombine.high %v3288_v12, %v3291_v38  ;;  %v7460_v35 = vsel %vm6755_vm8, %v2542_v5, %v2545_v34  ;;  %v7491_v5 = vld [vmem:[%s5539_s9 + $0x118] sm:$0xff] }
 0x177   : > { %3746 = vmatprep.mubr.bf16.mxu0 %v5038_v40  ;;  %v7450_v22 = vadd.f32 %v2218_v9, %v1574_v44  ;;  %v3297_v40 = vrot.slane %v5343_v45, 6  ;;  %v3301_v62 = vrot.slane %v5346_v53, 6  ;;  %v4931_v9 = vcombine.low %v2531_v51, %v2538_v8 }
 0x178   : > { %v2220_v2 = vpop.f32.mrf.mxu0  ;;  %v1576_v59 = vpop.f32.mrf.mxu1  ;;  %v7464_v45 = vsel %vm6755_vm8, %v2547_v17, %v2552_v3  ;;  %v5039_v7 = vcombine.low %v3288_v12, %v3291_v38  ;;  %v2578_v17 = vshrl.u32 %v7491_v5, 16 }
 0x179   : > { %v1577_v58 = vadd.f32 %v1576_v59, %v7043_v27  ;;  %v7468_v27 = vsel %vm7084_vm11, %v4980_v14, %v3294_v15  ;;  %v7472_v20 = vsel %vm7084_vm11, %v3296_v61, %v3297_v40  ;;  %v4934_v33 = vcombine.high %v7460_v35, %v7464_v45  ;;  %v5349_v14 = vld [vmem:[%s5539_s9 + $0x100] sm:$0xff] }
 0x17a   : > { %v2221_v32 = vpop.f32.mrf.mxu0  ;;  %v1578_v60 = vpop.f32.mrf.mxu1  ;;  %v5042_v54 = vcombine.high %v7468_v27, %v7472_v20  ;;  %v3303_v48 = vrot.slane %v3301_v62, 4  ;;  %v3304_v61 = vrot.slane %v5349_v14, 6 }
 0x17b   : > { %v7456_v29 = vadd.f32 %v2221_v32, %v1577_v58  ;;  %v5348_v32 = vld [vmem:[%s5539_s9 + $0xf0] sm:$0xff] }
 0x17c   : > { %v2223_v16 = vpop.f32.mrf.mxu0  ;;  %v1581_v25 = vpop.f32.mrf.mxu1  ;;  %3082 = vmatmul.mubr.bf16.gmra.mxu1 %v4929_v56  ;;  %v4981_v3 = vrot.slane %v5348_v32, 10 }
 0x17d   : > { %v1582_v31 = vadd.f32 %v1581_v25, %v7055_v26  ;;  %3089 = vmatprep.mubr.bf16.mxu1 %v4932_v23  ;;  %v9040_v26 = vld [vmem:[#allocation5_spill] sm:$0xff] }
 0x17e   : > { %v2226_v10 = vpop.f32.mrf.mxu0  ;;  %3747 = vmatmul.mubr.bf16.gmra.mxu0 %v5037_v63  ;;  %v1583_v34 = vpop.f32.mrf.mxu1  ;;  %v9041_v28 = vshrl.u32 %v9040_v26, 16  ;;  %v9042_v57 = vshll.u32 %v9040_v26, 16  ;;  %v9043_v63 = vld [vmem:[#allocation6_spill] sm:$0xff]  ;;  %v7508_v26 = vsel %vm7084_vm11, %v3303_v48, %v3304_v61 }
 0x17f   : > { %3754 = vmatprep.mubr.bf16.mxu0 %v5040_v39  ;;  %v7476_v42 = vadd.f32 %v2226_v10, %v1582_v31  ;;  %v9044_v51 = vshrl.u32 %v9043_v63, 16  ;;  %v9045_v12 = vshll.u32 %v9043_v63, 16  ;;  %v2580_v10 = vrot.slane %v2578_v17, 5  ;;  %v9046_v31 = vld [vmem:[#allocation7_spill] sm:$0xff] }
 0x180   : > { %v2228_v47 = vpop.f32.mrf.mxu0  ;;  %v2569_v15 = vrot.slane %v9041_v28, 5  ;;  %v1584_v44 = vpop.f32.mrf.mxu1  ;;  %v2570_v2 = vrot.slane %v9042_v57, 6  ;;  %v9047_v53 = vshll.u32 %v9046_v31, 16  ;;  %v7526_v17 = vld [vmem:[%s5539_s9 + $0x130] sm:$0xff] }
 0x181   : > { %v2573_v8 = vrot.slane %v9044_v51, 5  ;;  %v2574_v38 = vrot.slane %v9045_v12, 6  ;;  %v1585_v59 = vadd.f32 %v1584_v44, %v7070_v11  ;;  %v7504_v47 = vsel %vm7084_vm11, %v4981_v3, %v3301_v62  ;;  %v9048_v44 = vld [vmem:[#allocation8_spill] sm:$0xff] }
 0x182   : > { %v2229_v56 = vpop.f32.mrf.mxu0  ;;  %v1586_v40 = vpop.f32.mrf.mxu1  ;;  %v2571_v16 = vor.u32 %v2570_v2, %v2569_v15  ;;  %v2581_v11 = vrot.slane %v9047_v53, 6  ;;  %v4933_v12 = vcombine.low %v7460_v35, %v7464_v45  ;;  %v5044_v48 = vcombine.high %v7504_v47, %v7508_v26 }
 0x183   : > { %v7497_v23 = vadd.f32 %v2229_v56, %v1585_v59  ;;  %v2575_v25 = vor.u32 %v2574_v38, %v2573_v8  ;;  %v9049_v56 = vshrl.u32 %v9048_v44, 16  ;;  %v5041_v38 = vcombine.low %v7468_v27, %v7472_v20 }
 0x184   : > { %v2231_v58 = vpop.f32.mrf.mxu0  ;;  %v1589_v39 = vpop.f32.mrf.mxu1  ;;  %3090 = vmatmul.mubr.bf16.gmra.mxu1 %v4931_v9  ;;  %v5350_v9 = vld [vmem:[%s5539_s9 + $0x110] sm:$0xff]  ;;  %v2593_v59 = vshrl.u32 %v7526_v17, 16  ;;  %v2572_v14 = vrot.slane %v2571_v16, 4  ;;  %v2582_v40 = vor.u32 %v2581_v11, %v2580_v10  ;;  %v3311_v27 = vrot.slane %v7491_v5, 6 }
 0x185   : > { %v1590_v34 = vadd.f32 %v1589_v39, %v7089_v0  ;;  %3097 = vmatprep.mubr.bf16.mxu1 %v4934_v33  ;;  %v2584_v57 = vrot.slane %v9049_v56, 5  ;;  %v9050_v0 = vshll.u32 %v9048_v44, 16  ;;  %v2577_v61 = vrot.slane %v2575_v25, 4  ;;  %v5352_v39 = vld [vmem:[%s5539_s9 + $0x108] sm:$0xff]  ;;  %v9054_v44 = vld [vmem:[#allocation13_spill] sm:$0xff] }
 0x186   : > { %v2234_v60 = vpop.f32.mrf.mxu0  ;;  %3755 = vmatmul.mubr.bf16.gmra.mxu0 %v5039_v7  ;;  %v3308_v7 = vrot.slane %v5350_v9, 6  ;;  %v1591_v28 = vpop.f32.mrf.mxu1  ;;  %v4982_v35 = vrot.slane %v5352_v39, 10  ;;  %v9055_v16 = vshll.u32 %v9054_v44, 16  ;;  %v5043_v5 = vcombine.low %v7504_v47, %v7508_v26 }
 0x187   : > { %3762 = vmatprep.mubr.bf16.mxu0 %v5042_v54  ;;  %v2585_v33 = vrot.slane %v9050_v0, 6  ;;  %v9051_v54 = vld [vmem:[#allocation9_spill] sm:$0xff]  ;;  %v7519_v8 = vadd.f32 %v2234_v60, %v1590_v34  ;;  %v5353_v34 = vld [vmem:[%s5539_s9 + $0x128] sm:$0xff]  ;;  %v7543_v11 = vsel %vm6755_vm8, %v2572_v14, %v2575_v25 }
 0x188   : > { %v2236_v15 = vpop.f32.mrf.mxu0  ;;  %v9052_v2 = vshrl.u32 %v9051_v54, 16  ;;  %v9053_v62 = vshll.u32 %v9051_v54, 16  ;;  %v1592_v32 = vpop.f32.mrf.mxu1  ;;  %v3310_v45 = vrot.slane %v3308_v7, 4  ;;  %v3315_v9 = vrot.slane %v5353_v34, 6  ;;  %v9057_v54 = vld [vmem:[#allocation51_spill] sm:$0xff] }
 0x189   : > { %v1593_v58 = vadd.f32 %v1592_v32, %v7103_v30  ;;  %v2586_v31 = vor.u32 %v2585_v33, %v2584_v57  ;;  %v2595_v15 = vrot.slane %v2593_v59, 5  ;;  %v2596_v56 = vrot.slane %v9055_v16, 6  ;;  %v9056_v33 = vld [vmem:[#allocation50_spill] sm:$0xff] }
 0x18a   : > { %v2588_v63 = vrot.slane %v9052_v2, 5  ;;  %v2589_v51 = vrot.slane %v9053_v62, 6  ;;  %v2237_v3 = vpop.f32.mrf.mxu0  ;;  %v1594_v20 = vpop.f32.mrf.mxu1  ;;  %v7547_v57 = vsel %vm6755_vm8, %v2577_v61, %v2582_v40  ;;  %v9058_v2 = vcombine.high %v9056_v33, %v9057_v54 }
 0x18b   : > { %v7535_v28 = vadd.f32 %v2237_v3, %v1593_v58  ;;  %v7559_v47 = vsel %vm7084_vm11, %v3310_v45, %v3311_v27  ;;  %v2587_v62 = vrot.slane %v2586_v31, 4  ;;  %v2597_v32 = vor.u32 %v2596_v56, %v2595_v15  ;;  %v7574_v31 = vld [vmem:[%s5539_s9 + $0x148] sm:$0xff] }
 0x18c   : > { %v2239_v60 = vpop.f32.mrf.mxu0  ;;  %v2590_v53 = vor.u32 %v2589_v51, %v2588_v63  ;;  %v1597_v10 = vpop.f32.mrf.mxu1  ;;  %3098 = vmatmul.mubr.bf16.gmra.mxu1 %v4933_v12  ;;  %v7555_v63 = vsel %vm7084_vm11, %v4982_v35, %v3308_v7  ;;  %v5354_v12 = vld [vmem:[%s5539_s9 + $0x120] sm:$0xff]  ;;  %v3318_v3 = vrot.slane %v7526_v17, 6  ;;  %v9062_v35 = vld [vmem:[#allocation15_spill] sm:$0xff]  ;;  %v2608_v34 = vshrl.u32 %v7574_v31, 16 }
 0x18d   : > { %v1598_v0 = vadd.f32 %v1597_v10, %v7124_v4  ;;  %3105 = vmatprep.mubr.bf16.mxu1 %v9058_v2  ;;  %v4983_v4 = vrot.slane %v5354_v12, 10  ;;  %v9063_v45 = vshrl.u32 %v9062_v35, 16  ;;  %v9064_v20 = vshll.u32 %v9062_v35, 16 }
 0x18e   : > { %v2242_v30 = vpop.f32.mrf.mxu0  ;;  %3763 = vmatmul.mubr.bf16.gmra.mxu0 %v5041_v38  ;;  %v1599_v25 = vpop.f32.mrf.mxu1  ;;  %v2592_v51 = vrot.slane %v2590_v53, 4  ;;  %v3317_v38 = vrot.slane %v3315_v9, 4  ;;  %v4938_v15 = vcombine.high %v7543_v11, %v7547_v57  ;;  %v5046_v44 = vcombine.high %v7555_v63, %v7559_v47 }
 0x18f   : > { %3770 = vmatprep.mubr.bf16.mxu0 %v5044_v48  ;;  %v7562_v59 = vadd.f32 %v2242_v30, %v1598_v0  ;;  %v9059_v48 = vld [vmem:[#allocation14_spill] sm:$0xff]  ;;  %v2603_v27 = vrot.slane %v9063_v45, 5  ;;  %v2604_v60 = vrot.slane %v9064_v20, 6  ;;  %v7584_v10 = vsel %vm6755_vm8, %v2587_v62, %v2590_v53 }
 0x190   : > { %v2244_v26 = vpop.f32.mrf.mxu0  ;;  %v9060_v7 = vshrl.u32 %v9059_v48, 16  ;;  %v1600_v61 = vpop.f32.mrf.mxu1  ;;  %v9061_v58 = vshll.u32 %v9059_v48, 16  ;;  %v7590_v0 = vsel %vm6755_vm8, %v2592_v51, %v2597_v32  ;;  %v7598_v2 = vsel %vm7084_vm11, %v3317_v38, %v3318_v3  ;;  %v9066_v51 = vld [vmem:[#allocation20_spill] sm:$0xff]  ;;  %v9068_v3 = vld [vmem:[#allocation19_spill] sm:$0xff] }
 0x191   : > { %v1601_v17 = vadd.f32 %v1600_v61, %v7146_v1  ;;  %v7594_v1 = vsel %vm7084_vm11, %v4983_v4, %v3315_v9  ;;  %v9065_v53 = vcombine.low %v9056_v33, %v9057_v54  ;;  %v2605_v12 = vor.u32 %v2604_v60, %v2603_v27  ;;  %v5356_v4 = vld [vmem:[%s5539_s9 + $0x140] sm:$0xff] }
 0x192   : > { %v2599_v14 = vrot.slane %v9060_v7, 5  ;;  %v2245_v40 = vpop.f32.mrf.mxu0  ;;  %v2600_v39 = vrot.slane %v9061_v58, 6  ;;  %v1602_v16 = vpop.f32.mrf.mxu1  ;;  %v2610_v48 = vrot.slane %v2608_v34, 5  ;;  %v9067_v32 = vshll.u32 %v9066_v51, 16  ;;  %v9071_v27 = vld [vmem:[#allocation21_spill] sm:$0xff] }
 0x193   : > { %v7586_v30 = vadd.f32 %v2245_v40, %v1601_v17  ;;  %v3322_v38 = vrot.slane %v5356_v4, 6  ;;  %v9069_v61 = vshrl.u32 %v9068_v3, 16  ;;  %v9070_v33 = vshll.u32 %v9068_v3, 16 }
 0x194   : > { %v2247_v56 = vpop.f32.mrf.mxu0  ;;  %v1605_v25 = vpop.f32.mrf.mxu1  ;;  %3106 = vmatmul.mubr.bf16.gmra.mxu1 %v9065_v53  ;;  %v2601_v62 = vor.u32 %v2600_v39, %v2599_v14  ;;  %v2611_v7 = vrot.slane %v9067_v32, 6  ;;  %v4937_v58 = vcombine.low %v7543_v11, %v7547_v57  ;;  %v4940_v39 = vcombine.high %v7584_v10, %v7590_v0 }
 0x195   : > { %v1606_v9 = vadd.f32 %v1605_v25, %v7161_v13  ;;  %3113 = vmatprep.mubr.bf16.mxu1 %v4938_v15  ;;  %v2614_v40 = vrot.slane %v9069_v61, 5  ;;  %v2615_v54 = vrot.slane %v9070_v33, 6  ;;  %v5045_v13 = vcombine.low %v7555_v63, %v7559_v47  ;;  %v7626_v15 = vld [vmem:[%s5539_s9 + $0x160] sm:$0xff]  ;;  %v5358_v56 = vld [vmem:[%s5539_s9 + $0x138] sm:$0xff] }
 0x196   : > { %v2250_v26 = vpop.f32.mrf.mxu0  ;;  %3771 = vmatmul.mubr.bf16.gmra.mxu0 %v5043_v5  ;;  %v1607_v5 = vpop.f32.mrf.mxu1  ;;  %v5048_v35 = vcombine.high %v7594_v1, %v7598_v2  ;;  %v9072_v20 = vshrl.u32 %v9071_v27, 16  ;;  %v9073_v34 = vshll.u32 %v9071_v27, 16  ;;  %v2623_v11 = vshrl.u32 %v7626_v15, 16 }
 0x197   : > { %3778 = vmatprep.mubr.bf16.mxu0 %v5046_v44  ;;  %v7619_v45 = vadd.f32 %v2250_v26, %v1606_v9  ;;  %v2602_v47 = vrot.slane %v2601_v62, 4  ;;  %v2607_v44 = vrot.slane %v2605_v12, 4  ;;  %v2612_v16 = vor.u32 %v2611_v7, %v2610_v48  ;;  %v9074_v5 = vld [vmem:[#allocation23_spill] sm:$0xff] }
 0x198   : > { %v2252_v14 = vpop.f32.mrf.mxu0  ;;  %v2618_v60 = vrot.slane %v9072_v20, 5  ;;  %v2619_v17 = vrot.slane %v9073_v34, 6  ;;  %v1608_v57 = vpop.f32.mrf.mxu1  ;;  %v4984_v25 = vrot.slane %v5358_v56, 10  ;;  %v3324_v53 = vrot.slane %v3322_v38, 4  ;;  %v9076_v34 = vld [vmem:[#allocation26_spill] sm:$0xff] }
 0x199   : > { %v1609_v26 = vadd.f32 %v1608_v57, %v7196_v55  ;;  %v3325_v51 = vrot.slane %v7574_v31, 6  ;;  %v2616_v32 = vor.u32 %v2615_v54, %v2614_v40  ;;  %v2625_v33 = vrot.slane %v2623_v11, 5 }
 0x19a   : > { %v2253_v63 = vpop.f32.mrf.mxu0  ;;  %v1610_v9 = vpop.f32.mrf.mxu1  ;;  %v2620_v61 = vor.u32 %v2619_v17, %v2618_v60  ;;  %v9075_v14 = vshll.u32 %v9074_v5, 16  ;;  %v7638_v55 = vsel %vm6755_vm8, %v2602_v47, %v2605_v12  ;;  %v7642_v31 = vsel %vm6755_vm8, %v2607_v44, %v2612_v16  ;;  %v5359_v12 = vld [vmem:[%s5539_s9 + $0x158] sm:$0xff] }
 0x19b   : > { %v7632_v3 = vadd.f32 %v2253_v63, %v1609_v26  ;;  %v7646_v7 = vsel %vm7084_vm11, %v4984_v25, %v3322_v38  ;;  %v7651_v54 = vsel %vm7084_vm11, %v3324_v53, %v3325_v51  ;;  %v9077_v17 = vshrl.u32 %v9076_v34, 16  ;;  %v7665_v25 = vld [vmem:[%s5539_s9 + $0x178] sm:$0xff] }
 0x19c   : > { %v2255_v4 = vpop.f32.mrf.mxu0  ;;  %v2626_v62 = vrot.slane %v9075_v14, 6  ;;  %v1613_v27 = vpop.f32.mrf.mxu1  ;;  %3114 = vmatmul.mubr.bf16.gmra.mxu1 %v4937_v58  ;;  %v2617_v58 = vrot.slane %v2616_v32, 4  ;;  %v9078_v38 = vshll.u32 %v9076_v34, 16  ;;  %v2622_v16 = vrot.slane %v2620_v61, 4  ;;  %v5361_v14 = vld [vmem:[%s5539_s9 + $0x150] sm:$0xff] }
 0x19d   : > { %v1614_v40 = vadd.f32 %v1613_v27, %v7213_v52  ;;  %3121 = vmatprep.mubr.bf16.mxu1 %v4940_v39  ;;  %v2629_v11 = vrot.slane %v9077_v17, 5  ;;  %v9079_v52 = vld [vmem:[#allocation27_spill] sm:$0xff]  ;;  %v2638_v26 = vshrl.u32 %v7665_v25, 16  ;;  %v4939_v32 = vcombine.low %v7584_v10, %v7590_v0 }
 0x19e   : > { %v2258_v48 = vpop.f32.mrf.mxu0  ;;  %3779 = vmatmul.mubr.bf16.gmra.mxu0 %v5045_v13  ;;  %v3329_v13 = vrot.slane %v5359_v12, 6  ;;  %v1615_v20 = vpop.f32.mrf.mxu1  ;;  %v2630_v57 = vrot.slane %v9078_v38, 6  ;;  %v9080_v63 = vshrl.u32 %v9079_v52, 16  ;;  %v2627_v56 = vor.u32 %v2626_v62, %v2625_v33 }
 0x19f   : > { %3786 = vmatprep.mubr.bf16.mxu0 %v5048_v35  ;;  %v9081_v35 = vshll.u32 %v9079_v52, 16  ;;  %v7662_v44 = vadd.f32 %v2258_v48, %v1614_v40  ;;  %v5047_v9 = vcombine.low %v7594_v1, %v7598_v2  ;;  %v4942_v4 = vcombine.high %v7638_v55, %v7642_v31 }
 0x1a0   : > { %v2260_v60 = vpop.f32.mrf.mxu0  ;;  %v2633_v39 = vrot.slane %v9080_v63, 5  ;;  %v1616_v53 = vpop.f32.mrf.mxu1  ;;  %v5050_v33 = vcombine.high %v7646_v7, %v7651_v54  ;;  %v4985_v62 = vrot.slane %v5361_v14, 10  ;;  %v3331_v27 = vrot.slane %v3329_v13, 4 }
 0x1a1   : > { %v2634_v47 = vrot.slane %v9081_v35, 6  ;;  %v1617_v5 = vadd.f32 %v1616_v53, %v7241_v43  ;;  %v7680_v12 = vsel %vm6755_vm8, %v2617_v58, %v2620_v61  ;;  %v3332_v10 = vrot.slane %v7626_v15, 6  ;;  %v9082_v60 = vld [vmem:[#allocation30_spill] sm:$0xff] }
 0x1a2   : > { %v2261_v51 = vpop.f32.mrf.mxu0  ;;  %v1618_v48 = vpop.f32.mrf.mxu1  ;;  %v2631_v0 = vor.u32 %v2630_v57, %v2629_v11  ;;  %v7687_v43 = vsel %vm6755_vm8, %v2622_v16, %v2627_v56  ;;  %v2640_v20 = vrot.slane %v2638_v26, 5  ;;  %v9083_v34 = vshll.u32 %v9082_v60, 16  ;;  %v5362_v57 = vld [vmem:[%s5539_s9 + $0x170] sm:$0xff]  ;;  %v5363_v16 = vld [vmem:[%s5539_s9 + $0x168] sm:$0xff] }
 0x1a3   : > { %v2635_v1 = vor.u32 %v2634_v47, %v2633_v39  ;;  %v7683_v2 = vadd.f32 %v2261_v51, %v1617_v5  ;;  %v4941_v15 = vcombine.low %v7638_v55, %v7642_v31  ;;  %v5049_v58 = vcombine.low %v7646_v7, %v7651_v54  ;;  %v9084_v56 = vld [vmem:[#allocation31_spill] sm:$0xff]  ;;  %v9087_v5 = vld [vmem:[#allocation32_spill] sm:$0xff] }
 0x1a4   : > { %v2263_v40 = vpop.f32.mrf.mxu0  ;;  %v2641_v17 = vrot.slane %v9083_v34, 6  ;;  %v1621_v38 = vpop.f32.mrf.mxu1  ;;  %3122 = vmatmul.mubr.bf16.gmra.mxu1 %v4939_v32  ;;  %v7698_v11 = vsel %vm7084_vm11, %v4985_v62, %v3329_v13  ;;  %v3336_v63 = vrot.slane %v5362_v57, 6  ;;  %v4944_v55 = vcombine.high %v7680_v12, %v7687_v43  ;;  %v7719_v48 = vld [vmem:[%s5539_s9 + $0x190] sm:$0xff] }
 0x1a5   : > { %v1622_v61 = vadd.f32 %v1621_v38, %v7274_v49  ;;  %3129 = vmatprep.mubr.bf16.mxu1 %v4942_v4  ;;  %v7705_v49 = vsel %vm7084_vm11, %v3331_v27, %v3332_v10  ;;  %v2632_v31 = vrot.slane %v2631_v0, 4  ;;  %v2637_v47 = vrot.slane %v2635_v1, 4  ;;  %v9090_v10 = vld [vmem:[#allocation22_spill] sm:$0xff] }
 0x1a6   : > { %v2266_v52 = vpop.f32.mrf.mxu0  ;;  %3787 = vmatmul.mubr.bf16.gmra.mxu0 %v5047_v9  ;;  %v1623_v39 = vpop.f32.mrf.mxu1  ;;  %v2642_v54 = vor.u32 %v2641_v17, %v2640_v20  ;;  %v4986_v13 = vrot.slane %v5363_v16, 10  ;;  %v9085_v26 = vshrl.u32 %v9084_v56, 16  ;;  %v9086_v9 = vshll.u32 %v9084_v56, 16 }
 0x1a7   : > { %3794 = vmatprep.mubr.bf16.mxu0 %v5050_v33  ;;  %v7707_v7 = vadd.f32 %v2266_v52, %v1622_v61  ;;  %v9088_v33 = vshrl.u32 %v9087_v5, 16  ;;  %v9089_v62 = vshll.u32 %v9087_v5, 16  ;;  %v2653_v40 = vshrl.u32 %v7719_v48, 16 }
 0x1a8   : > { %v2268_v35 = vpop.f32.mrf.mxu0  ;;  %v2644_v53 = vrot.slane %v9085_v26, 5  ;;  %v1624_v51 = vpop.f32.mrf.mxu1  ;;  %v2645_v4 = vrot.slane %v9086_v9, 6  ;;  %v5052_v20 = vcombine.high %v7698_v11, %v7705_v49  ;;  %v3338_v60 = vrot.slane %v3336_v63, 4 }
 0x1a9   : > { %v2648_v14 = vrot.slane %v9088_v33, 5  ;;  %v2649_v27 = vrot.slane %v9089_v62, 6  ;;  %v1625_v0 = vadd.f32 %v1624_v51, %v9090_v10  ;;  %v3339_v34 = vrot.slane %v7665_v25, 6  ;;  %v9091_v51 = vld [vmem:[#allocation33_spill] sm:$0xff]  ;;  %v9096_v33 = vld [vmem:[#allocation35_spill] sm:$0xff] }
 0x1aa   : > { %v2269_v32 = vpop.f32.mrf.mxu0  ;;  %v1626_v17 = vpop.f32.mrf.mxu1  ;;  %v7730_v61 = vsel %vm6755_vm8, %v2632_v31, %v2635_v1  ;;  %v7734_v57 = vsel %vm6755_vm8, %v2637_v47, %v2642_v54  ;;  %v7738_v39 = vsel %vm7084_vm11, %v4986_v13, %v3336_v63  ;;  %v2646_v25 = vor.u32 %v2645_v4, %v2644_v53  ;;  %v5365_v63 = vld [vmem:[%s5539_s9 + $0x188] sm:$0xff] }
 0x1ab   : > { %v7726_v52 = vadd.f32 %v2269_v32, %v1625_v0  ;;  %v2650_v56 = vor.u32 %v2649_v27, %v2648_v14  ;;  %v2655_v26 = vrot.slane %v2653_v40, 5  ;;  %v9092_v32 = vshll.u32 %v9091_v51, 16  ;;  %v9093_v13 = vld [vmem:[#allocation34_spill] sm:$0xff] }
 0x1ac   : > { %v2271_v38 = vpop.f32.mrf.mxu0  ;;  %v1629_v35 = vpop.f32.mrf.mxu1  ;;  %3130 = vmatmul.mubr.bf16.gmra.mxu1 %v4941_v15  ;;  %v7745_v47 = vsel %vm7084_vm11, %v3338_v60, %v3339_v34  ;;  %v3343_v54 = vrot.slane %v5365_v63, 6  ;;  %v9094_v15 = vshrl.u32 %v9093_v13, 16  ;;  %v9095_v4 = vshll.u32 %v9093_v13, 16  ;;  %v7757_v27 = vld [vmem:[%s5539_s9 + $0x1a8] sm:$0xff] }
 0x1ad   : > { %v2656_v1 = vrot.slane %v9092_v32, 6  ;;  %v1630_v31 = vadd.f32 %v1629_v35, %v7304_v36  ;;  %3137 = vmatprep.mubr.bf16.mxu1 %v4944_v55  ;;  %v9097_v14 = vshrl.u32 %v9096_v33, 16  ;;  %v9098_v55 = vshll.u32 %v9096_v33, 16 }
 0x1ae   : > { %v2274_v16 = vpop.f32.mrf.mxu0  ;;  %3795 = vmatmul.mubr.bf16.gmra.mxu0 %v5049_v58  ;;  %v2659_v58 = vrot.slane %v9094_v15, 5  ;;  %v1631_v53 = vpop.f32.mrf.mxu1  ;;  %v2660_v5 = vrot.slane %v9095_v4, 6  ;;  %v2668_v40 = vshrl.u32 %v7757_v27, 16  ;;  %v4943_v0 = vcombine.low %v7680_v12, %v7687_v43 }
 0x1af   : > { %3802 = vmatprep.mubr.bf16.mxu0 %v5052_v20  ;;  %v2663_v36 = vrot.slane %v9097_v14, 5  ;;  %v2664_v62 = vrot.slane %v9098_v55, 6  ;;  %v7760_v10 = vadd.f32 %v2274_v16, %v1630_v31  ;;  %v5051_v20 = vcombine.low %v7698_v11, %v7705_v49  ;;  %v5367_v31 = vld [vmem:[%s5539_s9 + $0x180] sm:$0xff] }
 0x1b0   : > { %v2276_v9 = vpop.f32.mrf.mxu0  ;;  %v4946_v60 = vcombine.high %v7730_v61, %v7734_v57  ;;  %v1632_v34 = vpop.f32.mrf.mxu1  ;;  %v5054_v38 = vcombine.high %v7738_v39, %v7745_v47  ;;  %v2647_v35 = vrot.slane %v2646_v25, 4  ;;  %v2652_v51 = vrot.slane %v2650_v56, 4 }
 0x1b1   : > { %v2657_v32 = vor.u32 %v2656_v1, %v2655_v26  ;;  %v1633_v16 = vadd.f32 %v1632_v34, %v7334_v37  ;;  %v4987_v63 = vrot.slane %v5367_v31, 10  ;;  %v3345_v12 = vrot.slane %v3343_v54, 4  ;;  %v9099_v9 = vld [vmem:[#allocation38_spill] sm:$0xff]  ;;  %v5368_v26 = vld [vmem:[%s5539_s9 + $0x1a0] sm:$0xff] }
 0x1b2   : > { %v2277_v17 = vpop.f32.mrf.mxu0  ;;  %v3346_v43 = vrot.slane %v7719_v48, 6  ;;  %v1634_v11 = vpop.f32.mrf.mxu1  ;;  %v2661_v13 = vor.u32 %v2660_v5, %v2659_v58  ;;  %v2665_v15 = vor.u32 %v2664_v62, %v2663_v36  ;;  %v2670_v53 = vrot.slane %v2668_v40, 5  ;;  %v9101_v36 = vld [vmem:[#allocation52_spill] sm:$0xff] }
 0x1b3   : > { %v9100_v4 = vshll.u32 %v9099_v9, 16  ;;  %v7775_v14 = vadd.f32 %v2277_v17, %v1633_v16  ;;  %v4945_v25 = vcombine.low %v7730_v61, %v7734_v57  ;;  %v3350_v37 = vrot.slane %v5368_v26, 6 }
 0x1b4   : > { %v2279_v49 = vpop.f32.mrf.mxu0  ;;  %v1637_v1 = vpop.f32.mrf.mxu1  ;;  %3138 = vmatmul.mubr.bf16.gmra.mxu1 %v4943_v0  ;;  %v5053_v48 = vcombine.low %v7738_v39, %v7745_v47  ;;  %v7784_v58 = vsel %vm6755_vm8, %v2647_v35, %v2650_v56  ;;  %v7788_v5 = vsel %vm6755_vm8, %v2652_v51, %v2657_v32  ;;  %v7793_v57 = vsel %vm7084_vm11, %v4987_v63, %v3343_v54 }
 0x1b5   : > { %v2671_v33 = vrot.slane %v9100_v4, 6  ;;  %v1638_v61 = vadd.f32 %v1637_v1, %v9101_v36  ;;  %3145 = vmatprep.mubr.bf16.mxu1 %v4946_v60  ;;  %v7797_v62 = vsel %vm7084_vm11, %v3345_v12, %v3346_v43  ;;  %v2662_v47 = vrot.slane %v2661_v13, 4  ;;  %v9105_v12 = vld [vmem:[#allocation40_spill] sm:$0xff]  ;;  %v9108_v4 = vld [vmem:[#allocation53_spill] sm:$0xff] }
 0x1b6   : > { %v2282_v55 = vpop.f32.mrf.mxu0  ;;  %3803 = vmatmul.mubr.bf16.gmra.mxu0 %v5051_v20  ;;  %v1639_v39 = vpop.f32.mrf.mxu1  ;;  %v2667_v40 = vrot.slane %v2665_v15, 4  ;;  %v5369_v20 = vld [vmem:[%s5539_s9 + $0x198] sm:$0xff]  ;;  %v3352_v60 = vrot.slane %v3350_v37, 4  ;;  %v3353_v63 = vrot.slane %v7757_v27, 6  ;;  %v9106_v43 = vshrl.u32 %v9105_v12, 16 }
 0x1b7   : > { %3810 = vmatprep.mubr.bf16.mxu0 %v5054_v38  ;;  %v2672_v0 = vor.u32 %v2671_v33, %v2670_v53  ;;  %v4988_v34 = vrot.slane %v5369_v20, 10  ;;  %v7800_v17 = vadd.f32 %v2282_v55, %v1638_v61  ;;  %v9102_v38 = vld [vmem:[#allocation39_spill] sm:$0xff]  ;;  %v9107_v49 = vshll.u32 %v9105_v12, 16  ;;  %v7812_v53 = vld [vmem:[%s5539_s9 + $0x1c0] sm:$0xff] }
 0x1b8   : > { %v2284_v56 = vpop.f32.mrf.mxu0  ;;  %v9103_v35 = vshrl.u32 %v9102_v38, 16  ;;  %v9104_v54 = vshll.u32 %v9102_v38, 16  ;;  %v1640_v16 = vpop.f32.mrf.mxu1  ;;  %v2678_v11 = vrot.slane %v9106_v43, 5  ;;  %v2683_v9 = vshrl.u32 %v7812_v53, 16 }
 0x1b9   : > { %v2679_v13 = vrot.slane %v9107_v49, 6  ;;  %v1641_v33 = vadd.f32 %v1640_v16, %v9108_v4  ;;  %v4948_v26 = vcombine.high %v7784_v58, %v7788_v5  ;;  %v5056_v1 = vcombine.high %v7793_v57, %v7797_v62  ;;  %v9109_v16 = vld [vmem:[#allocation42_spill] sm:$0xff] }
 0x1ba   : > { %v2674_v51 = vrot.slane %v9103_v35, 5  ;;  %v2675_v32 = vrot.slane %v9104_v54, 6  ;;  %v2285_v31 = vpop.f32.mrf.mxu0  ;;  %v1642_v55 = vpop.f32.mrf.mxu1  ;;  %v7822_v36 = vsel %vm6755_vm8, %v2662_v47, %v2665_v15  ;;  %v7828_v39 = vsel %vm6755_vm8, %v2667_v40, %v2672_v0  ;;  %v9111_v0 = vld [vmem:[#allocation54_spill] sm:$0xff] }
 0x1bb   : > { %v7824_v61 = vadd.f32 %v2285_v31, %v1641_v33  ;;  %v7832_v56 = vsel %vm7084_vm11, %v4988_v34, %v3350_v37  ;;  %v7836_v15 = vsel %vm7084_vm11, %v3352_v60, %v3353_v63  ;;  %v2680_v47 = vor.u32 %v2679_v13, %v2678_v11  ;;  %v5371_v60 = vld [vmem:[%s5539_s9 + $0x1b8] sm:$0xff]  ;;  %v9112_v33 = vld [vmem:[#allocation45_spill] sm:$0xff] }
 0x1bc   : > { %v2287_v27 = vpop.f32.mrf.mxu0  ;;  %v2676_v20 = vor.u32 %v2675_v32, %v2674_v51  ;;  %v1645_v38 = vpop.f32.mrf.mxu1  ;;  %3146 = vmatmul.mubr.bf16.gmra.mxu1 %v4945_v25  ;;  %v2685_v54 = vrot.slane %v2683_v9, 5  ;;  %v9110_v31 = vshll.u32 %v9109_v16, 16  ;;  %v4947_v25 = vcombine.low %v7784_v58, %v7788_v5  ;;  %v5372_v58 = vld [vmem:[%s5539_s9 + $0x1b0] sm:$0xff] }
 0x1bd   : > { %v1646_v12 = vadd.f32 %v1645_v38, %v9111_v0  ;;  %3153 = vmatprep.mubr.bf16.mxu1 %v4948_v26  ;;  %v3357_v51 = vrot.slane %v5371_v60, 6  ;;  %v4950_v63 = vcombine.high %v7822_v36, %v7828_v39  ;;  %v5058_v43 = vcombine.high %v7832_v56, %v7836_v15  ;;  %v9114_v26 = vld [vmem:[#allocation55_spill] sm:$0xff]  ;;  %v9116_v38 = vld [vmem:[#allocation46_spill] sm:$0xff] }
 0x1be   : > { %v2290_v35 = vpop.f32.mrf.mxu0  ;;  %3811 = vmatmul.mubr.bf16.gmra.mxu0 %v5053_v48  ;;  %v2686_v40 = vrot.slane %v9110_v31, 6  ;;  %v1647_v37 = vpop.f32.mrf.mxu1  ;;  %v5055_v48 = vcombine.low %v7793_v57, %v7797_v62  ;;  %v2677_v11 = vrot.slane %v2676_v20, 4  ;;  %v2682_v9 = vrot.slane %v2680_v47, 4 }
 0x1bf   : > { %3818 = vmatprep.mubr.bf16.mxu0 %v5056_v1  ;;  %v7846_v32 = vadd.f32 %v2290_v35, %v1646_v12  ;;  %v4989_v5 = vrot.slane %v5372_v58, 10  ;;  %v9113_v57 = vshrl.u32 %v9112_v33, 16  ;;  %v9115_v55 = vshll.u32 %v9112_v33, 16 }
 0x1c0   : > { %v2292_v34 = vpop.f32.mrf.mxu0  ;;  %v1648_v49 = vpop.f32.mrf.mxu1  ;;  %v2687_v4 = vor.u32 %v2686_v40, %v2685_v54  ;;  %v9117_v35 = vshrl.u32 %v9116_v38, 16  ;;  %v9118_v20 = vshll.u32 %v9116_v38, 16  ;;  %v3359_v37 = vrot.slane %v3357_v51, 4  ;;  %v5373_v40 = vld [vmem:[%s5539_s9 + $0x1d8] sm:$0xff] }
 0x1c1   : > { %v2689_v62 = vrot.slane %v9113_v57, 5  ;;  %v1649_v1 = vadd.f32 %v1648_v49, %v9114_v26  ;;  %v2690_v27 = vrot.slane %v9115_v55, 6  ;;  %v3360_v54 = vrot.slane %v7812_v53, 6  ;;  %v9119_v55 = vld [vmem:[#allocation56_spill] sm:$0xff] }
 0x1c2   : > { %v2293_v13 = vpop.f32.mrf.mxu0  ;;  %v2693_v16 = vrot.slane %v9117_v35, 5  ;;  %v2694_v31 = vrot.slane %v9118_v20, 6  ;;  %v1650_v0 = vpop.f32.mrf.mxu1  ;;  %v2698_v34 = vshrl.u32 %v5373_v40, 16  ;;  %v2681_v33 = vsel %vm6755_vm8, %v2677_v11, %v2680_v47  ;;  %v9120_v20 = vld [vmem:[#allocation48_spill] sm:$0xff] }
 0x1c3   : > { %v7864_v60 = vadd.f32 %v2293_v13, %v1649_v1  ;;  %v2688_v57 = vsel %vm6755_vm8, %v2682_v9, %v2687_v4  ;;  %v3358_v26 = vsel %vm7084_vm11, %v4989_v5, %v3357_v51  ;;  %v2691_v13 = vor.u32 %v2690_v27, %v2689_v62  ;;  %v5374_v9 = vld [vmem:[%s5539_s9 + $0x1d0] sm:$0xff]  ;;  %v9122_v27 = vld [vmem:[#allocation57_spill] sm:$0xff] }
 0x1c4   : > { %v2295_v12 = vpop.f32.mrf.mxu0  ;;  %v1653_v58 = vpop.f32.mrf.mxu1  ;;  %3154 = vmatmul.mubr.bf16.gmra.mxu1 %v4947_v25  ;;  %v2695_v1 = vor.u32 %v2694_v31, %v2693_v16  ;;  %v3361_v25 = vsel %vm7084_vm11, %v3359_v37, %v3360_v54  ;;  %v9121_v47 = vshll.u32 %v9120_v20, 16  ;;  %v3364_v4 = vrot.slane %v5374_v9, 6 }
 0x1c5   : > { %v1654_v53 = vadd.f32 %v1653_v58, %v9119_v55  ;;  %3161 = vmatprep.mubr.bf16.mxu1 %v4950_v63  ;;  %v4949_v63 = vcombine.low %v7822_v36, %v7828_v39  ;;  %v4952_v62 = vcombine.high %v2681_v33, %v2688_v57  ;;  %v5060_v31 = vcombine.high %v3358_v26, %v3361_v25  ;;  %v5375_v55 = vld [vmem:[%s5539_s9 + $0x1c8] sm:$0xff]  ;;  %s5439_s9 = smov 104  }
 0x1c6   : > { %v2298_v49 = vpop.f32.mrf.mxu0  ;;  %3819 = vmatmul.mubr.bf16.gmra.mxu0 %v5055_v48  ;;  %v1655_v38 = vpop.f32.mrf.mxu1  ;;  %v2700_v48 = vrot.slane %v2698_v34, 5  ;;  %v2701_v11 = vrot.slane %v9121_v47, 6  ;;  %v2692_v12 = vrot.slane %v2691_v13, 4  ;;  %v2697_v37 = vrot.slane %v2695_v1, 4  ;;  %v9123_v39 = vld [vmem:[#allocation58_spill] sm:$0xff] }
 0x1c7   : > { %3826 = vmatprep.mubr.bf16.mxu0 %v5058_v43  ;;  %v7878_v0 = vadd.f32 %v2298_v49, %v1654_v53  ;;  %v5057_v43 = vcombine.low %v7832_v56, %v7836_v15  ;;  %v4990_v49 = vrot.slane %v5375_v55, 10  ;;  %v3366_v53 = vrot.slane %v3364_v4, 4 }
 0x1c8   : > { %v2300_v35 = vpop.f32.mrf.mxu0  ;;  %v1656_v51 = vpop.f32.mrf.mxu1  ;;  %v2702_v58 = vor.u32 %v2701_v11, %v2700_v48  ;;  %v3367_v38 = vrot.slane %v5373_v40, 6  ;;  %v2696_v47 = vsel %vm6755_vm8, %v2692_v12, %v2695_v1 }
 0x1c9   : > { %v1657_v16 = vadd.f32 %v1656_v51, %v9122_v27  ;;  %v3365_v40 = vsel %vm7084_vm11, %v4990_v49, %v3364_v4  ;;  %v9126_v49 = vld [vmem:[#allocation61_spill] sm:$0xff] }
 0x1ca   : > { %v2301_v5 = vpop.f32.mrf.mxu0  ;;  %v1658_v54 = vpop.f32.mrf.mxu1  ;;  %v2703_v48 = vsel %vm6755_vm8, %v2697_v37, %v2702_v58  ;;  %v3368_v11 = vsel %vm7084_vm11, %v3366_v53, %v3367_v38 }
 0x1cb   : > { %v7886_v35 = vadd.f32 %v2301_v5, %v1657_v16  ;;  %v4954_v16 = vcombine.high %v2696_v47, %v2703_v48  ;;  %v5061_v55 = vcombine.low %v3365_v40, %v3368_v11 }
 0x1cc   : > { %v2303_v34 = vpop.f32.mrf.mxu0  ;;  %v1661_v20 = vpop.f32.mrf.mxu1  ;;  %3162 = vmatmul.mubr.bf16.gmra.mxu1 %v4949_v63  ;;  %v4951_v63 = vcombine.low %v2681_v33, %v2688_v57 }
 0x1cd   : > { %v1662_v56 = vadd.f32 %v1661_v20, %v9123_v39  ;;  %3169 = vmatprep.mubr.bf16.mxu1 %v4952_v62  ;;  %v9124_v62 = vld [vmem:[#allocation59_spill] sm:$0xff] }
 0x1ce   : > { %v2306_v36 = vpop.f32.mrf.mxu0  ;;  %3827 = vmatmul.mubr.bf16.gmra.mxu0 %v5057_v43  ;;  %v1663_v15 = vpop.f32.mrf.mxu1  ;;  %v5059_v43 = vcombine.low %v3358_v26, %v3361_v25  ;;  %v4953_v25 = vcombine.low %v2696_v47, %v2703_v48  ;;  %v9128_v47 = vld [vmem:[#allocation10_spill] sm:$0xff] }
 0x1cf   : > { %3834 = vmatprep.mubr.bf16.mxu0 %v5060_v31  ;;  %v7897_v9 = vadd.f32 %v2306_v36, %v1662_v56  ;;  %v5062_v31 = vcombine.high %v3365_v40, %v3368_v11  ;;  %v9127_v15 = vld [vmem:[#allocation62_spill] sm:$0xff] }
 0x1d0   : > { %v2308_v13 = vpop.f32.mrf.mxu0  ;;  %v1664_v51 = vpop.f32.mrf.mxu1 }
 0x1d1   : > { %v1665_v27 = vadd.f32 %v1664_v51, %v9124_v62 }
 0x1d2   : > { %v2309_v5 = vpop.f32.mrf.mxu0  ;;  %v1666_v1 = vpop.f32.mrf.mxu1 }
 0x1d3   : > { %v7900_v21 = vadd.f32 %v2309_v5, %v1665_v27  ;;  %v9129_v1 = vld [vmem:[#allocation11_spill] sm:$0xff] }
 0x1d4   : > { %v2311_v12 = vpop.f32.mrf.mxu0  ;;  %v1669_v37 = vpop.f32.mrf.mxu1  ;;  %3170 = vmatmul.mubr.bf16.gmra.mxu1 %v4951_v63 }
 0x1d5   : > { %v1670_v4 = vadd.f32 %v1669_v37, %v9125_v6  ;;  %3177 = vmatprep.mubr.bf16.mxu1 %v4954_v16 }
 0x1d6   : > { %v2314_v54 = vpop.f32.mrf.mxu0  ;;  %3835 = vmatmul.mubr.bf16.gmra.mxu0 %v5059_v43  ;;  %v1671_v34 = vpop.f32.mrf.mxu1 }
 0x1d7   : > { %3842 = vmatprep.mubr.bf16.mxu0 %v5062_v31  ;;  %v7903_v33 = vadd.f32 %v2314_v54, %v1670_v4 }
 0x1d8   : > { %v2316_v58 = vpop.f32.mrf.mxu0  ;;  %v1672_v57 = vpop.f32.mrf.mxu1 }
 0x1d9   : > { %v1673_v53 = vadd.f32 %v1672_v57, %v9126_v49  ;;  %v9130_v58 = vld [vmem:[#allocation12_spill] sm:$0xff] }
 0x1da   : > { %v2317_v26 = vpop.f32.mrf.mxu0  ;;  %v1674_v38 = vpop.f32.mrf.mxu1 }
 0x1db   : > { %v7906_v36 = vadd.f32 %v2317_v26, %v1673_v53  ;;  %v9131_v38 = vld [vmem:[#allocation16_spill] sm:$0xff] }
 0x1dc   : > { %v2319_v20 = vpop.f32.mrf.mxu0  ;;  %v1677_v39 = vpop.f32.mrf.mxu1  ;;  %3178 = vmatmul.mubr.bf16.gmra.mxu1 %v4953_v25 }
 0x1dd   : > { %v1678_v13 = vadd.f32 %v1677_v39, %v9127_v15 }
 0x1de   : > { %v2322_v56 = vpop.f32.mrf.mxu0  ;;  %3843 = vmatmul.mubr.bf16.gmra.mxu0 %v5061_v55  ;;  %v1679_v51 = vpop.f32.mrf.mxu1 }
 0x1df   : > { %v7909_v63 = vadd.f32 %v2322_v56, %v1678_v13 }
 0x1e0   : > { %v2324_v5 = vpop.f32.mrf.mxu0  ;;  %v1680_v43 = vpop.f32.mrf.mxu1 }
 0x1e1   : > { %v1681_v48 = vadd.f32 %v1680_v43, %v9128_v47  ;;  %v9132_v5 = vld [vmem:[#allocation17_spill] sm:$0xff] }
 0x1e2   : > { %v2325_v62 = vpop.f32.mrf.mxu0  ;;  %v1682_v40 = vpop.f32.mrf.mxu1 }
 0x1e3   : > { %v7912_v27 = vadd.f32 %v2325_v62, %v1681_v48 }
 0x1e4   : > { %v2327_v11 = vpop.f32.mrf.mxu0  ;;  %v1685_v16 = vpop.f32.mrf.mxu1 }
 0x1e5   : > { %v1686_v12 = vadd.f32 %v1685_v16, %v9129_v1  ;;  %v9133_v16 = vld [vmem:[#allocation18_spill] sm:$0xff] }
 0x1e6   : > { %v2330_v31 = vpop.f32.mrf.mxu0  ;;  %v1687_v37 = vpop.f32.mrf.mxu1 }
 0x1e7   : > { %v7915_v6 = vadd.f32 %v2330_v31, %v1686_v12 }
 0x1e8   : > { %v2332_v54 = vpop.f32.mrf.mxu0  ;;  %v1688_v4 = vpop.f32.mrf.mxu1 }
 0x1e9   : > { %v1689_v57 = vadd.f32 %v1688_v4, %v9130_v58 }
 0x1ea   : > { %v2333_v34 = vpop.f32.mrf.mxu0  ;;  %v1690_v26 = vpop.f32.mrf.mxu1 }
 0x1eb   : > { %v7918_v55 = vadd.f32 %v2333_v34, %v1689_v57  ;;  %v9134_v34 = vld [vmem:[#allocation24_spill] sm:$0xff] }
 0x1ec   : > { %v2335_v25 = vpop.f32.mrf.mxu0  ;;  %v1693_v49 = vpop.f32.mrf.mxu1 }
 0x1ed   : > { %v1694_v20 = vadd.f32 %v1693_v49, %v9131_v38 }
 0x1ee   : > { %v2338_v53 = vpop.f32.mrf.mxu0  ;;  %v1695_v39 = vpop.f32.mrf.mxu1 }
 0x1ef   : > { %v7921_v15 = vadd.f32 %v2338_v53, %v1694_v20 }
 0x1f0   : > { %v2340_v56 = vpop.f32.mrf.mxu0  ;;  %v1696_v13 = vpop.f32.mrf.mxu1 }
 0x1f1   : > { %v1697_v43 = vadd.f32 %v1696_v13, %v9132_v5 }
 0x1f2   : > { %v2341_v51 = vpop.f32.mrf.mxu0  ;;  %v1698_v62 = vpop.f32.mrf.mxu1 }
 0x1f3   : > { %v7924_v48 = vadd.f32 %v2341_v51, %v1697_v43 }
 0x1f4   : > { %v2343_v47 = vpop.f32.mrf.mxu0  ;;  %v1701_v40 = vpop.f32.mrf.mxu1 }
 0x1f5   : > { %v1702_v31 = vadd.f32 %v1701_v40, %v9133_v16 }
 0x1f6   : > { %v2346_v11 = vpop.f32.mrf.mxu0  ;;  %v1703_v1 = vpop.f32.mrf.mxu1 }
 0x1f7   : > { %v7927_v37 = vadd.f32 %v2346_v11, %v1702_v31 }
 0x1f8   : > { %v2348_v12 = vpop.f32.mrf.mxu0  ;;  %v1704_v54 = vpop.f32.mrf.mxu1 }
 0x1f9   : > { %v1705_v58 = vadd.f32 %v1704_v54, %v9134_v34 }
 0x1fa   : > { %v2349_v4 = vpop.f32.mrf.mxu0  ;;  %v1706_v57 = vpop.f32.mrf.mxu1 }
 0x1fb   : > { %v7930_v25 = vadd.f32 %v2349_v4, %v1705_v58 }
 0x1fc   : > { %v2351_v26 = vpop.f32.mrf.mxu0  ;;  %v1709_v49 = vpop.f32.mrf.mxu1 }
 0x1fd   : > { %v1710_v38 = vadd.f32 %v1709_v49, %v7306_v50 }
 0x1fe   : > { %v2354_v53 = vpop.f32.mrf.mxu0  ;;  %v1711_v20 = vpop.f32.mrf.mxu1 }
 0x1ff   : > { %v7933_v56 = vadd.f32 %v2354_v53, %v1710_v38 }
 0x200   : > { %v2356_v39 = vpop.f32.mrf.mxu0  ;;  %v1712_v13 = vpop.f32.mrf.mxu1 }
 0x201   : > { %v1713_v5 = vadd.f32 %v1712_v13, %v7336_v18 }
 0x202   : > { %v2357_v51 = vpop.f32.mrf.mxu0  ;;  %v1714_v43 = vpop.f32.mrf.mxu1 }
 0x203   : > { %v7936_v47 = vadd.f32 %v2357_v51, %v1713_v5 }
 0x204   : > { %v2359_v62 = vpop.f32.mrf.mxu0  ;;  %v3027_v40 = vpop.f32.mrf.mxu1 }
 0x205   : > { %v3186_v16 = vadd.f32 %v3027_v40, %v7374_v46 }
 0x206   : > { %v3692_v11 = vpop.f32.mrf.mxu0  ;;  %v3029_v31 = vpop.f32.mrf.mxu1 }
 0x207   : > { %v7939_v12 = vadd.f32 %v3692_v11, %v3186_v16 }
 0x208   : > { %v3694_v1 = vpop.f32.mrf.mxu0  ;;  %v3030_v50 = vpop.f32.mrf.mxu1 }
 0x209   : > { %v3187_v4 = vadd.f32 %v3030_v50, %v7390_v24 }
 0x20a   : > { %v3695_v54 = vpop.f32.mrf.mxu0  ;;  %v3032_v34 = vpop.f32.mrf.mxu1 }
 0x20b   : > { %v7942_v57 = vadd.f32 %v3695_v54, %v3187_v4 }
 0x20c   : > { %v3697_v58 = vpop.f32.mrf.mxu0  ;;  %v3035_v18 = vpop.f32.mrf.mxu1 }
 0x20d   : > { %v3188_v49 = vadd.f32 %v3035_v18, %v7414_v41 }
 0x20e   : > { %v3700_v26 = vpop.f32.mrf.mxu0  ;;  %v3037_v53 = vpop.f32.mrf.mxu1 }
 0x20f   : > { %v7945_v20 = vadd.f32 %v3700_v26, %v3188_v49 }
 0x210   : > { %v3702_v38 = vpop.f32.mrf.mxu0  ;;  %v3038_v46 = vpop.f32.mrf.mxu1 }
 0x211   : > { %v3189_v13 = vadd.f32 %v3038_v46, %v7434_v19  ;;  %3962 = vrot.lane.b32.xlu0 %v7945_v20, %s5439_s9 }
 0x212   : > { %v3703_v39 = vpop.f32.mrf.mxu0  ;;  %v3040_v24 = vpop.f32.mrf.mxu1 }
 0x213   : > { %v7950_v5 = vadd.f32 %v3703_v39, %v3189_v13 }
 0x214   : > { %v3705_v51 = vpop.f32.mrf.mxu0  ;;  %v3043_v43 = vpop.f32.mrf.mxu1 }
 0x215   : > { %v3190_v41 = vadd.f32 %v3043_v43, %v7450_v22  ;;  %3964 = vrot.lane.b32.xlu0 %v7950_v5, %s5439_s9 }
 0x216   : > { %v3708_v62 = vpop.f32.mrf.mxu0  ;;  %v3045_v40 = vpop.f32.mrf.mxu1 }
 0x217   : > { %v7955_v16 = vadd.f32 %v3708_v62, %v3190_v41 }
 0x218   : > { %v3710_v11 = vpop.f32.mrf.mxu0  ;;  %v3046_v19 = vpop.f32.mrf.mxu1 }
 0x219   : > { %9135 = vst [vmem:[#allocation25_spill] sm:$0xff] %v7955_v16  ;;  %v3191_v1 = vadd.f32 %v3046_v19, %v7456_v29  ;;  %4092 = vrot.lane.b32.xlu0 %v7955_v16, %s5440_s8  ;;  %3966 = vrot.lane.b32.xlu1 %v7955_v16, %s5439_s9 }
 0x21a   : > { %v3711_v31 = vpop.f32.mrf.mxu0  ;;  %v3048_v50 = vpop.f32.mrf.mxu1 }
 0x21b   : > { %v7962_v54 = vadd.f32 %v3711_v31, %v3191_v1 }
 0x21c   : > { %v3713_v22 = vpop.f32.mrf.mxu0  ;;  %v3051_v4 = vpop.f32.mrf.mxu1 }
 0x21d   : > { %9136 = vst [vmem:[#allocation28_spill] sm:$0xff] %v7962_v54  ;;  %v3192_v58 = vadd.f32 %v3051_v4, %v7476_v42  ;;  %3968 = vrot.lane.b32.xlu1 %v7962_v54, %s5439_s9 }
 0x21e   : > { %v3716_v34 = vpop.f32.mrf.mxu0  ;;  %v3053_v18 = vpop.f32.mrf.mxu1 }
 0x21f   : > { %v7967_v26 = vadd.f32 %v3716_v34, %v3192_v58 }
 0x220   : > { %v3718_v29 = vpop.f32.mrf.mxu0  ;;  %v3054_v49 = vpop.f32.mrf.mxu1 }
 0x221   : > { %v3193_v38 = vadd.f32 %v3054_v49, %v7497_v23  ;;  %4094 = vrot.lane.b32.xlu1 %v7962_v54, %s5440_s8  ;;  %3970 = vrot.lane.b32.xlu0 %v7967_v26, %s5439_s9 }
 0x222   : > { %v3719_v53 = vpop.f32.mrf.mxu0  ;;  %v3056_v46 = vpop.f32.mrf.mxu1 }
 0x223   : > { %v7974_v42 = vadd.f32 %v3719_v53, %v3193_v38 }
 0x224   : > { %v3721_v39 = vpop.f32.mrf.mxu0  ;;  %v3059_v13 = vpop.f32.mrf.mxu1 }
 0x225   : > { %4096 = vrot.lane.b32.xlu0 %v7967_v26, %s5440_s8  ;;  %3972 = vrot.lane.b32.xlu1 %v7974_v42, %s5439_s9  ;;  %v3194_v43 = vadd.f32 %v3059_v13, %v7519_v8 }
 0x226   : > { %v3724_v24 = vpop.f32.mrf.mxu0  ;;  %v3061_v51 = vpop.f32.mrf.mxu1 }
 0x227   : > { %v7985_v19 = vadd.f32 %v3724_v24, %v3194_v43 }
 0x228   : > { %v3726_v23 = vpop.f32.mrf.mxu0  ;;  %v3062_v62 = vpop.f32.mrf.mxu1 }
 0x229   : > { %4222 = vrot.lane.b32.xlu0 %v7967_v26, %s5441_s10  ;;  %4098 = vrot.lane.b32.xlu1 %v7974_v42, %s5440_s8  ;;  %v3195_v31 = vadd.f32 %v3062_v62, %v7535_v28 }
 0x22a   : > { %v3727_v41 = vpop.f32.mrf.mxu0  ;;  %v3064_v40 = vpop.f32.mrf.mxu1 }
 0x22b   : > { %v7992_v4 = vadd.f32 %v3727_v41, %v3195_v31 }
 0x22c   : > { %v3729_v11 = vpop.f32.mrf.mxu0  ;;  %v3067_v1 = vpop.f32.mrf.mxu1 }
 0x22d   : > { %4224 = vrot.lane.b32.xlu1 %v7974_v42, %s5441_s10  ;;  %3974 = vrot.lane.b32.xlu0 %v7985_v19, %s5439_s9  ;;  %v3196_v46 = vadd.f32 %v3067_v1, %v7562_v59 }
 0x22e   : > { %v3732_v50 = vpop.f32.mrf.mxu0  ;;  %v3069_v8 = vpop.f32.mrf.mxu1 }
 0x22f   : > { %v8007_v23 = vadd.f32 %v3732_v50, %v3196_v46 }
 0x230   : > { %v3734_v22 = vpop.f32.mrf.mxu0  ;;  %v3070_v34 = vpop.f32.mrf.mxu1 }
 0x231   : > { %4100 = vrot.lane.b32.xlu0 %v7985_v19, %s5440_s8  ;;  %3976 = vrot.lane.b32.xlu1 %v7992_v4, %s5439_s9  ;;  %v3197_v43 = vadd.f32 %v3070_v34, %v7586_v30 }
 0x232   : > { %v3735_v58 = vpop.f32.mrf.mxu0  ;;  %v3072_v28 = vpop.f32.mrf.mxu1 }
 0x233   : > { %v8014_v11 = vadd.f32 %v3735_v58, %v3197_v43 }
 0x234   : > { %v3737_v18 = vpop.f32.mrf.mxu0  ;;  %v3075_v29 = vpop.f32.mrf.mxu1 }
 0x235   : > { %4226 = vrot.lane.b32.xlu0 %v7985_v19, %s5441_s10  ;;  %4102 = vrot.lane.b32.xlu1 %v7992_v4, %s5440_s8  ;;  %v3198_v28 = vadd.f32 %v3075_v29, %v7619_v45 }
 0x236   : > { %v3740_v49 = vpop.f32.mrf.mxu0  ;;  %v3077_v53 = vpop.f32.mrf.mxu1 }
 0x238   : > { %v3742_v38 = vpop.f32.mrf.mxu0  ;;  %v3078_v39 = vpop.f32.mrf.mxu1 }
 0x239   : > { %4352 = vrot.lane.b32.xlu0 %v7985_v19, %s5442_s11  ;;  %4228 = vrot.lane.b32.xlu1 %v7992_v4, %s5441_s10 }
 0x23a   : > { %v3743_v13 = vpop.f32.mrf.mxu0  ;;  %v3080_v24 = vpop.f32.mrf.mxu1 }
 0x23b   : > { %v8035_v24 = vadd.f32 %v3740_v49, %v3198_v28 }
 0x23c   : > { %v3745_v51 = vpop.f32.mrf.mxu0  ;;  %v3083_v62 = vpop.f32.mrf.mxu1 }
 0x23d   : > { %4354 = vrot.lane.b32.xlu1 %v7992_v4, %s5442_s11  ;;  %3978 = vrot.lane.b32.xlu0 %v8007_v23, %s5439_s9  ;;  %v3199_v51 = vadd.f32 %v3078_v39, %v7632_v3 }
 0x23e   : > { %v3748_v41 = vpop.f32.mrf.mxu0  ;;  %v3085_v59 = vpop.f32.mrf.mxu1 }
 0x240   : > { %v3750_v40 = vpop.f32.mrf.mxu0  ;;  %v3086_v31 = vpop.f32.mrf.mxu1 }
 0x241   : > { %4104 = vrot.lane.b32.xlu0 %v8007_v23, %s5440_s8  ;;  %3980 = vrot.lane.b32.xlu1 %v8014_v11, %s5439_s9  ;;  %v8046_v40 = vadd.f32 %v3743_v13, %v3199_v51 }
 0x242   : > { %v3751_v1 = vpop.f32.mrf.mxu0  ;;  %v3088_v30 = vpop.f32.mrf.mxu1 }
 0x244   : > { %v3753_v50 = vpop.f32.mrf.mxu0  ;;  %v8020_v8 = vpop.f32.mrf.mxu1 }
 0x245   : > { %4230 = vrot.lane.b32.xlu0 %v8007_v23, %s5441_s10  ;;  %4106 = vrot.lane.b32.xlu1 %v8014_v11, %s5440_s8 }
 0x246   : > { %v8022_v22 = vpop.f32.mrf.mxu0  ;;  %v3093_v34 = vpop.f32.mrf.mxu1 }
 0x248   : > { %v3758_v58 = vpop.f32.mrf.mxu0  ;;  %v3094_v18 = vpop.f32.mrf.mxu1 }
 0x249   : > { %4356 = vrot.lane.b32.xlu0 %v8007_v23, %s5442_s11  ;;  %4232 = vrot.lane.b32.xlu1 %v8014_v11, %s5441_s10 }
 0x24a   : > { %v8029_v53 = vpop.f32.mrf.mxu0  ;;  %v3096_v38 = vpop.f32.mrf.mxu1 }
 0x24b   : > { %v3200_v38 = vadd.f32 %v3083_v62, %v7662_v44 }
 0x24c   : > { %v3761_v46 = vpop.f32.mrf.mxu0  ;;  %v8038_v43 = vpop.f32.mrf.mxu1 }
 0x24d   : > { %4358 = vrot.lane.b32.xlu1 %v8014_v11, %s5442_s11  ;;  %3982 = vrot.lane.b32.xlu0 %v8035_v24, %s5439_s9 }
 0x24e   : > { %v8040_v59 = vpop.f32.mrf.mxu0  ;;  %v3101_v45 = vpop.f32.mrf.mxu1 }
 0x250   : > { %v3766_v29 = vpop.f32.mrf.mxu0  ;;  %v8048_v30 = vpop.f32.mrf.mxu1 }
 0x251   : > { %4108 = vrot.lane.b32.xlu0 %v8035_v24, %s5440_s8  ;;  %3984 = vrot.lane.b32.xlu1 %v8046_v40, %s5439_s9 }
 0x252   : > { %v8050_v49 = vpop.f32.mrf.mxu0  ;;  %v3104_v3 = vpop.f32.mrf.mxu1 }
 0x253   : > { %v8072_v3 = vadd.f32 %v3748_v41, %v3200_v38 }
 0x254   : > { %v3769_v39 = vpop.f32.mrf.mxu0  ;;  %v3107_v50 = vpop.f32.mrf.mxu1 }
 0x255   : > { %v3206_v58 = vadd.f32 %v3107_v50, %v7800_v17  ;;  %4234 = vrot.lane.b32.xlu0 %v8035_v24, %s5441_s10  ;;  %4110 = vrot.lane.b32.xlu1 %v8046_v40, %s5440_s8  ;;  %v3201_v39 = vadd.f32 %v3086_v31, %v7683_v2 }
 0x256   : > { %v3772_v34 = vpop.f32.mrf.mxu0  ;;  %v3109_v13 = vpop.f32.mrf.mxu1 }
 0x257   : > { %v8062_v46 = vadd.f32 %v3772_v34, %v3206_v58  ;;  %v8080_v13 = vadd.f32 %v3751_v1, %v3201_v39  ;;  %v3203_v39 = vadd.f32 %v3094_v18, %v7726_v52 }
 0x258   : > { %v3774_v28 = vpop.f32.mrf.mxu0  ;;  %v8064_v51 = vpop.f32.mrf.mxu1 }
 0x259   : > { %9137 = vst [vmem:[#allocation29_spill] sm:$0xff] %v8062_v46  ;;  %4360 = vrot.lane.b32.xlu0 %v8035_v24, %s5442_s11  ;;  %4236 = vrot.lane.b32.xlu1 %v8046_v40, %s5441_s10 }
 0x25a   : > { %v8066_v45 = vpop.f32.mrf.mxu0  ;;  %v3112_v17 = vpop.f32.mrf.mxu1 }
 0x25c   : > { %v3777_v29 = vpop.f32.mrf.mxu0  ;;  %v3115_v50 = vpop.f32.mrf.mxu1 }
 0x25d   : > { %v3208_v62 = vadd.f32 %v3115_v50, %v7846_v32  ;;  %4362 = vrot.lane.b32.xlu1 %v8046_v40, %s5442_s11  ;;  %3986 = vrot.lane.b32.xlu0 %v8072_v3, %s5439_s9 }
 0x25e   : > { %v3780_v44 = vpop.f32.mrf.mxu0  ;;  %v3117_v34 = vpop.f32.mrf.mxu1 }
 0x25f   : > { %v8082_v28 = vadd.f32 %v3780_v44, %v3208_v62 }
 0x260   : > { %v3782_v58 = vpop.f32.mrf.mxu0  ;;  %v8084_v41 = vpop.f32.mrf.mxu1 }
 0x261   : > { %9138 = vst [vmem:[#allocation36_spill] sm:$0xff] %v8082_v28  ;;  %4112 = vrot.lane.b32.xlu0 %v8072_v3, %s5440_s8  ;;  %3988 = vrot.lane.b32.xlu1 %v8080_v13, %s5439_s9  ;;  %v3202_v58 = vadd.f32 %v8020_v8, %v7707_v7 }
 0x262   : > { %v8086_v38 = vpop.f32.mrf.mxu0  ;;  %v3120_v2 = vpop.f32.mrf.mxu1 }
 0x263   : > { %v8112_v2 = vadd.f32 %v8029_v53, %v3203_v39  ;;  %v3205_v39 = vadd.f32 %v8048_v30, %v7775_v14 }
 0x264   : > { %v3785_v32 = vpop.f32.mrf.mxu0  ;;  %v8092_v31 = vpop.f32.mrf.mxu1 }
 0x265   : > { %4238 = vrot.lane.b32.xlu0 %v8072_v3, %s5441_s10  ;;  %4114 = vrot.lane.b32.xlu1 %v8080_v13, %s5440_s8  ;;  %v8141_v54 = vadd.f32 %v8050_v49, %v3205_v39 }
 0x266   : > { %v8094_v17 = vpop.f32.mrf.mxu0  ;;  %v3125_v1 = vpop.f32.mrf.mxu1 }
 0x268   : > { %v3790_v29 = vpop.f32.mrf.mxu0  ;;  %v8101_v50 = vpop.f32.mrf.mxu1 }
 0x269   : > { %4364 = vrot.lane.b32.xlu0 %v8072_v3, %s5442_s11  ;;  %4240 = vrot.lane.b32.xlu1 %v8080_v13, %s5441_s10  ;;  %v8123_v29 = vadd.f32 %v8022_v22, %v3202_v58 }
 0x26a   : > { %v8103_v44 = vpop.f32.mrf.mxu0  ;;  %v3128_v62 = vpop.f32.mrf.mxu1 }
 0x26c   : > { %v3793_v34 = vpop.f32.mrf.mxu0  ;;  %v8114_v32 = vpop.f32.mrf.mxu1 }
 0x26d   : > { %4366 = vrot.lane.b32.xlu0 %v8080_v13, %s5442_s11  ;;  %3992 = vrot.lane.b32.xlu1 %v8112_v2, %s5439_s9 }
 0x26e   : > { %v8116_v52 = vpop.f32.mrf.mxu0  ;;  %v3133_v18 = vpop.f32.mrf.mxu1 }
 0x270   : > { %v3798_v1 = vpop.f32.mrf.mxu0  ;;  %v8125_v62 = vpop.f32.mrf.mxu1 }
 0x271   : > { %3990 = vrot.lane.b32.xlu0 %v8123_v29, %s5439_s9  ;;  %4118 = vrot.lane.b32.xlu1 %v8112_v2, %s5440_s8 }
 0x272   : > { %v8127_v7 = vpop.f32.mrf.mxu0  ;;  %v3136_v8 = vpop.f32.mrf.mxu1 }
 0x274   : > { %v3801_v53 = vpop.f32.mrf.mxu0  ;;  %v3139_v34 = vpop.f32.mrf.mxu1 }
 0x275   : > { %v3214_v22 = vadd.f32 %v3139_v34, %v7903_v33  ;;  %4116 = vrot.lane.b32.xlu0 %v8123_v29, %s5440_s8  ;;  %4244 = vrot.lane.b32.xlu1 %v8112_v2, %s5441_s10 }
 0x276   : > { %v3804_v18 = vpop.f32.mrf.mxu0  ;;  %v3141_v58 = vpop.f32.mrf.mxu1 }
 0x277   : > { %v8143_v8 = vadd.f32 %v3804_v18, %v3214_v22  ;;  %v3204_v18 = vadd.f32 %v8038_v43, %v7760_v10  ;;  %v3207_v22 = vadd.f32 %v8064_v51, %v7824_v61 }
 0x278   : > { %v3806_v1 = vpop.f32.mrf.mxu0  ;;  %v3142_v53 = vpop.f32.mrf.mxu1 }
 0x279   : > { %v3215_v14 = vadd.f32 %v3142_v53, %v7906_v36  ;;  %4242 = vrot.lane.b32.xlu0 %v8123_v29, %s5441_s10  ;;  %3996 = vrot.lane.b32.xlu1 %v8141_v54, %s5439_s9  ;;  %v8172_v10 = vadd.f32 %v8066_v45, %v3207_v22 }
 0x27a   : > { %v3807_v16 = vpop.f32.mrf.mxu0  ;;  %v3144_v33 = vpop.f32.mrf.mxu1 }
 0x27b   : > { %v8150_v34 = vadd.f32 %v3807_v16, %v3215_v14  ;;  %9142 = vst [vmem:[#allocation44_spill] sm:$0xff] %v8172_v10 }
 0x27c   : > { %v3809_v30 = vpop.f32.mrf.mxu0  ;;  %v3147_v58 = vpop.f32.mrf.mxu1 }
 0x27d   : > { %9139 = vst [vmem:[#allocation37_spill] sm:$0xff] %v8150_v34  ;;  %v3216_v49 = vadd.f32 %v3147_v58, %v7909_v63  ;;  %4368 = vrot.lane.b32.xlu0 %v8123_v29, %s5442_s11  ;;  %4122 = vrot.lane.b32.xlu1 %v8141_v54, %s5440_s8  ;;  %v8169_v58 = vadd.f32 %v8040_v59, %v3204_v18 }
 0x27e   : > { %v3812_v1 = vpop.f32.mrf.mxu0  ;;  %v3149_v36 = vpop.f32.mrf.mxu1 }
 0x27f   : > { %v8161_v16 = vadd.f32 %v3812_v1, %v3216_v49  ;;  %9141 = vst [vmem:[#allocation43_spill] sm:$0xff] %v8169_v58 }
 0x280   : > { %v3814_v39 = vpop.f32.mrf.mxu0  ;;  %v3150_v53 = vpop.f32.mrf.mxu1 }
 0x281   : > { %9140 = vst [vmem:[#allocation41_spill] sm:$0xff] %v8161_v16  ;;  %v3217_v63 = vadd.f32 %v3150_v53, %v7912_v27  ;;  %4370 = vrot.lane.b32.xlu0 %v8112_v2, %s5442_s11  ;;  %4248 = vrot.lane.b32.xlu1 %v8141_v54, %s5441_s10 }
 0x282   : > { %v3815_v14 = vpop.f32.mrf.mxu0  ;;  %v3152_v33 = vpop.f32.mrf.mxu1 }
 0x283   : > { %v8174_v61 = vadd.f32 %v3815_v14, %v3217_v63  ;;  %v8176_v43 = vpop.permute.xlu0 %3962  ;;  %v3209_v14 = vadd.f32 %v8084_v41, %v7864_v60 }
 0x284   : > { %v3817_v30 = vpop.f32.mrf.mxu0  ;;  %v3155_v51 = vpop.f32.mrf.mxu1 }
 0x285   : > { %9143 = vst [vmem:[#allocation49_spill] sm:$0xff] %v8174_v61  ;;  %v3218_v1 = vadd.f32 %v3155_v51, %v7915_v6  ;;  %3994 = vrot.lane.b32.xlu0 %v8169_v58, %s5439_s9  ;;  %4000 = vrot.lane.b32.xlu1 %v8172_v10, %s5439_s9 }
 0x286   : > { %v3820_v27 = vpop.f32.mrf.mxu0  ;;  %v3157_v49 = vpop.f32.mrf.mxu1 }
 0x287   : > { %v8183_v36 = vadd.f32 %v3820_v27, %v3218_v1  ;;  %v8185_v18 = vpop.permute.xlu0 %3964  ;;  %v8204_v49 = vadd.f32 %v8086_v38, %v3209_v14 }
 0x288   : > { %v3822_v59 = vpop.f32.mrf.mxu0  ;;  %v3158_v45 = vpop.f32.mrf.mxu1 }
 0x289   : > { %v3219_v22 = vadd.f32 %v3158_v45, %v7918_v55  ;;  %4120 = vrot.lane.b32.xlu0 %v8169_v58, %s5440_s8  ;;  %4126 = vrot.lane.b32.xlu1 %v8172_v10, %s5440_s8  ;;  %9144 = vst [vmem:[#allocation47_spill] sm:$0xff] %v8204_v49 }
 0x28a   : > { %v3823_v39 = vpop.f32.mrf.mxu0  ;;  %v3160_v6 = vpop.f32.mrf.mxu1 }
 0x28b   : > { %v8194_v63 = vadd.f32 %v3823_v39, %v3219_v22  ;;  %v8196_v33 = vpop.permute.xlu1 %3966  ;;  %v8206_v60 = vpop.permute.xlu0 %4092 }
 0x28c   : > { %v3825_v53 = vpop.f32.mrf.mxu0  ;;  %v3163_v30 = vpop.f32.mrf.mxu1 }
 0x28d   : > { %v3220_v27 = vadd.f32 %v3163_v30, %v7921_v15  ;;  %4246 = vrot.lane.b32.xlu0 %v8169_v58, %s5441_s10  ;;  %4252 = vrot.lane.b32.xlu1 %v8172_v10, %s5441_s10 }
 0x28e   : > { %v3828_v51 = vpop.f32.mrf.mxu0  ;;  %v3165_v55 = vpop.f32.mrf.mxu1 }
 0x28f   : > { %v8208_v41 = vadd.f32 %v3828_v51, %v3220_v27  ;;  %v8210_v59 = vpop.permute.xlu1 %3968 }
 0x290   : > { %v3830_v1 = vpop.f32.mrf.mxu0  ;;  %v3166_v45 = vpop.f32.mrf.mxu1 }
 0x291   : > { %v3221_v15 = vadd.f32 %v3166_v45, %v7924_v48  ;;  %4372 = vrot.lane.b32.xlu0 %v8169_v58, %s5442_s11  ;;  %4004 = vrot.lane.b32.xlu1 %v8204_v49, %s5439_s9  ;;  %v3210_v1 = vadd.f32 %v8092_v31, %v7878_v0  ;;  %v3211_v31 = vadd.f32 %v8101_v50, %v7886_v35 }
 0x292   : > { %v3831_v39 = vpop.f32.mrf.mxu0  ;;  %v3168_v22 = vpop.f32.mrf.mxu1 }
 0x293   : > { %v8217_v38 = vadd.f32 %v3831_v39, %v3221_v15  ;;  %v8219_v53 = vpop.permute.xlu1 %4094  ;;  %v8221_v14 = vpop.permute.xlu0 %3970  ;;  %v8242_v0 = vadd.f32 %v8094_v17, %v3210_v1  ;;  %v8258_v35 = vadd.f32 %v8103_v44, %v3211_v31 }
 0x294   : > { %v3833_v6 = vpop.f32.mrf.mxu0  ;;  %9145 = vst [vmem:[#allocation5_spill] sm:$0xff] %v8221_v14  ;;  %v3171_v30 = vpop.f32.mrf.mxu1 }
 0x295   : > { %v3222_v27 = vadd.f32 %v3171_v30, %v7927_v37  ;;  %4374 = vrot.lane.b32.xlu0 %v8141_v54, %s5442_s11  ;;  %4130 = vrot.lane.b32.xlu1 %v8204_v49, %s5440_s8 }
 0x296   : > { %v3836_v51 = vpop.f32.mrf.mxu0  ;;  %v3173_v48 = vpop.f32.mrf.mxu1 }
 0x297   : > { %v8230_v45 = vadd.f32 %v3836_v51, %v3222_v27  ;;  %v8232_v39 = vpop.permute.xlu0 %4096  ;;  %v8234_v15 = vpop.permute.xlu1 %3972 }
 0x298   : > { %v3838_v55 = vpop.f32.mrf.mxu0  ;;  %9146 = vst [vmem:[#allocation6_spill] sm:$0xff] %v8234_v15  ;;  %v3174_v22 = vpop.f32.mrf.mxu1 }
 0x299   : > { %v3223_v37 = vadd.f32 %v3174_v22, %v7930_v25  ;;  %3998 = vrot.lane.b32.xlu0 %v8062_v46, %s5439_s9  ;;  %4256 = vrot.lane.b32.xlu1 %v8204_v49, %s5441_s10 }
 0x29a   : > { %v3839_v6 = vpop.f32.mrf.mxu0  ;;  %v3176_v30 = vpop.f32.mrf.mxu1 }
 0x29b   : > { %v8246_v51 = vadd.f32 %v3839_v6, %v3223_v37  ;;  %v8248_v27 = vpop.permute.xlu0 %4222  ;;  %v8250_v55 = vpop.permute.xlu1 %4098 }
 0x29c   : > { %v3841_v48 = vpop.f32.mrf.mxu0  ;;  %9147 = vst [vmem:[#allocation7_spill] sm:$0xff] %v8250_v55  ;;  %v3179_v25 = vpop.f32.mrf.mxu1 }
 0x29d   : > { %v3224_v15 = vadd.f32 %v3179_v25, %v7933_v56  ;;  %4124 = vrot.lane.b32.xlu0 %v8062_v46, %s5440_s8  ;;  %4384 = vrot.lane.b32.xlu1 %v8242_v0, %s5442_s11 }
 0x29e   : > { %v3844_v22 = vpop.f32.mrf.mxu0  ;;  %v3181_v17 = vpop.f32.mrf.mxu1 }
 0x29f   : > { %v8260_v50 = vadd.f32 %v3844_v22, %v3224_v15  ;;  %v8262_v6 = vpop.permute.xlu1 %4224  ;;  %v3975_v37 = vpop.permute.xlu0 %3974 }
 0x2a0   : > { %v3846_v1 = vpop.f32.mrf.mxu0  ;;  %v3182_v30 = vpop.f32.mrf.mxu1 }
 0x2a1   : > { %v3225_v56 = vadd.f32 %v3182_v30, %v7936_v47  ;;  %4250 = vrot.lane.b32.xlu0 %v8062_v46, %s5441_s10  ;;  %4008 = vrot.lane.b32.xlu1 %v8258_v35, %s5439_s9  ;;  %v3212_v47 = vadd.f32 %v8114_v32, %v7897_v9 }
 0x2a2   : > { %v3847_v48 = vpop.f32.mrf.mxu0  ;;  %v3184_v25 = vpop.f32.mrf.mxu1 }
 0x2a3   : > { %v8269_v1 = vadd.f32 %v3847_v48, %v3225_v56  ;;  %v8271_v44 = vpop.permute.xlu0 %4100  ;;  %v3977_v15 = vpop.permute.xlu1 %3976  ;;  %v8288_v30 = vadd.f32 %v8116_v52, %v3212_v47  ;;  %v3213_v48 = vadd.f32 %v8125_v62, %v7900_v21 }
 0x2a4   : > { %v3849_v17 = vpop.f32.mrf.mxu0  ;;  %9148 = vst [vmem:[#allocation8_spill] sm:$0xff] %v8271_v44 }
 0x2a5   : > { %4376 = vrot.lane.b32.xlu0 %v8062_v46, %s5442_s11  ;;  %4134 = vrot.lane.b32.xlu1 %v8258_v35, %s5440_s8  ;;  %v8301_v9 = vadd.f32 %v8127_v7, %v3213_v48 }
 0x2a7   : > { %v8279_v31 = vpop.permute.xlu0 %4226  ;;  %v8281_v22 = vpop.permute.xlu1 %4102 }
 0x2a8   : > { %9149 = vst [vmem:[#allocation9_spill] sm:$0xff] %v8281_v22 }
 0x2a9   : > { %4378 = vrot.lane.b32.xlu0 %v8172_v10, %s5442_s11  ;;  %4260 = vrot.lane.b32.xlu1 %v8258_v35, %s5441_s10  ;;  %v8330_v10 = vld [vmem:[%s8680_s2] ss:$0 sm:$0xff] }
 0x2aa   : > { %v3906_v22 = vadd.f32 %v8330_v10, %v7985_v19  ;;  %v3905_v19 = vadd.f32 %v8330_v10, %v7974_v42  ;;  %v3910_v42 = vadd.f32 %v8330_v10, %v8035_v24  ;;  %v3909_v24 = vadd.f32 %v8330_v10, %v8014_v11 }
 0x2ab   : > { %v8292_v56 = vpop.permute.xlu0 %4352  ;;  %v8294_v25 = vpop.permute.xlu1 %4228 }
 0x2ac   : > { %9150 = vst [vmem:[#allocation13_spill] sm:$0xff] %v8294_v25 }
 0x2ad   : > { %4002 = vrot.lane.b32.xlu0 %v8082_v28, %s5439_s9  ;;  %4388 = vrot.lane.b32.xlu1 %v8288_v30, %s5442_s11 }
 0x2af   : > { %v8303_v32 = vpop.permute.xlu1 %4354  ;;  %v3979_v52 = vpop.permute.xlu0 %3978 }
 0x2b1   : > { %4128 = vrot.lane.b32.xlu0 %v8082_v28, %s5440_s8  ;;  %4012 = vrot.lane.b32.xlu1 %v8301_v9, %s5439_s9 }
 0x2b3   : > { %v4105_v21 = vpop.permute.xlu0 %4104  ;;  %v3981_v62 = vpop.permute.xlu1 %3980 }
 0x2b5   : > { %4254 = vrot.lane.b32.xlu0 %v8082_v28, %s5441_s10  ;;  %4138 = vrot.lane.b32.xlu1 %v8301_v9, %s5440_s8 }
 0x2b7   : > { %v8313_v17 = vpop.permute.xlu0 %4230  ;;  %v4107_v7 = vpop.permute.xlu1 %4106 }
 0x2b8   : > { %9151 = vst [vmem:[#allocation50_spill] sm:$0xff] %v8313_v17 }
 0x2b9   : > { %4380 = vrot.lane.b32.xlu0 %v8082_v28, %s5442_s11  ;;  %4264 = vrot.lane.b32.xlu1 %v8301_v9, %s5441_s10 }
 0x2bb   : > { %v8319_v47 = vpop.permute.xlu0 %4356  ;;  %v8321_v48 = vpop.permute.xlu1 %4232 }
 0x2bc   : > { %9152 = vst [vmem:[#allocation51_spill] sm:$0xff] %v8319_v47  ;;  %9153 = vst [vmem:[#allocation14_spill] sm:$0xff] %v8321_v48  ;;  %v4066_v48 = vadd.f32 %v3979_v52, %v3906_v22  ;;  %v4065_v52 = vadd.f32 %v3977_v15, %v3905_v19 }
 0x2bd   : > { %4382 = vrot.lane.b32.xlu0 %v8204_v49, %s5442_s11  ;;  %4392 = vrot.lane.b32.xlu1 %v8143_v8, %s5442_s11  ;;  %v3904_v49 = vadd.f32 %v8330_v10, %v7967_v26 }
 0x2bf   : > { %v8332_v46 = vpop.permute.xlu1 %4358  ;;  %v3983_v28 = vpop.permute.xlu0 %3982  ;;  %v4064_v44 = vadd.f32 %v3975_v37, %v3904_v49 }
 0x2c0   : > { %9154 = vst [vmem:[#allocation15_spill] sm:$0xff] %v8332_v46  ;;  %v3907_v46 = vadd.f32 %v8330_v10, %v7992_v4  ;;  %v4195_v4 = vadd.f32 %v4107_v7, %v4065_v52 }
 0x2c1   : > { %4006 = vrot.lane.b32.xlu0 %v8242_v0, %s5439_s9  ;;  %4016 = vrot.lane.b32.xlu1 %v8150_v34, %s5439_s9  ;;  %v4194_v14 = vadd.f32 %v4105_v21, %v4064_v44  ;;  %v3908_v44 = vadd.f32 %v8330_v10, %v8007_v23 }
 0x2c2   : > { %v4067_v47 = vadd.f32 %v3981_v62, %v3907_v46  ;;  %v3911_v62 = vadd.f32 %v8330_v10, %v8046_v40 }
 0x2c3   : > { %v4109_v17 = vpop.permute.xlu0 %4108  ;;  %v3985_v58 = vpop.permute.xlu1 %3984  ;;  %v4068_v21 = vadd.f32 %v3983_v28, %v3908_v44 }
 0x2c4   : > { %v4196_v25 = vadd.f32 %v4109_v17, %v4066_v48  ;;  %v4069_v23 = vadd.f32 %v3985_v58, %v3909_v24  ;;  %v3913_v58 = vadd.f32 %v8330_v10, %v8080_v13 }
 0x2c5   : > { %4132 = vrot.lane.b32.xlu0 %v8242_v0, %s5440_s8  ;;  %4142 = vrot.lane.b32.xlu1 %v8150_v34, %s5440_s8 }
 0x2c7   : > { %v4235_v26 = vpop.permute.xlu0 %4234  ;;  %v4111_v22 = vpop.permute.xlu1 %4110 }
 0x2c8   : > { %v4324_v55 = vadd.f32 %v4235_v26, %v4194_v14  ;;  %v4197_v49 = vadd.f32 %v4111_v22, %v4067_v47 }
 0x2c9   : > { %4258 = vrot.lane.b32.xlu0 %v8242_v0, %s5441_s10  ;;  %4268 = vrot.lane.b32.xlu1 %v8150_v34, %s5441_s10 }
 0x2cb   : > { %v8354_v37 = vpop.permute.xlu0 %4360  ;;  %v4237_v17 = vpop.permute.xlu1 %4236 }
 0x2cc   : > { %v4325_v48 = vadd.f32 %v4237_v17, %v4195_v4 }
 0x2cd   : > { %4386 = vrot.lane.b32.xlu0 %v8258_v35, %s5442_s11  ;;  %4396 = vrot.lane.b32.xlu1 %v8161_v16, %s5442_s11 }
 0x2cf   : > { %v8362_v46 = vpop.permute.xlu1 %4362  ;;  %v3987_v14 = vpop.permute.xlu0 %3986 }
 0x2d0   : > { %v4070_v15 = vadd.f32 %v3987_v14, %v3910_v42 }
 0x2d1   : > { %4010 = vrot.lane.b32.xlu0 %v8288_v30, %s5439_s9  ;;  %4020 = vrot.lane.b32.xlu1 %v8174_v61, %s5439_s9 }
 0x2d3   : > { %v4113_v7 = vpop.permute.xlu0 %4112  ;;  %v3989_v47 = vpop.permute.xlu1 %3988 }
 0x2d4   : > { %v4198_v19 = vadd.f32 %v4113_v7, %v4068_v21  ;;  %v4071_v26 = vadd.f32 %v3989_v47, %v3911_v62 }
 0x2d5   : > { %4136 = vrot.lane.b32.xlu0 %v8288_v30, %s5440_s8  ;;  %4146 = vrot.lane.b32.xlu1 %v8174_v61, %s5440_s8 }
 0x2d7   : > { %v4239_v22 = vpop.permute.xlu0 %4238  ;;  %v4115_v52 = vpop.permute.xlu1 %4114 }
 0x2d8   : > { %v4326_v28 = vadd.f32 %v4239_v22, %v4196_v25  ;;  %v4199_v4 = vadd.f32 %v4115_v52, %v4069_v23 }
 0x2d9   : > { %4262 = vrot.lane.b32.xlu0 %v8288_v30, %s5441_s10  ;;  %4272 = vrot.lane.b32.xlu1 %v8174_v61, %s5441_s10 }
 0x2db   : > { %v4365_v11 = vpop.permute.xlu0 %4364  ;;  %v4241_v40 = vpop.permute.xlu1 %4240 }
 0x2dc   : > { %v8382_v17 = vadd.f32 %v4365_v11, %v4324_v55  ;;  %v4327_v42 = vadd.f32 %v4241_v40, %v4197_v49  ;;  %v3912_v55 = vadd.f32 %v8330_v10, %v8072_v3  ;;  %v3915_v3 = vadd.f32 %v8330_v10, %v8112_v2 }
 0x2dd   : > { %4390 = vrot.lane.b32.xlu0 %v8301_v9, %s5442_s11  ;;  %4398 = vrot.lane.b32.xlu1 %v8174_v61, %s5442_s11 }
 0x2df   : > { %v4367_v25 = vpop.permute.xlu0 %4366  ;;  %v3993_v14 = vpop.permute.xlu1 %3992 }
 0x2e0   : > { %v8390_v44 = vadd.f32 %v4367_v25, %v4325_v48  ;;  %v4073_v21 = vadd.f32 %v3993_v14, %v3913_v58 }
 0x2e1   : > { %4014 = vrot.lane.b32.xlu0 %v8143_v8, %s5439_s9  ;;  %4400 = vrot.lane.b32.xlu1 %v8183_v36, %s5442_s11 }
 0x2e3   : > { %v3991_v49 = vpop.permute.xlu0 %3990  ;;  %v4119_v62 = vpop.permute.xlu1 %4118 }
 0x2e4   : > { %v4072_v7 = vadd.f32 %v3991_v49, %v3912_v55  ;;  %v4201_v47 = vadd.f32 %v4119_v62, %v4071_v26 }
 0x2e5   : > { %4140 = vrot.lane.b32.xlu0 %v8143_v8, %s5440_s8  ;;  %4024 = vrot.lane.b32.xlu1 %v8194_v63, %s5439_s9 }
 0x2e7   : > { %v4117_v13 = vpop.permute.xlu0 %4116  ;;  %v4245_v48 = vpop.permute.xlu1 %4244 }
 0x2e8   : > { %v4200_v24 = vadd.f32 %v4117_v13, %v4070_v15  ;;  %v4329_v23 = vadd.f32 %v4245_v48, %v4199_v4 }
 0x2e9   : > { %4266 = vrot.lane.b32.xlu0 %v8143_v8, %s5441_s10  ;;  %4150 = vrot.lane.b32.xlu1 %v8194_v63, %s5440_s8 }
 0x2eb   : > { %v4243_v26 = vpop.permute.xlu0 %4242  ;;  %v3997_v22 = vpop.permute.xlu1 %3996 }
 0x2ec   : > { %v4328_v52 = vadd.f32 %v4243_v26, %v4198_v19  ;;  %v8408_v11 = vadd.f32 %v3997_v22, %v3915_v3 }
 0x2ed   : > { %4394 = vrot.lane.b32.xlu0 %v8150_v34, %s5442_s11  ;;  %4276 = vrot.lane.b32.xlu1 %v8194_v63, %s5441_s10 }
 0x2ef   : > { %v4369_v15 = vpop.permute.xlu0 %4368  ;;  %v4123_v4 = vpop.permute.xlu1 %4122 }
 0x2f0   : > { %v8414_v40 = vadd.f32 %v4369_v15, %v4326_v28  ;;  %v4203_v58 = vadd.f32 %v4123_v4, %v4073_v21  ;;  %v3917_v28 = vadd.f32 %v8330_v10, %v8141_v54 }
 0x2f1   : > { %4018 = vrot.lane.b32.xlu0 %v8161_v16, %s5439_s9  ;;  %4402 = vrot.lane.b32.xlu1 %v8194_v63, %s5442_s11 }
 0x2f3   : > { %v4371_v2 = vpop.permute.xlu0 %4370  ;;  %v4249_v19 = vpop.permute.xlu1 %4248 }
 0x2f4   : > { %v8420_v25 = vadd.f32 %v4371_v2, %v4327_v42  ;;  %v4331_v14 = vadd.f32 %v4249_v19, %v4201_v47 }
 0x2f5   : > { %4144 = vrot.lane.b32.xlu0 %v8161_v16, %s5440_s8  ;;  %4404 = vrot.lane.b32.xlu1 %v8208_v41, %s5442_s11 }
 0x2f7   : > { %v8428_v21 = vpop.permute.xlu0 %3994  ;;  %v4001_v55 = vpop.permute.xlu1 %4000 }
 0x2f8   : > { %v8430_v49 = vadd.f32 %v4001_v55, %v3917_v28 }
 0x2f9   : > { %4270 = vrot.lane.b32.xlu0 %v8161_v16, %s5441_s10  ;;  %4154 = vrot.lane.b32.xlu1 %v8217_v38, %s5440_s8 }
 0x2fb   : > { %v4121_v63 = vpop.permute.xlu0 %4120  ;;  %v8436_v42 = vpop.permute.xlu1 %4126 }
 0x2fc   : > { %v4202_v62 = vadd.f32 %v4121_v63, %v4072_v7 }
 0x2fd   : > { %4022 = vrot.lane.b32.xlu0 %v8183_v36, %s5439_s9  ;;  %4280 = vrot.lane.b32.xlu1 %v8217_v38, %s5441_s10 }
 0x2ff   : > { %v4247_v54 = vpop.permute.xlu0 %4246  ;;  %v4253_v47 = vpop.permute.xlu1 %4252 }
 0x300   : > { %v4330_v13 = vadd.f32 %v4247_v54, %v4200_v24  ;;  %v8442_v48 = vadd.f32 %v4253_v47, %v4203_v58 }
 0x301   : > { %4148 = vrot.lane.b32.xlu0 %v8183_v36, %s5440_s8  ;;  %4406 = vrot.lane.b32.xlu1 %v8217_v38, %s5442_s11 }
 0x303   : > { %v4373_v3 = vpop.permute.xlu0 %4372  ;;  %v8448_v26 = vpop.permute.xlu1 %4004 }
 0x304   : > { %v8450_v7 = vadd.f32 %v4373_v3, %v4328_v52 }
 0x305   : > { %4274 = vrot.lane.b32.xlu0 %v8183_v36, %s5441_s10  ;;  %4408 = vrot.lane.b32.xlu1 %v8230_v45, %s5442_s11 }
 0x307   : > { %v4375_v24 = vpop.permute.xlu0 %4374  ;;  %v8456_v22 = vpop.permute.xlu1 %4130 }
 0x308   : > { %v8458_v15 = vadd.f32 %v4375_v24, %v4329_v23  ;;  %v3899_v24 = vadd.f32 %v8330_v10, %v7942_v57 }
 0x309   : > { %4152 = vrot.lane.b32.xlu0 %v8208_v41, %s5440_s8  ;;  %4284 = vrot.lane.b32.xlu1 %v8246_v51, %s5441_s10 }
 0x30b   : > { %v8464_v38 = vpop.permute.xlu0 %3998  ;;  %v8466_v52 = vpop.permute.xlu1 %4256 }
 0x30d   : > { %4278 = vrot.lane.b32.xlu0 %v8208_v41, %s5441_s10  ;;  %4410 = vrot.lane.b32.xlu1 %v8246_v51, %s5442_s11 }
 0x30f   : > { %v4125_v36 = vpop.permute.xlu0 %4124  ;;  %v8472_v4 = vpop.permute.xlu1 %4384 }
 0x311   : > { %4282 = vrot.lane.b32.xlu0 %v8230_v45, %s5441_s10  ;;  %4412 = vrot.lane.b32.xlu1 %v8260_v50, %s5442_s11 }
 0x313   : > { %v4251_v23 = vpop.permute.xlu0 %4250  ;;  %v8478_v58 = vpop.permute.xlu1 %4008 }
 0x314   : > { %v8480_v2 = vadd.f32 %v4251_v23, %v4202_v62  ;;  %v4059_v23 = vadd.f32 %v8185_v18, %v3899_v24 }
 0x315   : > { %4414 = vrot.lane.b32.xlu1 %v8269_v1, %s5442_s11  ;;  %v3898_v1 = vadd.f32 %v8330_v10, %v7939_v12  ;;  %v3900_v12 = vadd.f32 %v8330_v10, %v7945_v20 }
 0x317   : > { %v4377_v41 = vpop.permute.xlu0 %4376  ;;  %v8484_v19 = vpop.permute.xlu1 %4134  ;;  %v4058_v47 = vadd.f32 %v8176_v43, %v3898_v1  ;;  %v4189_v43 = vadd.f32 %v8219_v53, %v4059_v23  ;;  %v4060_v16 = vadd.f32 %v8196_v33, %v3900_v12  ;;  %v3914_v53 = vadd.f32 %v8330_v10, %v8123_v29  ;;  %v9155_v23 = vld [vmem:[#allocation25_spill] sm:$0xff] }
 0x318   : > { %v8486_v51 = vadd.f32 %v4377_v41, %v4330_v13  ;;  %v9158_v29 = vld [vmem:[#allocation5_spill] sm:$0xff] }
 0x319   : > { %v4319_v57 = vadd.f32 %v8262_v6, %v4189_v43 }
 0x31b   : > { %v4379_v28 = vpop.permute.xlu0 %4378  ;;  %v8488_v55 = vpop.permute.xlu1 %4260  ;;  %v4449_v20 = vadd.f32 %v8303_v32, %v4319_v57  ;;  %v9157_v32 = vld [vmem:[#allocation51_spill] sm:$0xff] }
 0x31c   : > { %v8490_v45 = vadd.f32 %v4379_v28, %v4331_v14  ;;  %v4188_v14 = vadd.f32 %v8206_v60, %v4058_v47  ;;  %v4190_v47 = vadd.f32 %v8232_v39, %v4060_v16  ;;  %v9156_v16 = vld [vmem:[#allocation7_spill] sm:$0xff] }
 0x31e   : > { %v4318_v41 = vadd.f32 %v8248_v27, %v4188_v14  ;;  %v3901_v27 = vadd.f32 %v8330_v10, %v7950_v5  ;;  %v4320_v33 = vadd.f32 %v8279_v31, %v4190_v47  ;;  %v4074_v14 = vadd.f32 %v8428_v21, %v3914_v53  ;;  %v9160_v47 = vld [vmem:[#allocation28_spill] sm:$0xff] }
 0x31f   : > { %v8492_v63 = vpop.permute.xlu0 %4002  ;;  %v8494_v50 = vpop.permute.xlu1 %4388  ;;  %v3902_v5 = vadd.f32 %v8330_v10, %v9155_v23  ;;  %v3903_v21 = vadd.f32 %v8330_v10, %v9160_v47  ;;  %v9162_v23 = vld [vmem:[#allocation15_spill] sm:$0xff] }
 0x320   : > { %v4448_v1 = vadd.f32 %v8292_v56, %v4318_v41  ;;  %v4061_v56 = vadd.f32 %v8210_v59, %v3901_v27  ;;  %v4450_v41 = vadd.f32 %v9157_v32, %v4320_v33  ;;  %v4204_v12 = vadd.f32 %v4125_v36, %v4074_v14  ;;  %v9159_v59 = vld [vmem:[#allocation13_spill] sm:$0xff]  ;;  %v9164_v36 = vld [vmem:[#allocation6_spill] sm:$0xff] }
 0x321   : > { %v4062_v43 = vadd.f32 %v9158_v29, %v3902_v5  ;;  %v4063_v14 = vadd.f32 %v9164_v36, %v3903_v21  ;;  %v9165_v5 = vld [vmem:[#allocation50_spill] sm:$0xff]  ;;  %v9166_v29 = vld [vmem:[#allocation9_spill] sm:$0xff] }
 0x322   : > { %v4191_v39 = vadd.f32 %v9156_v16, %v4061_v56  ;;  %v9163_v56 = vld [vmem:[#allocation43_spill] sm:$0xff]  ;;  %v9167_v21 = vld [vmem:[#allocation14_spill] sm:$0xff] }
 0x323   : > { %v4129_v54 = vpop.permute.xlu0 %4128  ;;  %v8496_v62 = vpop.permute.xlu1 %4012  ;;  %v3916_v33 = vadd.f32 %v8330_v10, %v9163_v56 }
 0x327   : > { %v4255_v3 = vpop.permute.xlu0 %4254  ;;  %v8501_v13 = vpop.permute.xlu1 %4138 }
 0x328   : > { %v4334_v27 = vadd.f32 %v4255_v3, %v4204_v12  ;;  %v4205_v3 = vadd.f32 %v8436_v42, %v8408_v11 }
 0x32a   : > { %v4464_v12 = vadd.f32 %v8472_v4, %v4334_v27 }
 0x32b   : > { %v8508_v28 = vpop.permute.xlu0 %4380  ;;  %v8510_v61 = vpop.permute.xlu1 %4264 }
 0x32f   : > { %v8518_v60 = vpop.permute.xlu0 %4382  ;;  %v8520_v18 = vpop.permute.xlu1 %4392  ;;  %4480 = vxpose.xlu0.b32.start [1/16] (narrow) %v4448_v1, 24  ;;  %v4321_v1 = vadd.f32 %v9159_v59, %v4191_v39 }
 0x331   : > { %v4451_v34 = vadd.f32 %v9162_v23, %v4321_v1  ;;  %v4335_v1 = vadd.f32 %v8466_v52, %v4205_v3 }
 0x333   : > { %v8530_v6 = vpop.permute.xlu0 %4006  ;;  %v8532_v24 = vpop.permute.xlu1 %4016  ;;  %4481 = vxpose.xlu0.b32.cont [2/16] (narrow) %v4449_v20, 24  ;;  %v9161_v20 = vld [vmem:[#allocation8_spill] sm:$0xff] }
 0x334   : > { %v4192_v53 = vadd.f32 %v9161_v20, %v4062_v43  ;;  %v4193_v43 = vadd.f32 %v9166_v29, %v4063_v14 }
 0x336   : > { %v4322_v16 = vadd.f32 %v9165_v5, %v4192_v53  ;;  %v4323_v20 = vadd.f32 %v9167_v21, %v4193_v43 }
 0x337   : > { %v4133_v31 = vpop.permute.xlu0 %4132  ;;  %v8541_v57 = vpop.permute.xlu1 %4142  ;;  %4482 = vxpose.xlu0.b32.cont [3/16] (narrow) %v4450_v41, 24  ;;  %v4076_v41 = vadd.f32 %v8464_v38, %v3916_v33 }
 0x338   : > { %v4452_v59 = vadd.f32 %v8354_v37, %v4322_v16  ;;  %v4453_v11 = vadd.f32 %v8362_v46, %v4323_v20  ;;  %v4207_v46 = vadd.f32 %v8456_v22, %v8430_v49 }
 0x339   : > { %v4206_v47 = vadd.f32 %v4129_v54, %v4076_v41  ;;  %v9168_v54 = vld [vmem:[#allocation29_spill] sm:$0xff] }
 0x33a   : > { %v3918_v27 = vadd.f32 %v8330_v10, %v9168_v54 }
 0x33b   : > { %v4259_v39 = vpop.permute.xlu0 %4258  ;;  %v8551_v32 = vpop.permute.xlu1 %4268  ;;  %4483 = vxpose.xlu0.b32.cont [4/16] (narrow) %v4451_v34, 24 }
 0x33c   : > { %v4336_v34 = vadd.f32 %v4259_v39, %v4206_v47  ;;  %v4078_v14 = vadd.f32 %v8492_v63, %v3918_v27 }
 0x33e   : > { %4512 = vxpose.xlu1.b32.start [1/16] (narrow) %v4464_v12, 24  ;;  %v4466_v37 = vadd.f32 %v8494_v50, %v4336_v34  ;;  %v4337_v50 = vadd.f32 %v8488_v55, %v4207_v46  ;;  %v4208_v5 = vadd.f32 %v4133_v31, %v4078_v14  ;;  %v9169_v55 = vld [vmem:[#allocation44_spill] sm:$0xff] }
 0x33f   : > { %v4387_v53 = vpop.permute.xlu0 %4386  ;;  %v4397_v23 = vpop.permute.xlu1 %4396  ;;  %4484 = vxpose.xlu0.b32.cont [5/16] (narrow) %v4452_v59, 24  ;;  %v3919_v63 = vadd.f32 %v8330_v10, %v9169_v55  ;;  %v9170_v31 = vld [vmem:[#allocation36_spill] sm:$0xff] }
 0x340   : > { %v4465_v56 = vadd.f32 %v4387_v53, %v4335_v1  ;;  %v3920_v29 = vadd.f32 %v8330_v10, %v9170_v31 }
 0x342   : > { %4513 = vxpose.xlu1.b32.cont [2/16] (narrow) %v4465_v56, 24 }
 0x343   : > { %v4011_v42 = vpop.permute.xlu0 %4010  ;;  %v8562_v38 = vpop.permute.xlu1 %4020  ;;  %4485 = vxpose.xlu0.b32.cont [6/16] (narrow) %v4453_v11, 24 }
 0x346   : > { %4514 = vxpose.xlu1.b32.cont [3/16] (narrow) %v4466_v37, 24  ;;  %v3922_v37 = vadd.f32 %v8330_v10, %v8242_v0 }
 0x347   : > { %v4137_v52 = vpop.permute.xlu0 %4136  ;;  %v8565_v4 = vpop.permute.xlu1 %4146  ;;  %4486 = vxpose.xlu0.b32.cont [7/16] (narrow) %v8382_v17, 24 }
 0x34b   : > { %v4263_v33 = vpop.permute.xlu0 %4262  ;;  %v8570_v36 = vpop.permute.xlu1 %4272  ;;  %4487 = vxpose.xlu0.b32.cont [8/16] (narrow) %v8390_v44, 24 }
 0x34c   : > { %v4338_v17 = vadd.f32 %v4263_v33, %v4208_v5 }
 0x34e   : > { %v4468_v44 = vadd.f32 %v8520_v18, %v4338_v17  ;;  %v4080_v18 = vadd.f32 %v8530_v6, %v3920_v29  ;;  %v4462_v6 = vadd.f32 %v8508_v28, %v8480_v2 }
 0x34f   : > { %v4391_v16 = vpop.permute.xlu0 %4390  ;;  %v4399_v39 = vpop.permute.xlu1 %4398  ;;  %4488 = vxpose.xlu0.b32.cont [9/16] (narrow) %v8414_v40, 24  ;;  %v4079_v40 = vadd.f32 %v8448_v26, %v3919_v63  ;;  %v9171_v26 = vld [vmem:[#allocation47_spill] sm:$0xff] }
 0x350   : > { %v4467_v3 = vadd.f32 %v4391_v16, %v4337_v50  ;;  %v3921_v20 = vadd.f32 %v8330_v10, %v9171_v26 }
 0x352   : > { %4515 = vxpose.xlu1.b32.cont [4/16] (narrow) %v4467_v3, 24  ;;  %v4081_v56 = vadd.f32 %v8478_v58, %v3921_v20  ;;  %v4082_v58 = vadd.f32 %v4011_v42, %v3922_v37 }
 0x353   : > { %v4015_v41 = vpop.permute.xlu0 %4014  ;;  %v4401_v12 = vpop.permute.xlu1 %4400  ;;  %4489 = vxpose.xlu0.b32.cont [10/16] (narrow) %v8420_v25, 24  ;;  %v4209_v25 = vadd.f32 %v8484_v19, %v4079_v40  ;;  %v9172_v40 = vld [vmem:[#allocation37_spill] sm:$0xff] }
 0x354   : > { %v4211_v19 = vadd.f32 %v8501_v13, %v4081_v56  ;;  %v3923_v13 = vadd.f32 %v8330_v10, %v8258_v35 }
 0x355   : > { %v4339_v1 = vadd.f32 %v8510_v61, %v4209_v25 }
 0x356   : > { %4516 = vxpose.xlu1.b32.cont [5/16] (narrow) %v4468_v44, 24  ;;  %v3926_v44 = vadd.f32 %v8330_v10, %v8143_v8 }
 0x357   : > { %v4141_v49 = vpop.permute.xlu0 %4140  ;;  %v8580_v22 = vpop.permute.xlu1 %4024  ;;  %4490 = vxpose.xlu0.b32.cont [11/16] (narrow) %v8450_v7, 24  ;;  %v4210_v7 = vadd.f32 %v4137_v52, %v4080_v18  ;;  %v9173_v18 = vld [vmem:[#allocation41_spill] sm:$0xff] }
 0x35b   : > { %v4267_v43 = vpop.permute.xlu0 %4266  ;;  %v8588_v59 = vpop.permute.xlu1 %4150  ;;  %4491 = vxpose.xlu0.b32.cont [12/16] (narrow) %v8458_v15, 24 }
 0x35c   : > { %v4340_v53 = vadd.f32 %v4267_v43, %v4210_v7 }
 0x35e   : > { %v4470_v61 = vadd.f32 %v4397_v23, %v4340_v53  ;;  %v4212_v23 = vadd.f32 %v4141_v49, %v4082_v58 }
 0x35f   : > { %v4395_v47 = vpop.permute.xlu0 %4394  ;;  %v4277_v21 = vpop.permute.xlu1 %4276  ;;  %4492 = vxpose.xlu0.b32.cont [13/16] (narrow) %v8486_v51, 24  ;;  %v4341_v51 = vadd.f32 %v8551_v32, %v4211_v19  ;;  %v4083_v32 = vadd.f32 %v8496_v62, %v3923_v13  ;;  %v3925_v62 = vadd.f32 %v8330_v10, %v8301_v9  ;;  %v3927_v9 = vadd.f32 %v8330_v10, %v9172_v40 }
 0x360   : > { %v4469_v34 = vadd.f32 %v4395_v47, %v4339_v1 }
 0x361   : > { %v4471_v27 = vadd.f32 %v4399_v39, %v4341_v51  ;;  %v4213_v33 = vadd.f32 %v8541_v57, %v4083_v32  ;;  %v4085_v3 = vadd.f32 %v8532_v24, %v3925_v62  ;;  %v4087_v24 = vadd.f32 %v8562_v38, %v3927_v9 }
 0x362   : > { %4517 = vxpose.xlu1.b32.cont [6/16] (narrow) %v4469_v34, 24  ;;  %v9174_v34 = vld [vmem:[#allocation49_spill] sm:$0xff] }
 0x363   : > { %v4019_v15 = vpop.permute.xlu0 %4018  ;;  %v4403_v11 = vpop.permute.xlu1 %4402  ;;  %4493 = vxpose.xlu0.b32.cont [14/16] (narrow) %v8490_v45, 24  ;;  %v4463_v45 = vadd.f32 %v8518_v60, %v8442_v48  ;;  %v4343_v50 = vadd.f32 %v8570_v36, %v4213_v33  ;;  %v3924_v48 = vadd.f32 %v8330_v10, %v8288_v30  ;;  %v4215_v36 = vadd.f32 %v8565_v4, %v4085_v3 }
 0x364   : > { %v3928_v4 = vadd.f32 %v8330_v10, %v9173_v18  ;;  %v4217_v8 = vadd.f32 %v8588_v59, %v4087_v24  ;;  %v3929_v56 = vadd.f32 %v8330_v10, %v9174_v34 }
 0x365   : > { %v4473_v35 = vadd.f32 %v4403_v11, %v4343_v50  ;;  %v4084_v16 = vadd.f32 %v4015_v41, %v3924_v48  ;;  %v4345_v63 = vadd.f32 %v4277_v21, %v4215_v36  ;;  %v4086_v41 = vadd.f32 %v4019_v15, %v3926_v44 }
 0x366   : > { %4518 = vxpose.xlu1.b32.cont [7/16] (narrow) %v4470_v61, 24  ;;  %v4089_v11 = vadd.f32 %v8580_v22, %v3929_v56 }
 0x367   : > { %v4145_v52 = vpop.permute.xlu0 %4144  ;;  %v4405_v54 = vpop.permute.xlu1 %4404  ;;  %4494 = vxpose.xlu0.b32.cont [15/16] (narrow) %v4462_v6, 24 }
 0x368   : > { %v4214_v39 = vadd.f32 %v4145_v52, %v4084_v16 }
 0x36a   : > { %4519 = vxpose.xlu1.b32.cont [8/16] (narrow) %v4471_v27, 24 }
 0x36b   : > { %v4271_v2 = vpop.permute.xlu0 %4270  ;;  %v4155_v28 = vpop.permute.xlu1 %4154  ;;  %4495 = vxpose.xlu0.b32.end [16/16] (narrow) %v4463_v45, 24 }
 0x36c   : > { %v4342_v0 = vadd.f32 %v4271_v2, %v4212_v23  ;;  %v4219_v19 = vadd.f32 %v4155_v28, %v4089_v11 }
 0x36e   : > { %v4472_v46 = vadd.f32 %v4401_v12, %v4342_v0 }
 0x36f   : > { %v4023_v14 = vpop.permute.xlu0 %4022  ;;  %v4281_v42 = vpop.permute.xlu1 %4280 }
 0x370   : > { %4520 = vxpose.xlu1.b32.cont [9/16] (narrow) %v4472_v46, 24  ;;  %v4088_v7 = vadd.f32 %v4023_v14, %v3928_v4  ;;  %v4347_v26 = vadd.f32 %v4281_v42, %v4217_v8 }
 0x373   : > { %v4149_v60 = vpop.permute.xlu0 %4148  ;;  %v4407_v5 = vpop.permute.xlu1 %4406 }
 0x374   : > { %4521 = vxpose.xlu1.b32.cont [10/16] (narrow) %v4473_v35, 24  ;;  %v4216_v31 = vadd.f32 %v4149_v60, %v4086_v41  ;;  %v4475_v29 = vadd.f32 %v4407_v5, %v4345_v63 }
 0x377   : > { %v4275_v17 = vpop.permute.xlu0 %4274  ;;  %v4409_v57 = vpop.permute.xlu1 %4408 }
 0x378   : > { %v4344_v12 = vadd.f32 %v4275_v17, %v4214_v39 }
 0x37a   : > { %v4474_v30 = vadd.f32 %v4405_v54, %v4344_v12 }
 0x37b   : > { %v4153_v49 = vpop.permute.xlu0 %4152  ;;  %v4285_v55 = vpop.permute.xlu1 %4284 }
 0x37c   : > { %4522 = vxpose.xlu1.b32.cont [11/16] (narrow) %v4474_v30, 24  ;;  %v4218_v20 = vadd.f32 %v4153_v49, %v4088_v7  ;;  %v4349_v59 = vadd.f32 %v4285_v55, %v4219_v19 }
 0x37f   : > { %v4279_v43 = vpop.permute.xlu0 %4278  ;;  %v4411_v25 = vpop.permute.xlu1 %4410 }
 0x380   : > { %v4346_v1 = vadd.f32 %v4279_v43, %v4216_v31  ;;  %4523 = vxpose.xlu1.b32.cont [12/16] (narrow) %v4475_v29, 24  ;;  %v4477_v15 = vadd.f32 %v4411_v25, %v4347_v26 }
 0x382   : > { %v4476_v47 = vadd.f32 %v4409_v57, %v4346_v1 }
 0x383   : > { %v4283_v21 = vpop.permute.xlu0 %4282  ;;  %v4413_v53 = vpop.permute.xlu1 %4412 }
 0x384   : > { %4524 = vxpose.xlu1.b32.cont [13/16] (narrow) %v4476_v47, 24  ;;  %v4348_v38 = vadd.f32 %v4283_v21, %v4218_v20 }
 0x386   : > { %v4478_v61 = vadd.f32 %v4413_v53, %v4348_v38 }
 0x387   : > { %v4415_v6 = vpop.permute.xlu1 %4414 }
 0x388   : > { %4525 = vxpose.xlu1.b32.cont [14/16] (narrow) %v4477_v15, 24  ;;  %v4479_v51 = vadd.f32 %v4415_v6, %v4349_v59 }
 0x38c   : > { %4526 = vxpose.xlu1.b32.cont [15/16] (narrow) %v4478_v61, 24 }
 0x390   : > { %4527 = vxpose.xlu1.b32.end [16/16] (narrow) %v4479_v51, 24 }
 0x3ab   : > { %v4496_v37 = vpop.trf.xlu0 }
 0x3ac   : > { %4544 = vst [vmem:[%s163_s25] sm:$0xff] %v4496_v37 }
 0x3af   : > { %v4497_v52 = vpop.trf.xlu0 }
 0x3b0   : > { %4546 = vst [vmem:[%s163_s25 + $0x10] sm:$0xff] %v4497_v52 }
 0x3b3   : > { %v4498_v10 = vpop.trf.xlu0 }
 0x3b4   : > { %4548 = vst [vmem:[%s163_s25 + $0x20] sm:$0xff] %v4498_v10 }
 0x3d0   : > { %v4528_v22 = vpop.trf.xlu1 }
 0x3d1   : > { %4545 = vst [vmem:[%s163_s25 + $0x8] sm:$0xff] %v4528_v22 }
 0x3d4   : > { %v4529_v54 = vpop.trf.xlu1 }
 0x3d5   : > { %4547 = vst [vmem:[%s163_s25 + $0x18] sm:$0xff] %v4529_v54 }
 0x3d8   : > { %v4530_v58 = vpop.trf.xlu1 }
 0x3d9   : > { %4549 = vst [vmem:[%s163_s25 + $0x28] sm:$0xff] %v4530_v58 }
 0x3da   : > { %5389 = shalt.err (!%p5386_p3)
}
 0x3db   : > { %s5390_s9 = scalar_lea.hbm %s8636_s30, 768  ;;  %s5394_s11 = scalar_lea.hbm %s8681_s3, 1536 }
 0x3dc   : > { %p5391_p4 = scmp.ne.s32.totalorder %s8636_s30, %s5390_s9  ;;  %p5395_p9 = scmp.lt.s32.totalorder %s8636_s30, %s8681_s3 }
 0x3dd   : > { %p5396_p10 = scmp.lt.s32.totalorder %s5394_s11, %s5390_s9 }
 0x3de   : > { %p5392_p7 = pnand %p5391_p4, %p5504_p5 }
 0x3df   : > { %p5397_p11 = por %p5396_p10, %p5395_p9 }
 0x3e0   : > { %p5393_p8 = pneg %p5392_p7 }
 0x3e2   : > { %p5398_p12 = pnand %p5397_p11, %p5393_p8 }
 0x3e4   : > { %5401 = shalt.err (!%p5398_p12)
}
 0x3e5   : > { %s5444_s20 = smov 256   ;;  %s5445_s24 = smov 16  }
 0x3e6   : > { %5118 = dma.vmem_to_hbm [thread:$0]  (%p5504_p5), %s8631_s27, 768, %s8636_s30, %s8638_s4, %s5444_s20, %s5444_s20, %s5445_s24  }
 0x3e7 PF: > { %p5124_p13 = scmp.ge.s32.totalorder %s5436_s15, 2  ;;  %s4579_s25 = sand.u32 1, %s5424_s12  }
 0x3e8   : > { %s4580_s26 = scalar_lea.sflag [#allocation3], %s4579_s25 }
 0x3e9   : > { %p5121_p0 = pnand %p5124_p13, %p5508_p6 }
 0x3eb   : > { %p5122_p1 = pneg %p5121_p0 }
 0x3ed   : > { %5419 = dma.done.wait (%p5122_p1), %s4580_s26, 768  }
 0x3ee   : > { %5421 = vsyncadd (%p5122_p1), %s4580_s26, 4294966528  ;;  %p13_p2 = scmp.ge.s32.totalorder %s5491_s18, 4   ;;  %s9175_s12 = smov %s5428_s13 }
 0x3ef   : > { %s9176_s13 = smov %s5432_s14  ;;  %s9177_s14 = smov %s5502_s21 }
 0x3f0   : > { %s9178_s15 = smov %s5491_s18  ;;  %15 = sbr.rel (!%p13_p2) target bundleno = 3 (0x3), region = 71 }
 0x3f5   :  { %4585 = vsyncpa [#allocation3], 1 }
 0x3f6   :  { %4587 = vsyncpa [#allocation3 + $0x1], 1 }

</bundles_post_ra>
